<compile_context>
chip_gen: v7x
topology: tpu7x:2x2x1
jax: 0.10.0
libtpu: 0.0.40
codegen_flags: <defaults>
</compile_context>

<pallas_src>
import jax
import jax.numpy as jnp
from jax.experimental import pallas as pl
from jax.experimental.pallas import tpu as pltpu

_BN_EPS = 1e-5

# (Cin, Cout) for conv0..conv9 of NetConnect_3
_LAYER_DIMS = [(3, 64), (64, 64), (64, 64), (64, 64), (64, 64),
               (64 * 5, 256), (256, 64), (64, 16), (16, 4), (4, 2)]
_C_MAX = 256          # widest layer (for the packed bias/gamma/beta array)
_SKIP_C = 64          # channel width of conv0..conv4 (skip branches)


# ----------------------------------------------------------------------------
# Fused Pallas kernel: whole network in one call
# ----------------------------------------------------------------------------
def _netconnect3_fused_kernel(adj_ref, x_ref, w0_ref, w14_ref, w5_ref,
                              w6_ref, w7_ref, w8_ref, w9_ref, bgb_ref,
                              out_ref):
    f32 = jnp.float32
    bf16 = jnp.bfloat16

    # adjacency is loaded from VMEM once and stays resident (f32 + bf16
    # copies) for all 10 layers -- no per-layer reload.
    adj_f = adj_ref[...]
    adj_b = adj_f.astype(bf16)

    def mm(a, b, use_bf16=True):
        if use_bf16:
            a = a.astype(bf16)
            b = b.astype(bf16)
        return jnp.dot(a, b, preferred_element_type=f32)

    def sigmoid_bn(h, layer, c):
        """bias add + sigmoid + BatchNorm1d (training-mode batch stats)."""
        blk = bgb_ref[layer]                 # (3, C_MAX): [bias; gamma; beta]
        bias = blk[0:1, :c]
        gamma = blk[1:2, :c]
        beta = blk[2:3, :c]
        # sigmoid: exp + approx reciprocal both run on the (otherwise idle)
        # EUP slot instead of a VPU Newton divide.
        h = pl.reciprocal(1.0 + jnp.exp(-(h + bias)), approx=True)
        mean = jnp.mean(h, axis=0, keepdims=True)
        diff = h - mean
        var = jnp.mean(diff * diff, axis=0, keepdims=True)
        scale = gamma * jax.lax.rsqrt(var + _BN_EPS)   # fold gamma into scale
        return diff * scale + beta

    # ---- conv0 : Cin=3 < Cout=64  ->  (A_hat @ X) @ W0 (cheaper order) ----
    ax = jnp.dot(adj_f, x_ref[...], preferred_element_type=f32)   # (N, 3)
    h = jnp.dot(ax, w0_ref[...], preferred_element_type=f32)      # (N, 64)
    h = sigmoid_bn(h, 0, 64)
    parts = [h]                              # part0 .. part4 in order

    # ---- conv1..conv4 (64 -> 64), packed (4, 64, 64) weights ----
    for i in range(1, 5):
        xw = mm(h, w14_ref[i - 1])
        h = mm(adj_b, xw)
        h = sigmoid_bn(h, i, 64)
        parts.append(h)

    # ---- conv5 : cat(part4, part3, part2, part1, part0) (N, 320) -> 256 ----
    # W5 is pre-split into (5, 64, 256); block i multiplies part(4 - i),
    # so   cat @ W5  ==  sum_i  part_(4-i) @ W5[i]   (no concat materialized).
    xw = mm(parts[4], w5_ref[0])
    for i in range(1, 5):
        xw = xw + mm(parts[4 - i], w5_ref[i])
    h = mm(adj_b, xw)
    h = sigmoid_bn(h, 5, 256)

    # ---- conv6..conv9 ----
    tail = [(w6_ref, 6, 64, True),       # conv6: 256 -> 64
            (w7_ref, 7, 16, True),       # conv7: 64 -> 16 (synthesized)
            (w8_ref, 8, 4, False),       # conv8: 16 -> 4  (tiny -> keep f32)
            (w9_ref, 9, 2, False)]       # conv9: 4 -> 2   (tiny -> keep f32)
    for w_ref, layer, c_out, use_bf16 in tail:
        xw = mm(h, w_ref[...], use_bf16)
        h = mm(adj_b if use_bf16 else adj_f, xw, use_bf16)
        h = sigmoid_bn(h, layer, c_out)

    # ---- softmax over channels (dim=1), fused into the epilogue ----
    m = jnp.max(h, axis=1, keepdims=True)
    e = jnp.exp(h - m)
    out_ref[...] = e / jnp.sum(e, axis=1, keepdims=True)


# ----------------------------------------------------------------------------
# Wrapper: single pallas_call, everything in VMEM
# ----------------------------------------------------------------------------
def netconnect3_forward(params, adj, x):
    n = x.shape[0]
    vmem = pl.BlockSpec(memory_space=pltpu.MemorySpace.VMEM)
    return pl.pallas_call(
        _netconnect3_fused_kernel,
        out_shape=jax.ShapeDtypeStruct((n, _LAYER_DIMS[-1][1]), jnp.float32),
        in_specs=[vmem] * 10,
        out_specs=vmem,
    )(adj, x, params["w0"], params["w1_4"], params["w5"], params["w6"],
      params["w7"], params["w8"], params["w9"], params["bgb"])


# ----------------------------------------------------------------------------
# Glue: graph normalization + parameter init (deterministic, in-script)
# ----------------------------------------------------------------------------
def normalized_adjacency(edge_index, num_nodes):
    """Dense GCN normalization  D^-1/2 (A + I) D^-1/2  (float32, (N, N))."""
    src, dst = edge_index[0], edge_index[1]
    a = jnp.zeros((num_nodes, num_nodes), jnp.float32)
    a = a.at[dst, src].set(1.0)                       # messages flow src -> dst
    a = a + jnp.eye(num_nodes, dtype=jnp.float32)     # self loops
    deg = jnp.sum(a, axis=1)
    d_inv_sqrt = jnp.where(deg > 0, jax.lax.rsqrt(deg), 0.0)
    return a * d_inv_sqrt[:, None] * d_inv_sqrt[None, :]


def init_params(key):
    ws = []
    for (c_in, c_out) in _LAYER_DIMS:
        key, wk = jax.random.split(key)
        limit = jnp.sqrt(6.0 / (c_in + c_out))        # glorot uniform
        ws.append(jax.random.uniform(wk, (c_in, c_out), jnp.float32,
                                     -limit, limit))
    # bias / BN-gamma / BN-beta packed as (layer, {b, gamma, beta}, C_MAX)
    bgb = jnp.zeros((10, 3, _C_MAX), jnp.float32)
    bgb = bgb.at[:, 1, :].set(1.0)                    # gamma = 1
    return {
        "w0": ws[0],                                  # (3, 64)
        "w1_4": jnp.stack(ws[1:5]),                   # (4, 64, 64)
        # conv5 weight pre-split into 64-row blocks: block i <-> part(4 - i)
        "w5": ws[5].reshape(5, _SKIP_C, 256),         # (5, 64, 256)
        "w6": ws[6], "w7": ws[7], "w8": ws[8], "w9": ws[9],
        "bgb": bgb,                                   # (10, 3, 256)
    }


# ----------------------------------------------------------------------------
if __name__ == "__main__":
    key = jax.random.PRNGKey(0)

    num_nodes = 64
    idx = jnp.arange(num_nodes)
    # symmetric ring graph + a few deterministic chords
    src = jnp.concatenate([idx, (idx + 1) % num_nodes,
                           idx, (idx + 7) % num_nodes])
    dst = jnp.concatenate([(idx + 1) % num_nodes, idx,
                           (idx + 7) % num_nodes, idx])
    edge_index = jnp.stack([src, dst]).astype(jnp.int32)

    key, xk = jax.random.split(key)
    x = jax.random.normal(xk, (num_nodes, 3), dtype=jnp.float32)

    adj = normalized_adjacency(edge_index, num_nodes)
    params = init_params(key)

    out = jax.jit(netconnect3_forward)(params, adj, x)
    out = jax.block_until_ready(out)

    assert out.shape == (num_nodes, 2)
    assert not bool(jnp.any(jnp.isnan(out)))
    # rows of a softmax must sum to 1
    assert jnp.allclose(jnp.sum(out, axis=1), 1.0, atol=1e-5)
    print("KERNEL_OK")
</pallas_src>

<mosaic_0001>
module attributes {stable_mosaic.version = 11 : i64} {
  func.func @_netconnect3_fused_kernel(%arg0: memref<64x64xf32, #tpu.memory_space<vmem>>, %arg1: memref<64x3xf32, #tpu.memory_space<vmem>>, %arg2: memref<3x64xf32, #tpu.memory_space<vmem>>, %arg3: memref<4x64x64xf32, #tpu.memory_space<vmem>>, %arg4: memref<5x64x256xf32, #tpu.memory_space<vmem>>, %arg5: memref<256x64xf32, #tpu.memory_space<vmem>>, %arg6: memref<64x16xf32, #tpu.memory_space<vmem>>, %arg7: memref<16x4xf32, #tpu.memory_space<vmem>>, %arg8: memref<4x2xf32, #tpu.memory_space<vmem>>, %arg9: memref<10x3x256xf32, #tpu.memory_space<vmem>>, %arg10: memref<64x2xf32, #tpu.memory_space<vmem>>) attributes {dimension_semantics = [], scalar_prefetch = 0 : i64, scratch_operands = 0 : i64, tpu.core_type = #tpu.core_type<tc>} {
    %c0 = arith.constant 0 : index
    %c0_0 = arith.constant 0 : index
    %0 = vector.load %arg0[%c0, %c0_0] : memref<64x64xf32, #tpu.memory_space<vmem>>, vector<64x64xf32>
    %1 = arith.truncf %0 : vector<64x64xf32> to vector<64x64xbf16>
    %c0_1 = arith.constant 0 : index
    %c0_2 = arith.constant 0 : index
    %2 = vector.load %arg1[%c0_1, %c0_2] : memref<64x3xf32, #tpu.memory_space<vmem>>, vector<64x3xf32>
    %cst = arith.constant dense<0.000000e+00> : vector<64x3xf32>
    %3 = tpu.matmul %0, %2, %cst {dimension_numbers = #tpu.dot_dimension_numbers<[1], [0], [0], [1], [0, 0, 1, 1], [], []>} : vector<64x64xf32>, vector<64x3xf32>, vector<64x3xf32> -> vector<64x3xf32>
    %c0_3 = arith.constant 0 : index
    %c0_4 = arith.constant 0 : index
    %4 = vector.load %arg2[%c0_3, %c0_4] : memref<3x64xf32, #tpu.memory_space<vmem>>, vector<3x64xf32>
    %cst_5 = arith.constant dense<0.000000e+00> : vector<64x64xf32>
    %5 = tpu.matmul %3, %4, %cst_5 {dimension_numbers = #tpu.dot_dimension_numbers<[1], [0], [0], [1], [0, 0, 1, 1], [], []>} : vector<64x3xf32>, vector<3x64xf32>, vector<64x64xf32> -> vector<64x64xf32>
    %c0_6 = arith.constant 0 : index
    %c0_7 = arith.constant 0 : index
    %c0_8 = arith.constant 0 : index
    %6 = vector.load %arg9[%c0_6, %c0_7, %c0_8] : memref<10x3x256xf32, #tpu.memory_space<vmem>>, vector<1x3x256xf32>
    %7 = vector.shape_cast %6 : vector<1x3x256xf32> to vector<3x256xf32>
    %8 = vector.extract_strided_slice %7 {offsets = [0, 0], sizes = [1, 64], strides = [1, 1]} : vector<3x256xf32> to vector<1x64xf32>
    %9 = vector.extract_strided_slice %7 {offsets = [1, 0], sizes = [1, 64], strides = [1, 1]} : vector<3x256xf32> to vector<1x64xf32>
    %10 = vector.extract_strided_slice %7 {offsets = [2, 0], sizes = [1, 64], strides = [1, 1]} : vector<3x256xf32> to vector<1x64xf32>
    %11 = vector.broadcast %8 : vector<1x64xf32> to vector<64x64xf32>
    %12 = arith.addf %5, %11 : vector<64x64xf32>
    %cst_9 = arith.constant 0.000000e+00 : f32
    %13 = vector.broadcast %cst_9 : f32 to vector<64x64xf32>
    %14 = arith.subf %13, %12 : vector<64x64xf32>
    %15 = math.exp %14 : vector<64x64xf32>
    %cst_10 = arith.constant 1.000000e+00 : f32
    %16 = vector.broadcast %cst_10 : f32 to vector<64x64xf32>
    %17 = arith.addf %16, %15 : vector<64x64xf32>
    %18 = tpu.reciprocal %17 {approx = true} : vector<64x64xf32> -> vector<64x64xf32>
    %cst_11 = arith.constant dense<0.000000e+00> : vector<64xf32>
    %19 = vector.multi_reduction <add>, %18, %cst_11 [0] : vector<64x64xf32> to vector<64xf32>
    %20 = vector.shape_cast %19 : vector<64xf32> to vector<1x64xf32>
    %cst_12 = arith.constant 6.400000e+01 : f32
    %21 = vector.broadcast %cst_12 : f32 to vector<1x64xf32>
    %22 = arith.divf %20, %21 : vector<1x64xf32>
    %23 = vector.broadcast %22 : vector<1x64xf32> to vector<64x64xf32>
    %24 = arith.subf %18, %23 : vector<64x64xf32>
    %25 = arith.mulf %24, %24 : vector<64x64xf32>
    %cst_13 = arith.constant dense<0.000000e+00> : vector<64xf32>
    %26 = vector.multi_reduction <add>, %25, %cst_13 [0] : vector<64x64xf32> to vector<64xf32>
    %27 = vector.shape_cast %26 : vector<64xf32> to vector<1x64xf32>
    %cst_14 = arith.constant 6.400000e+01 : f32
    %28 = vector.broadcast %cst_14 : f32 to vector<1x64xf32>
    %29 = arith.divf %27, %28 : vector<1x64xf32>
    %cst_15 = arith.constant 9.99999974E-6 : f32
    %30 = vector.broadcast %cst_15 : f32 to vector<1x64xf32>
    %31 = arith.addf %29, %30 : vector<1x64xf32>
    %32 = math.rsqrt %31 : vector<1x64xf32>
    %33 = arith.mulf %9, %32 : vector<1x64xf32>
    %34 = vector.broadcast %33 : vector<1x64xf32> to vector<64x64xf32>
    %35 = arith.mulf %24, %34 : vector<64x64xf32>
    %36 = vector.broadcast %10 : vector<1x64xf32> to vector<64x64xf32>
    %37 = arith.addf %35, %36 : vector<64x64xf32>
    %c0_16 = arith.constant 0 : index
    %c0_17 = arith.constant 0 : index
    %c0_18 = arith.constant 0 : index
    %38 = vector.load %arg3[%c0_16, %c0_17, %c0_18] : memref<4x64x64xf32, #tpu.memory_space<vmem>>, vector<1x64x64xf32>
    %39 = vector.shape_cast %38 : vector<1x64x64xf32> to vector<64x64xf32>
    %40 = arith.truncf %37 : vector<64x64xf32> to vector<64x64xbf16>
    %41 = arith.truncf %39 : vector<64x64xf32> to vector<64x64xbf16>
    %cst_19 = arith.constant dense<0.000000e+00> : vector<64x64xf32>
    %42 = tpu.matmul %40, %41, %cst_19 {dimension_numbers = #tpu.dot_dimension_numbers<[1], [0], [0], [1], [0, 0, 1, 1], [], []>} : vector<64x64xbf16>, vector<64x64xbf16>, vector<64x64xf32> -> vector<64x64xf32>
    %43 = arith.truncf %42 : vector<64x64xf32> to vector<64x64xbf16>
    %cst_20 = arith.constant dense<0.000000e+00> : vector<64x64xf32>
    %44 = tpu.matmul %1, %43, %cst_20 {dimension_numbers = #tpu.dot_dimension_numbers<[1], [0], [0], [1], [0, 0, 1, 1], [], []>} : vector<64x64xbf16>, vector<64x64xbf16>, vector<64x64xf32> -> vector<64x64xf32>
    %c1 = arith.constant 1 : index
    %c0_21 = arith.constant 0 : index
    %c0_22 = arith.constant 0 : index
    %45 = vector.load %arg9[%c1, %c0_21, %c0_22] : memref<10x3x256xf32, #tpu.memory_space<vmem>>, vector<1x3x256xf32>
    %46 = vector.shape_cast %45 : vector<1x3x256xf32> to vector<3x256xf32>
    %47 = vector.extract_strided_slice %46 {offsets = [0, 0], sizes = [1, 64], strides = [1, 1]} : vector<3x256xf32> to vector<1x64xf32>
    %48 = vector.extract_strided_slice %46 {offsets = [1, 0], sizes = [1, 64], strides = [1, 1]} : vector<3x256xf32> to vector<1x64xf32>
    %49 = vector.extract_strided_slice %46 {offsets = [2, 0], sizes = [1, 64], strides = [1, 1]} : vector<3x256xf32> to vector<1x64xf32>
    %50 = vector.broadcast %47 : vector<1x64xf32> to vector<64x64xf32>
    %51 = arith.addf %44, %50 : vector<64x64xf32>
    %cst_23 = arith.constant 0.000000e+00 : f32
    %52 = vector.broadcast %cst_23 : f32 to vector<64x64xf32>
    %53 = arith.subf %52, %51 : vector<64x64xf32>
    %54 = math.exp %53 : vector<64x64xf32>
    %cst_24 = arith.constant 1.000000e+00 : f32
    %55 = vector.broadcast %cst_24 : f32 to vector<64x64xf32>
    %56 = arith.addf %55, %54 : vector<64x64xf32>
    %57 = tpu.reciprocal %56 {approx = true} : vector<64x64xf32> -> vector<64x64xf32>
    %cst_25 = arith.constant dense<0.000000e+00> : vector<64xf32>
    %58 = vector.multi_reduction <add>, %57, %cst_25 [0] : vector<64x64xf32> to vector<64xf32>
    %59 = vector.shape_cast %58 : vector<64xf32> to vector<1x64xf32>
    %cst_26 = arith.constant 6.400000e+01 : f32
    %60 = vector.broadcast %cst_26 : f32 to vector<1x64xf32>
    %61 = arith.divf %59, %60 : vector<1x64xf32>
    %62 = vector.broadcast %61 : vector<1x64xf32> to vector<64x64xf32>
    %63 = arith.subf %57, %62 : vector<64x64xf32>
    %64 = arith.mulf %63, %63 : vector<64x64xf32>
    %cst_27 = arith.constant dense<0.000000e+00> : vector<64xf32>
    %65 = vector.multi_reduction <add>, %64, %cst_27 [0] : vector<64x64xf32> to vector<64xf32>
    %66 = vector.shape_cast %65 : vector<64xf32> to vector<1x64xf32>
    %cst_28 = arith.constant 6.400000e+01 : f32
    %67 = vector.broadcast %cst_28 : f32 to vector<1x64xf32>
    %68 = arith.divf %66, %67 : vector<1x64xf32>
    %cst_29 = arith.constant 9.99999974E-6 : f32
    %69 = vector.broadcast %cst_29 : f32 to vector<1x64xf32>
    %70 = arith.addf %68, %69 : vector<1x64xf32>
    %71 = math.rsqrt %70 : vector<1x64xf32>
    %72 = arith.mulf %48, %71 : vector<1x64xf32>
    %73 = vector.broadcast %72 : vector<1x64xf32> to vector<64x64xf32>
    %74 = arith.mulf %63, %73 : vector<64x64xf32>
    %75 = vector.broadcast %49 : vector<1x64xf32> to vector<64x64xf32>
    %76 = arith.addf %74, %75 : vector<64x64xf32>
    %c1_30 = arith.constant 1 : index
    %c0_31 = arith.constant 0 : index
    %c0_32 = arith.constant 0 : index
    %77 = vector.load %arg3[%c1_30, %c0_31, %c0_32] : memref<4x64x64xf32, #tpu.memory_space<vmem>>, vector<1x64x64xf32>
    %78 = vector.shape_cast %77 : vector<1x64x64xf32> to vector<64x64xf32>
    %79 = arith.truncf %76 : vector<64x64xf32> to vector<64x64xbf16>
    %80 = arith.truncf %78 : vector<64x64xf32> to vector<64x64xbf16>
    %cst_33 = arith.constant dense<0.000000e+00> : vector<64x64xf32>
    %81 = tpu.matmul %79, %80, %cst_33 {dimension_numbers = #tpu.dot_dimension_numbers<[1], [0], [0], [1], [0, 0, 1, 1], [], []>} : vector<64x64xbf16>, vector<64x64xbf16>, vector<64x64xf32> -> vector<64x64xf32>
    %82 = arith.truncf %81 : vector<64x64xf32> to vector<64x64xbf16>
    %cst_34 = arith.constant dense<0.000000e+00> : vector<64x64xf32>
    %83 = tpu.matmul %1, %82, %cst_34 {dimension_numbers = #tpu.dot_dimension_numbers<[1], [0], [0], [1], [0, 0, 1, 1], [], []>} : vector<64x64xbf16>, vector<64x64xbf16>, vector<64x64xf32> -> vector<64x64xf32>
    %c2 = arith.constant 2 : index
    %c0_35 = arith.constant 0 : index
    %c0_36 = arith.constant 0 : index
    %84 = vector.load %arg9[%c2, %c0_35, %c0_36] : memref<10x3x256xf32, #tpu.memory_space<vmem>>, vector<1x3x256xf32>
    %85 = vector.shape_cast %84 : vector<1x3x256xf32> to vector<3x256xf32>
    %86 = vector.extract_strided_slice %85 {offsets = [0, 0], sizes = [1, 64], strides = [1, 1]} : vector<3x256xf32> to vector<1x64xf32>
    %87 = vector.extract_strided_slice %85 {offsets = [1, 0], sizes = [1, 64], strides = [1, 1]} : vector<3x256xf32> to vector<1x64xf32>
    %88 = vector.extract_strided_slice %85 {offsets = [2, 0], sizes = [1, 64], strides = [1, 1]} : vector<3x256xf32> to vector<1x64xf32>
    %89 = vector.broadcast %86 : vector<1x64xf32> to vector<64x64xf32>
    %90 = arith.addf %83, %89 : vector<64x64xf32>
    %cst_37 = arith.constant 0.000000e+00 : f32
    %91 = vector.broadcast %cst_37 : f32 to vector<64x64xf32>
    %92 = arith.subf %91, %90 : vector<64x64xf32>
    %93 = math.exp %92 : vector<64x64xf32>
    %cst_38 = arith.constant 1.000000e+00 : f32
    %94 = vector.broadcast %cst_38 : f32 to vector<64x64xf32>
    %95 = arith.addf %94, %93 : vector<64x64xf32>
    %96 = tpu.reciprocal %95 {approx = true} : vector<64x64xf32> -> vector<64x64xf32>
    %cst_39 = arith.constant dense<0.000000e+00> : vector<64xf32>
    %97 = vector.multi_reduction <add>, %96, %cst_39 [0] : vector<64x64xf32> to vector<64xf32>
    %98 = vector.shape_cast %97 : vector<64xf32> to vector<1x64xf32>
    %cst_40 = arith.constant 6.400000e+01 : f32
    %99 = vector.broadcast %cst_40 : f32 to vector<1x64xf32>
    %100 = arith.divf %98, %99 : vector<1x64xf32>
    %101 = vector.broadcast %100 : vector<1x64xf32> to vector<64x64xf32>
    %102 = arith.subf %96, %101 : vector<64x64xf32>
    %103 = arith.mulf %102, %102 : vector<64x64xf32>
    %cst_41 = arith.constant dense<0.000000e+00> : vector<64xf32>
    %104 = vector.multi_reduction <add>, %103, %cst_41 [0] : vector<64x64xf32> to vector<64xf32>
    %105 = vector.shape_cast %104 : vector<64xf32> to vector<1x64xf32>
    %cst_42 = arith.constant 6.400000e+01 : f32
    %106 = vector.broadcast %cst_42 : f32 to vector<1x64xf32>
    %107 = arith.divf %105, %106 : vector<1x64xf32>
    %cst_43 = arith.constant 9.99999974E-6 : f32
    %108 = vector.broadcast %cst_43 : f32 to vector<1x64xf32>
    %109 = arith.addf %107, %108 : vector<1x64xf32>
    %110 = math.rsqrt %109 : vector<1x64xf32>
    %111 = arith.mulf %87, %110 : vector<1x64xf32>
    %112 = vector.broadcast %111 : vector<1x64xf32> to vector<64x64xf32>
    %113 = arith.mulf %102, %112 : vector<64x64xf32>
    %114 = vector.broadcast %88 : vector<1x64xf32> to vector<64x64xf32>
    %115 = arith.addf %113, %114 : vector<64x64xf32>
    %c2_44 = arith.constant 2 : index
    %c0_45 = arith.constant 0 : index
    %c0_46 = arith.constant 0 : index
    %116 = vector.load %arg3[%c2_44, %c0_45, %c0_46] : memref<4x64x64xf32, #tpu.memory_space<vmem>>, vector<1x64x64xf32>
    %117 = vector.shape_cast %116 : vector<1x64x64xf32> to vector<64x64xf32>
    %118 = arith.truncf %115 : vector<64x64xf32> to vector<64x64xbf16>
    %119 = arith.truncf %117 : vector<64x64xf32> to vector<64x64xbf16>
    %cst_47 = arith.constant dense<0.000000e+00> : vector<64x64xf32>
    %120 = tpu.matmul %118, %119, %cst_47 {dimension_numbers = #tpu.dot_dimension_numbers<[1], [0], [0], [1], [0, 0, 1, 1], [], []>} : vector<64x64xbf16>, vector<64x64xbf16>, vector<64x64xf32> -> vector<64x64xf32>
    %121 = arith.truncf %120 : vector<64x64xf32> to vector<64x64xbf16>
    %cst_48 = arith.constant dense<0.000000e+00> : vector<64x64xf32>
    %122 = tpu.matmul %1, %121, %cst_48 {dimension_numbers = #tpu.dot_dimension_numbers<[1], [0], [0], [1], [0, 0, 1, 1], [], []>} : vector<64x64xbf16>, vector<64x64xbf16>, vector<64x64xf32> -> vector<64x64xf32>
    %c3 = arith.constant 3 : index
    %c0_49 = arith.constant 0 : index
    %c0_50 = arith.constant 0 : index
    %123 = vector.load %arg9[%c3, %c0_49, %c0_50] : memref<10x3x256xf32, #tpu.memory_space<vmem>>, vector<1x3x256xf32>
    %124 = vector.shape_cast %123 : vector<1x3x256xf32> to vector<3x256xf32>
    %125 = vector.extract_strided_slice %124 {offsets = [0, 0], sizes = [1, 64], strides = [1, 1]} : vector<3x256xf32> to vector<1x64xf32>
    %126 = vector.extract_strided_slice %124 {offsets = [1, 0], sizes = [1, 64], strides = [1, 1]} : vector<3x256xf32> to vector<1x64xf32>
    %127 = vector.extract_strided_slice %124 {offsets = [2, 0], sizes = [1, 64], strides = [1, 1]} : vector<3x256xf32> to vector<1x64xf32>
    %128 = vector.broadcast %125 : vector<1x64xf32> to vector<64x64xf32>
    %129 = arith.addf %122, %128 : vector<64x64xf32>
    %cst_51 = arith.constant 0.000000e+00 : f32
    %130 = vector.broadcast %cst_51 : f32 to vector<64x64xf32>
    %131 = arith.subf %130, %129 : vector<64x64xf32>
    %132 = math.exp %131 : vector<64x64xf32>
    %cst_52 = arith.constant 1.000000e+00 : f32
    %133 = vector.broadcast %cst_52 : f32 to vector<64x64xf32>
    %134 = arith.addf %133, %132 : vector<64x64xf32>
    %135 = tpu.reciprocal %134 {approx = true} : vector<64x64xf32> -> vector<64x64xf32>
    %cst_53 = arith.constant dense<0.000000e+00> : vector<64xf32>
    %136 = vector.multi_reduction <add>, %135, %cst_53 [0] : vector<64x64xf32> to vector<64xf32>
    %137 = vector.shape_cast %136 : vector<64xf32> to vector<1x64xf32>
    %cst_54 = arith.constant 6.400000e+01 : f32
    %138 = vector.broadcast %cst_54 : f32 to vector<1x64xf32>
    %139 = arith.divf %137, %138 : vector<1x64xf32>
    %140 = vector.broadcast %139 : vector<1x64xf32> to vector<64x64xf32>
    %141 = arith.subf %135, %140 : vector<64x64xf32>
    %142 = arith.mulf %141, %141 : vector<64x64xf32>
    %cst_55 = arith.constant dense<0.000000e+00> : vector<64xf32>
    %143 = vector.multi_reduction <add>, %142, %cst_55 [0] : vector<64x64xf32> to vector<64xf32>
    %144 = vector.shape_cast %143 : vector<64xf32> to vector<1x64xf32>
    %cst_56 = arith.constant 6.400000e+01 : f32
    %145 = vector.broadcast %cst_56 : f32 to vector<1x64xf32>
    %146 = arith.divf %144, %145 : vector<1x64xf32>
    %cst_57 = arith.constant 9.99999974E-6 : f32
    %147 = vector.broadcast %cst_57 : f32 to vector<1x64xf32>
    %148 = arith.addf %146, %147 : vector<1x64xf32>
    %149 = math.rsqrt %148 : vector<1x64xf32>
    %150 = arith.mulf %126, %149 : vector<1x64xf32>
    %151 = vector.broadcast %150 : vector<1x64xf32> to vector<64x64xf32>
    %152 = arith.mulf %141, %151 : vector<64x64xf32>
    %153 = vector.broadcast %127 : vector<1x64xf32> to vector<64x64xf32>
    %154 = arith.addf %152, %153 : vector<64x64xf32>
    %c3_58 = arith.constant 3 : index
    %c0_59 = arith.constant 0 : index
    %c0_60 = arith.constant 0 : index
    %155 = vector.load %arg3[%c3_58, %c0_59, %c0_60] : memref<4x64x64xf32, #tpu.memory_space<vmem>>, vector<1x64x64xf32>
    %156 = vector.shape_cast %155 : vector<1x64x64xf32> to vector<64x64xf32>
    %157 = arith.truncf %154 : vector<64x64xf32> to vector<64x64xbf16>
    %158 = arith.truncf %156 : vector<64x64xf32> to vector<64x64xbf16>
    %cst_61 = arith.constant dense<0.000000e+00> : vector<64x64xf32>
    %159 = tpu.matmul %157, %158, %cst_61 {dimension_numbers = #tpu.dot_dimension_numbers<[1], [0], [0], [1], [0, 0, 1, 1], [], []>} : vector<64x64xbf16>, vector<64x64xbf16>, vector<64x64xf32> -> vector<64x64xf32>
    %160 = arith.truncf %159 : vector<64x64xf32> to vector<64x64xbf16>
    %cst_62 = arith.constant dense<0.000000e+00> : vector<64x64xf32>
    %161 = tpu.matmul %1, %160, %cst_62 {dimension_numbers = #tpu.dot_dimension_numbers<[1], [0], [0], [1], [0, 0, 1, 1], [], []>} : vector<64x64xbf16>, vector<64x64xbf16>, vector<64x64xf32> -> vector<64x64xf32>
    %c4 = arith.constant 4 : index
    %c0_63 = arith.constant 0 : index
    %c0_64 = arith.constant 0 : index
    %162 = vector.load %arg9[%c4, %c0_63, %c0_64] : memref<10x3x256xf32, #tpu.memory_space<vmem>>, vector<1x3x256xf32>
    %163 = vector.shape_cast %162 : vector<1x3x256xf32> to vector<3x256xf32>
    %164 = vector.extract_strided_slice %163 {offsets = [0, 0], sizes = [1, 64], strides = [1, 1]} : vector<3x256xf32> to vector<1x64xf32>
    %165 = vector.extract_strided_slice %163 {offsets = [1, 0], sizes = [1, 64], strides = [1, 1]} : vector<3x256xf32> to vector<1x64xf32>
    %166 = vector.extract_strided_slice %163 {offsets = [2, 0], sizes = [1, 64], strides = [1, 1]} : vector<3x256xf32> to vector<1x64xf32>
    %167 = vector.broadcast %164 : vector<1x64xf32> to vector<64x64xf32>
    %168 = arith.addf %161, %167 : vector<64x64xf32>
    %cst_65 = arith.constant 0.000000e+00 : f32
    %169 = vector.broadcast %cst_65 : f32 to vector<64x64xf32>
    %170 = arith.subf %169, %168 : vector<64x64xf32>
    %171 = math.exp %170 : vector<64x64xf32>
    %cst_66 = arith.constant 1.000000e+00 : f32
    %172 = vector.broadcast %cst_66 : f32 to vector<64x64xf32>
    %173 = arith.addf %172, %171 : vector<64x64xf32>
    %174 = tpu.reciprocal %173 {approx = true} : vector<64x64xf32> -> vector<64x64xf32>
    %cst_67 = arith.constant dense<0.000000e+00> : vector<64xf32>
    %175 = vector.multi_reduction <add>, %174, %cst_67 [0] : vector<64x64xf32> to vector<64xf32>
    %176 = vector.shape_cast %175 : vector<64xf32> to vector<1x64xf32>
    %cst_68 = arith.constant 6.400000e+01 : f32
    %177 = vector.broadcast %cst_68 : f32 to vector<1x64xf32>
    %178 = arith.divf %176, %177 : vector<1x64xf32>
    %179 = vector.broadcast %178 : vector<1x64xf32> to vector<64x64xf32>
    %180 = arith.subf %174, %179 : vector<64x64xf32>
    %181 = arith.mulf %180, %180 : vector<64x64xf32>
    %cst_69 = arith.constant dense<0.000000e+00> : vector<64xf32>
    %182 = vector.multi_reduction <add>, %181, %cst_69 [0] : vector<64x64xf32> to vector<64xf32>
    %183 = vector.shape_cast %182 : vector<64xf32> to vector<1x64xf32>
    %cst_70 = arith.constant 6.400000e+01 : f32
    %184 = vector.broadcast %cst_70 : f32 to vector<1x64xf32>
    %185 = arith.divf %183, %184 : vector<1x64xf32>
    %cst_71 = arith.constant 9.99999974E-6 : f32
    %186 = vector.broadcast %cst_71 : f32 to vector<1x64xf32>
    %187 = arith.addf %185, %186 : vector<1x64xf32>
    %188 = math.rsqrt %187 : vector<1x64xf32>
    %189 = arith.mulf %165, %188 : vector<1x64xf32>
    %190 = vector.broadcast %189 : vector<1x64xf32> to vector<64x64xf32>
    %191 = arith.mulf %180, %190 : vector<64x64xf32>
    %192 = vector.broadcast %166 : vector<1x64xf32> to vector<64x64xf32>
    %193 = arith.addf %191, %192 : vector<64x64xf32>
    %c0_72 = arith.constant 0 : index
    %c0_73 = arith.constant 0 : index
    %c0_74 = arith.constant 0 : index
    %194 = vector.load %arg4[%c0_72, %c0_73, %c0_74] : memref<5x64x256xf32, #tpu.memory_space<vmem>>, vector<1x64x256xf32>
    %195 = vector.shape_cast %194 : vector<1x64x256xf32> to vector<64x256xf32>
    %196 = arith.truncf %193 : vector<64x64xf32> to vector<64x64xbf16>
    %197 = arith.truncf %195 : vector<64x256xf32> to vector<64x256xbf16>
    %cst_75 = arith.constant dense<0.000000e+00> : vector<64x256xf32>
    %198 = tpu.matmul %196, %197, %cst_75 {dimension_numbers = #tpu.dot_dimension_numbers<[1], [0], [0], [1], [0, 0, 1, 1], [], []>} : vector<64x64xbf16>, vector<64x256xbf16>, vector<64x256xf32> -> vector<64x256xf32>
    %c1_76 = arith.constant 1 : index
    %c0_77 = arith.constant 0 : index
    %c0_78 = arith.constant 0 : index
    %199 = vector.load %arg4[%c1_76, %c0_77, %c0_78] : memref<5x64x256xf32, #tpu.memory_space<vmem>>, vector<1x64x256xf32>
    %200 = vector.shape_cast %199 : vector<1x64x256xf32> to vector<64x256xf32>
    %201 = arith.truncf %154 : vector<64x64xf32> to vector<64x64xbf16>
    %202 = arith.truncf %200 : vector<64x256xf32> to vector<64x256xbf16>
    %cst_79 = arith.constant dense<0.000000e+00> : vector<64x256xf32>
    %203 = tpu.matmul %201, %202, %cst_79 {dimension_numbers = #tpu.dot_dimension_numbers<[1], [0], [0], [1], [0, 0, 1, 1], [], []>} : vector<64x64xbf16>, vector<64x256xbf16>, vector<64x256xf32> -> vector<64x256xf32>
    %204 = arith.addf %198, %203 : vector<64x256xf32>
    %c2_80 = arith.constant 2 : index
    %c0_81 = arith.constant 0 : index
    %c0_82 = arith.constant 0 : index
    %205 = vector.load %arg4[%c2_80, %c0_81, %c0_82] : memref<5x64x256xf32, #tpu.memory_space<vmem>>, vector<1x64x256xf32>
    %206 = vector.shape_cast %205 : vector<1x64x256xf32> to vector<64x256xf32>
    %207 = arith.truncf %115 : vector<64x64xf32> to vector<64x64xbf16>
    %208 = arith.truncf %206 : vector<64x256xf32> to vector<64x256xbf16>
    %cst_83 = arith.constant dense<0.000000e+00> : vector<64x256xf32>
    %209 = tpu.matmul %207, %208, %cst_83 {dimension_numbers = #tpu.dot_dimension_numbers<[1], [0], [0], [1], [0, 0, 1, 1], [], []>} : vector<64x64xbf16>, vector<64x256xbf16>, vector<64x256xf32> -> vector<64x256xf32>
    %210 = arith.addf %204, %209 : vector<64x256xf32>
    %c3_84 = arith.constant 3 : index
    %c0_85 = arith.constant 0 : index
    %c0_86 = arith.constant 0 : index
    %211 = vector.load %arg4[%c3_84, %c0_85, %c0_86] : memref<5x64x256xf32, #tpu.memory_space<vmem>>, vector<1x64x256xf32>
    %212 = vector.shape_cast %211 : vector<1x64x256xf32> to vector<64x256xf32>
    %213 = arith.truncf %76 : vector<64x64xf32> to vector<64x64xbf16>
    %214 = arith.truncf %212 : vector<64x256xf32> to vector<64x256xbf16>
    %cst_87 = arith.constant dense<0.000000e+00> : vector<64x256xf32>
    %215 = tpu.matmul %213, %214, %cst_87 {dimension_numbers = #tpu.dot_dimension_numbers<[1], [0], [0], [1], [0, 0, 1, 1], [], []>} : vector<64x64xbf16>, vector<64x256xbf16>, vector<64x256xf32> -> vector<64x256xf32>
    %216 = arith.addf %210, %215 : vector<64x256xf32>
    %c4_88 = arith.constant 4 : index
    %c0_89 = arith.constant 0 : index
    %c0_90 = arith.constant 0 : index
    %217 = vector.load %arg4[%c4_88, %c0_89, %c0_90] : memref<5x64x256xf32, #tpu.memory_space<vmem>>, vector<1x64x256xf32>
    %218 = vector.shape_cast %217 : vector<1x64x256xf32> to vector<64x256xf32>
    %219 = arith.truncf %37 : vector<64x64xf32> to vector<64x64xbf16>
    %220 = arith.truncf %218 : vector<64x256xf32> to vector<64x256xbf16>
    %cst_91 = arith.constant dense<0.000000e+00> : vector<64x256xf32>
    %221 = tpu.matmul %219, %220, %cst_91 {dimension_numbers = #tpu.dot_dimension_numbers<[1], [0], [0], [1], [0, 0, 1, 1], [], []>} : vector<64x64xbf16>, vector<64x256xbf16>, vector<64x256xf32> -> vector<64x256xf32>
    %222 = arith.addf %216, %221 : vector<64x256xf32>
    %223 = arith.truncf %222 : vector<64x256xf32> to vector<64x256xbf16>
    %cst_92 = arith.constant dense<0.000000e+00> : vector<64x256xf32>
    %224 = tpu.matmul %1, %223, %cst_92 {dimension_numbers = #tpu.dot_dimension_numbers<[1], [0], [0], [1], [0, 0, 1, 1], [], []>} : vector<64x64xbf16>, vector<64x256xbf16>, vector<64x256xf32> -> vector<64x256xf32>
    %c5 = arith.constant 5 : index
    %c0_93 = arith.constant 0 : index
    %c0_94 = arith.constant 0 : index
    %225 = vector.load %arg9[%c5, %c0_93, %c0_94] : memref<10x3x256xf32, #tpu.memory_space<vmem>>, vector<1x3x256xf32>
    %226 = vector.shape_cast %225 : vector<1x3x256xf32> to vector<3x256xf32>
    %227 = vector.extract_strided_slice %226 {offsets = [0, 0], sizes = [1, 256], strides = [1, 1]} : vector<3x256xf32> to vector<1x256xf32>
    %228 = vector.extract_strided_slice %226 {offsets = [1, 0], sizes = [1, 256], strides = [1, 1]} : vector<3x256xf32> to vector<1x256xf32>
    %229 = vector.extract_strided_slice %226 {offsets = [2, 0], sizes = [1, 256], strides = [1, 1]} : vector<3x256xf32> to vector<1x256xf32>
    %230 = vector.broadcast %227 : vector<1x256xf32> to vector<64x256xf32>
    %231 = arith.addf %224, %230 : vector<64x256xf32>
    %cst_95 = arith.constant 0.000000e+00 : f32
    %232 = vector.broadcast %cst_95 : f32 to vector<64x256xf32>
    %233 = arith.subf %232, %231 : vector<64x256xf32>
    %234 = math.exp %233 : vector<64x256xf32>
    %cst_96 = arith.constant 1.000000e+00 : f32
    %235 = vector.broadcast %cst_96 : f32 to vector<64x256xf32>
    %236 = arith.addf %235, %234 : vector<64x256xf32>
    %237 = tpu.reciprocal %236 {approx = true} : vector<64x256xf32> -> vector<64x256xf32>
    %cst_97 = arith.constant dense<0.000000e+00> : vector<256xf32>
    %238 = vector.multi_reduction <add>, %237, %cst_97 [0] : vector<64x256xf32> to vector<256xf32>
    %239 = vector.shape_cast %238 : vector<256xf32> to vector<1x256xf32>
    %cst_98 = arith.constant 6.400000e+01 : f32
    %240 = vector.broadcast %cst_98 : f32 to vector<1x256xf32>
    %241 = arith.divf %239, %240 : vector<1x256xf32>
    %242 = vector.broadcast %241 : vector<1x256xf32> to vector<64x256xf32>
    %243 = arith.subf %237, %242 : vector<64x256xf32>
    %244 = arith.mulf %243, %243 : vector<64x256xf32>
    %cst_99 = arith.constant dense<0.000000e+00> : vector<256xf32>
    %245 = vector.multi_reduction <add>, %244, %cst_99 [0] : vector<64x256xf32> to vector<256xf32>
    %246 = vector.shape_cast %245 : vector<256xf32> to vector<1x256xf32>
    %cst_100 = arith.constant 6.400000e+01 : f32
    %247 = vector.broadcast %cst_100 : f32 to vector<1x256xf32>
    %248 = arith.divf %246, %247 : vector<1x256xf32>
    %cst_101 = arith.constant 9.99999974E-6 : f32
    %249 = vector.broadcast %cst_101 : f32 to vector<1x256xf32>
    %250 = arith.addf %248, %249 : vector<1x256xf32>
    %251 = math.rsqrt %250 : vector<1x256xf32>
    %252 = arith.mulf %228, %251 : vector<1x256xf32>
    %253 = vector.broadcast %252 : vector<1x256xf32> to vector<64x256xf32>
    %254 = arith.mulf %243, %253 : vector<64x256xf32>
    %255 = vector.broadcast %229 : vector<1x256xf32> to vector<64x256xf32>
    %256 = arith.addf %254, %255 : vector<64x256xf32>
    %c0_102 = arith.constant 0 : index
    %c0_103 = arith.constant 0 : index
    %257 = vector.load %arg5[%c0_102, %c0_103] : memref<256x64xf32, #tpu.memory_space<vmem>>, vector<256x64xf32>
    %258 = arith.truncf %256 : vector<64x256xf32> to vector<64x256xbf16>
    %259 = arith.truncf %257 : vector<256x64xf32> to vector<256x64xbf16>
    %cst_104 = arith.constant dense<0.000000e+00> : vector<64x64xf32>
    %260 = tpu.matmul %258, %259, %cst_104 {dimension_numbers = #tpu.dot_dimension_numbers<[1], [0], [0], [1], [0, 0, 1, 1], [], []>} : vector<64x256xbf16>, vector<256x64xbf16>, vector<64x64xf32> -> vector<64x64xf32>
    %261 = arith.truncf %260 : vector<64x64xf32> to vector<64x64xbf16>
    %cst_105 = arith.constant dense<0.000000e+00> : vector<64x64xf32>
    %262 = tpu.matmul %1, %261, %cst_105 {dimension_numbers = #tpu.dot_dimension_numbers<[1], [0], [0], [1], [0, 0, 1, 1], [], []>} : vector<64x64xbf16>, vector<64x64xbf16>, vector<64x64xf32> -> vector<64x64xf32>
    %c6 = arith.constant 6 : index
    %c0_106 = arith.constant 0 : index
    %c0_107 = arith.constant 0 : index
    %263 = vector.load %arg9[%c6, %c0_106, %c0_107] : memref<10x3x256xf32, #tpu.memory_space<vmem>>, vector<1x3x256xf32>
    %264 = vector.shape_cast %263 : vector<1x3x256xf32> to vector<3x256xf32>
    %265 = vector.extract_strided_slice %264 {offsets = [0, 0], sizes = [1, 64], strides = [1, 1]} : vector<3x256xf32> to vector<1x64xf32>
    %266 = vector.extract_strided_slice %264 {offsets = [1, 0], sizes = [1, 64], strides = [1, 1]} : vector<3x256xf32> to vector<1x64xf32>
    %267 = vector.extract_strided_slice %264 {offsets = [2, 0], sizes = [1, 64], strides = [1, 1]} : vector<3x256xf32> to vector<1x64xf32>
    %268 = vector.broadcast %265 : vector<1x64xf32> to vector<64x64xf32>
    %269 = arith.addf %262, %268 : vector<64x64xf32>
    %cst_108 = arith.constant 0.000000e+00 : f32
    %270 = vector.broadcast %cst_108 : f32 to vector<64x64xf32>
    %271 = arith.subf %270, %269 : vector<64x64xf32>
    %272 = math.exp %271 : vector<64x64xf32>
    %cst_109 = arith.constant 1.000000e+00 : f32
    %273 = vector.broadcast %cst_109 : f32 to vector<64x64xf32>
    %274 = arith.addf %273, %272 : vector<64x64xf32>
    %275 = tpu.reciprocal %274 {approx = true} : vector<64x64xf32> -> vector<64x64xf32>
    %cst_110 = arith.constant dense<0.000000e+00> : vector<64xf32>
    %276 = vector.multi_reduction <add>, %275, %cst_110 [0] : vector<64x64xf32> to vector<64xf32>
    %277 = vector.shape_cast %276 : vector<64xf32> to vector<1x64xf32>
    %cst_111 = arith.constant 6.400000e+01 : f32
    %278 = vector.broadcast %cst_111 : f32 to vector<1x64xf32>
    %279 = arith.divf %277, %278 : vector<1x64xf32>
    %280 = vector.broadcast %279 : vector<1x64xf32> to vector<64x64xf32>
    %281 = arith.subf %275, %280 : vector<64x64xf32>
    %282 = arith.mulf %281, %281 : vector<64x64xf32>
    %cst_112 = arith.constant dense<0.000000e+00> : vector<64xf32>
    %283 = vector.multi_reduction <add>, %282, %cst_112 [0] : vector<64x64xf32> to vector<64xf32>
    %284 = vector.shape_cast %283 : vector<64xf32> to vector<1x64xf32>
    %cst_113 = arith.constant 6.400000e+01 : f32
    %285 = vector.broadcast %cst_113 : f32 to vector<1x64xf32>
    %286 = arith.divf %284, %285 : vector<1x64xf32>
    %cst_114 = arith.constant 9.99999974E-6 : f32
    %287 = vector.broadcast %cst_114 : f32 to vector<1x64xf32>
    %288 = arith.addf %286, %287 : vector<1x64xf32>
    %289 = math.rsqrt %288 : vector<1x64xf32>
    %290 = arith.mulf %266, %289 : vector<1x64xf32>
    %291 = vector.broadcast %290 : vector<1x64xf32> to vector<64x64xf32>
    %292 = arith.mulf %281, %291 : vector<64x64xf32>
    %293 = vector.broadcast %267 : vector<1x64xf32> to vector<64x64xf32>
    %294 = arith.addf %292, %293 : vector<64x64xf32>
    %c0_115 = arith.constant 0 : index
    %c0_116 = arith.constant 0 : index
    %295 = vector.load %arg6[%c0_115, %c0_116] : memref<64x16xf32, #tpu.memory_space<vmem>>, vector<64x16xf32>
    %296 = arith.truncf %294 : vector<64x64xf32> to vector<64x64xbf16>
    %297 = arith.truncf %295 : vector<64x16xf32> to vector<64x16xbf16>
    %cst_117 = arith.constant dense<0.000000e+00> : vector<64x16xf32>
    %298 = tpu.matmul %296, %297, %cst_117 {dimension_numbers = #tpu.dot_dimension_numbers<[1], [0], [0], [1], [0, 0, 1, 1], [], []>} : vector<64x64xbf16>, vector<64x16xbf16>, vector<64x16xf32> -> vector<64x16xf32>
    %299 = arith.truncf %298 : vector<64x16xf32> to vector<64x16xbf16>
    %cst_118 = arith.constant dense<0.000000e+00> : vector<64x16xf32>
    %300 = tpu.matmul %1, %299, %cst_118 {dimension_numbers = #tpu.dot_dimension_numbers<[1], [0], [0], [1], [0, 0, 1, 1], [], []>} : vector<64x64xbf16>, vector<64x16xbf16>, vector<64x16xf32> -> vector<64x16xf32>
    %c7 = arith.constant 7 : index
    %c0_119 = arith.constant 0 : index
    %c0_120 = arith.constant 0 : index
    %301 = vector.load %arg9[%c7, %c0_119, %c0_120] : memref<10x3x256xf32, #tpu.memory_space<vmem>>, vector<1x3x256xf32>
    %302 = vector.shape_cast %301 : vector<1x3x256xf32> to vector<3x256xf32>
    %303 = vector.extract_strided_slice %302 {offsets = [0, 0], sizes = [1, 16], strides = [1, 1]} : vector<3x256xf32> to vector<1x16xf32>
    %304 = vector.extract_strided_slice %302 {offsets = [1, 0], sizes = [1, 16], strides = [1, 1]} : vector<3x256xf32> to vector<1x16xf32>
    %305 = vector.extract_strided_slice %302 {offsets = [2, 0], sizes = [1, 16], strides = [1, 1]} : vector<3x256xf32> to vector<1x16xf32>
    %306 = vector.broadcast %303 : vector<1x16xf32> to vector<64x16xf32>
    %307 = arith.addf %300, %306 : vector<64x16xf32>
    %cst_121 = arith.constant 0.000000e+00 : f32
    %308 = vector.broadcast %cst_121 : f32 to vector<64x16xf32>
    %309 = arith.subf %308, %307 : vector<64x16xf32>
    %310 = math.exp %309 : vector<64x16xf32>
    %cst_122 = arith.constant 1.000000e+00 : f32
    %311 = vector.broadcast %cst_122 : f32 to vector<64x16xf32>
    %312 = arith.addf %311, %310 : vector<64x16xf32>
    %313 = tpu.reciprocal %312 {approx = true} : vector<64x16xf32> -> vector<64x16xf32>
    %cst_123 = arith.constant dense<0.000000e+00> : vector<16xf32>
    %314 = vector.multi_reduction <add>, %313, %cst_123 [0] : vector<64x16xf32> to vector<16xf32>
    %315 = vector.shape_cast %314 : vector<16xf32> to vector<1x16xf32>
    %cst_124 = arith.constant 6.400000e+01 : f32
    %316 = vector.broadcast %cst_124 : f32 to vector<1x16xf32>
    %317 = arith.divf %315, %316 : vector<1x16xf32>
    %318 = vector.broadcast %317 : vector<1x16xf32> to vector<64x16xf32>
    %319 = arith.subf %313, %318 : vector<64x16xf32>
    %320 = arith.mulf %319, %319 : vector<64x16xf32>
    %cst_125 = arith.constant dense<0.000000e+00> : vector<16xf32>
    %321 = vector.multi_reduction <add>, %320, %cst_125 [0] : vector<64x16xf32> to vector<16xf32>
    %322 = vector.shape_cast %321 : vector<16xf32> to vector<1x16xf32>
    %cst_126 = arith.constant 6.400000e+01 : f32
    %323 = vector.broadcast %cst_126 : f32 to vector<1x16xf32>
    %324 = arith.divf %322, %323 : vector<1x16xf32>
    %cst_127 = arith.constant 9.99999974E-6 : f32
    %325 = vector.broadcast %cst_127 : f32 to vector<1x16xf32>
    %326 = arith.addf %324, %325 : vector<1x16xf32>
    %327 = math.rsqrt %326 : vector<1x16xf32>
    %328 = arith.mulf %304, %327 : vector<1x16xf32>
    %329 = vector.broadcast %328 : vector<1x16xf32> to vector<64x16xf32>
    %330 = arith.mulf %319, %329 : vector<64x16xf32>
    %331 = vector.broadcast %305 : vector<1x16xf32> to vector<64x16xf32>
    %332 = arith.addf %330, %331 : vector<64x16xf32>
    %c0_128 = arith.constant 0 : index
    %c0_129 = arith.constant 0 : index
    %333 = vector.load %arg7[%c0_128, %c0_129] : memref<16x4xf32, #tpu.memory_space<vmem>>, vector<16x4xf32>
    %cst_130 = arith.constant dense<0.000000e+00> : vector<64x4xf32>
    %334 = tpu.matmul %332, %333, %cst_130 {dimension_numbers = #tpu.dot_dimension_numbers<[1], [0], [0], [1], [0, 0, 1, 1], [], []>} : vector<64x16xf32>, vector<16x4xf32>, vector<64x4xf32> -> vector<64x4xf32>
    %cst_131 = arith.constant dense<0.000000e+00> : vector<64x4xf32>
    %335 = tpu.matmul %0, %334, %cst_131 {dimension_numbers = #tpu.dot_dimension_numbers<[1], [0], [0], [1], [0, 0, 1, 1], [], []>} : vector<64x64xf32>, vector<64x4xf32>, vector<64x4xf32> -> vector<64x4xf32>
    %c8 = arith.constant 8 : index
    %c0_132 = arith.constant 0 : index
    %c0_133 = arith.constant 0 : index
    %336 = vector.load %arg9[%c8, %c0_132, %c0_133] : memref<10x3x256xf32, #tpu.memory_space<vmem>>, vector<1x3x256xf32>
    %337 = vector.shape_cast %336 : vector<1x3x256xf32> to vector<3x256xf32>
    %338 = vector.extract_strided_slice %337 {offsets = [0, 0], sizes = [1, 4], strides = [1, 1]} : vector<3x256xf32> to vector<1x4xf32>
    %339 = vector.extract_strided_slice %337 {offsets = [1, 0], sizes = [1, 4], strides = [1, 1]} : vector<3x256xf32> to vector<1x4xf32>
    %340 = vector.extract_strided_slice %337 {offsets = [2, 0], sizes = [1, 4], strides = [1, 1]} : vector<3x256xf32> to vector<1x4xf32>
    %341 = vector.broadcast %338 : vector<1x4xf32> to vector<64x4xf32>
    %342 = arith.addf %335, %341 : vector<64x4xf32>
    %cst_134 = arith.constant 0.000000e+00 : f32
    %343 = vector.broadcast %cst_134 : f32 to vector<64x4xf32>
    %344 = arith.subf %343, %342 : vector<64x4xf32>
    %345 = math.exp %344 : vector<64x4xf32>
    %cst_135 = arith.constant 1.000000e+00 : f32
    %346 = vector.broadcast %cst_135 : f32 to vector<64x4xf32>
    %347 = arith.addf %346, %345 : vector<64x4xf32>
    %348 = tpu.reciprocal %347 {approx = true} : vector<64x4xf32> -> vector<64x4xf32>
    %cst_136 = arith.constant dense<0.000000e+00> : vector<4xf32>
    %349 = vector.multi_reduction <add>, %348, %cst_136 [0] : vector<64x4xf32> to vector<4xf32>
    %350 = vector.shape_cast %349 : vector<4xf32> to vector<1x4xf32>
    %cst_137 = arith.constant 6.400000e+01 : f32
    %351 = vector.broadcast %cst_137 : f32 to vector<1x4xf32>
    %352 = arith.divf %350, %351 : vector<1x4xf32>
    %353 = vector.broadcast %352 : vector<1x4xf32> to vector<64x4xf32>
    %354 = arith.subf %348, %353 : vector<64x4xf32>
    %355 = arith.mulf %354, %354 : vector<64x4xf32>
    %cst_138 = arith.constant dense<0.000000e+00> : vector<4xf32>
    %356 = vector.multi_reduction <add>, %355, %cst_138 [0] : vector<64x4xf32> to vector<4xf32>
    %357 = vector.shape_cast %356 : vector<4xf32> to vector<1x4xf32>
    %cst_139 = arith.constant 6.400000e+01 : f32
    %358 = vector.broadcast %cst_139 : f32 to vector<1x4xf32>
    %359 = arith.divf %357, %358 : vector<1x4xf32>
    %cst_140 = arith.constant 9.99999974E-6 : f32
    %360 = vector.broadcast %cst_140 : f32 to vector<1x4xf32>
    %361 = arith.addf %359, %360 : vector<1x4xf32>
    %362 = math.rsqrt %361 : vector<1x4xf32>
    %363 = arith.mulf %339, %362 : vector<1x4xf32>
    %364 = vector.broadcast %363 : vector<1x4xf32> to vector<64x4xf32>
    %365 = arith.mulf %354, %364 : vector<64x4xf32>
    %366 = vector.broadcast %340 : vector<1x4xf32> to vector<64x4xf32>
    %367 = arith.addf %365, %366 : vector<64x4xf32>
    %c0_141 = arith.constant 0 : index
    %c0_142 = arith.constant 0 : index
    %368 = vector.load %arg8[%c0_141, %c0_142] : memref<4x2xf32, #tpu.memory_space<vmem>>, vector<4x2xf32>
    %cst_143 = arith.constant dense<0.000000e+00> : vector<64x2xf32>
    %369 = tpu.matmul %367, %368, %cst_143 {dimension_numbers = #tpu.dot_dimension_numbers<[1], [0], [0], [1], [0, 0, 1, 1], [], []>} : vector<64x4xf32>, vector<4x2xf32>, vector<64x2xf32> -> vector<64x2xf32>
    %cst_144 = arith.constant dense<0.000000e+00> : vector<64x2xf32>
    %370 = tpu.matmul %0, %369, %cst_144 {dimension_numbers = #tpu.dot_dimension_numbers<[1], [0], [0], [1], [0, 0, 1, 1], [], []>} : vector<64x64xf32>, vector<64x2xf32>, vector<64x2xf32> -> vector<64x2xf32>
    %c9 = arith.constant 9 : index
    %c0_145 = arith.constant 0 : index
    %c0_146 = arith.constant 0 : index
    %371 = vector.load %arg9[%c9, %c0_145, %c0_146] : memref<10x3x256xf32, #tpu.memory_space<vmem>>, vector<1x3x256xf32>
    %372 = vector.shape_cast %371 : vector<1x3x256xf32> to vector<3x256xf32>
    %373 = vector.extract_strided_slice %372 {offsets = [0, 0], sizes = [1, 2], strides = [1, 1]} : vector<3x256xf32> to vector<1x2xf32>
    %374 = vector.extract_strided_slice %372 {offsets = [1, 0], sizes = [1, 2], strides = [1, 1]} : vector<3x256xf32> to vector<1x2xf32>
    %375 = vector.extract_strided_slice %372 {offsets = [2, 0], sizes = [1, 2], strides = [1, 1]} : vector<3x256xf32> to vector<1x2xf32>
    %376 = vector.broadcast %373 : vector<1x2xf32> to vector<64x2xf32>
    %377 = arith.addf %370, %376 : vector<64x2xf32>
    %cst_147 = arith.constant 0.000000e+00 : f32
    %378 = vector.broadcast %cst_147 : f32 to vector<64x2xf32>
    %379 = arith.subf %378, %377 : vector<64x2xf32>
    %380 = math.exp %379 : vector<64x2xf32>
    %cst_148 = arith.constant 1.000000e+00 : f32
    %381 = vector.broadcast %cst_148 : f32 to vector<64x2xf32>
    %382 = arith.addf %381, %380 : vector<64x2xf32>
    %383 = tpu.reciprocal %382 {approx = true} : vector<64x2xf32> -> vector<64x2xf32>
    %cst_149 = arith.constant dense<0.000000e+00> : vector<2xf32>
    %384 = vector.multi_reduction <add>, %383, %cst_149 [0] : vector<64x2xf32> to vector<2xf32>
    %385 = vector.shape_cast %384 : vector<2xf32> to vector<1x2xf32>
    %cst_150 = arith.constant 6.400000e+01 : f32
    %386 = vector.broadcast %cst_150 : f32 to vector<1x2xf32>
    %387 = arith.divf %385, %386 : vector<1x2xf32>
    %388 = vector.broadcast %387 : vector<1x2xf32> to vector<64x2xf32>
    %389 = arith.subf %383, %388 : vector<64x2xf32>
    %390 = arith.mulf %389, %389 : vector<64x2xf32>
    %cst_151 = arith.constant dense<0.000000e+00> : vector<2xf32>
    %391 = vector.multi_reduction <add>, %390, %cst_151 [0] : vector<64x2xf32> to vector<2xf32>
    %392 = vector.shape_cast %391 : vector<2xf32> to vector<1x2xf32>
    %cst_152 = arith.constant 6.400000e+01 : f32
    %393 = vector.broadcast %cst_152 : f32 to vector<1x2xf32>
    %394 = arith.divf %392, %393 : vector<1x2xf32>
    %cst_153 = arith.constant 9.99999974E-6 : f32
    %395 = vector.broadcast %cst_153 : f32 to vector<1x2xf32>
    %396 = arith.addf %394, %395 : vector<1x2xf32>
    %397 = math.rsqrt %396 : vector<1x2xf32>
    %398 = arith.mulf %374, %397 : vector<1x2xf32>
    %399 = vector.broadcast %398 : vector<1x2xf32> to vector<64x2xf32>
    %400 = arith.mulf %389, %399 : vector<64x2xf32>
    %401 = vector.broadcast %375 : vector<1x2xf32> to vector<64x2xf32>
    %402 = arith.addf %400, %401 : vector<64x2xf32>
    %cst_154 = arith.constant dense<0xFF800000> : vector<64xf32>
    %403 = vector.multi_reduction <maximumf>, %402, %cst_154 [1] : vector<64x2xf32> to vector<64xf32>
    %404 = vector.shape_cast %403 : vector<64xf32> to vector<64x1xf32>
    %405 = vector.broadcast %404 : vector<64x1xf32> to vector<64x2xf32>
    %406 = arith.subf %402, %405 : vector<64x2xf32>
    %407 = math.exp %406 : vector<64x2xf32>
    %cst_155 = arith.constant dense<0.000000e+00> : vector<64xf32>
    %408 = vector.multi_reduction <add>, %407, %cst_155 [1] : vector<64x2xf32> to vector<64xf32>
    %409 = vector.shape_cast %408 : vector<64xf32> to vector<64x1xf32>
    %410 = vector.broadcast %409 : vector<64x1xf32> to vector<64x2xf32>
    %411 = arith.divf %407, %410 : vector<64x2xf32>
    %c0_156 = arith.constant 0 : index
    %c0_157 = arith.constant 0 : index
    %412 = vector.load %arg10[%c0_156, %c0_157] : memref<64x2xf32, #tpu.memory_space<vmem>>, vector<64x2xf32>
    tpu.vector_store %arg10[%c0_156, %c0_157], %411 {strides = array<i32>} : memref<64x2xf32, #tpu.memory_space<vmem>>, vector<64x2xf32>,
    return
  }
}

</mosaic_0001>

<bundles_post_ra>
// kernel: netconnect3_forward.1
= control target key start
LH: loop header
LB: loop body
LE: loop exit
PB: predicated region body
PF: predicated region fallthrough
CT: control target
= control target key end

     0   :  { %15 = vsyncpa [#allocation3], 0  ;;  %s5246_s13 = smov [#allocation2]   ;;  %s6340_s0 = inlined_call_operand.vmem [shape: f32[64,64], index: 0, kind: input, shape index: {}]   ;;  %s6341_s1 = inlined_call_operand.vmem [shape: f32[64,3], index: 1, kind: input, shape index: {}]   ;;  %s6342_s2 = inlined_call_operand.vmem [shape: f32[3,64], index: 2, kind: input, shape index: {}]   ;;  %s6343_s3 = inlined_call_operand.vmem [shape: f32[4,64,64], index: 3, kind: input, shape index: {}]   ;;  %s6344_s4 = inlined_call_operand.hbm [shape: f32[5,64,256], index: 4, kind: input, shape index: {}]   ;;  %s6345_s5 = inlined_call_operand.vmem [shape: f32[256,64], index: 5, kind: input, shape index: {}]   ;;  %s6346_s6 = inlined_call_operand.vmem [shape: f32[64,16], index: 6, kind: input, shape index: {}]   ;;  %s6347_s7 = inlined_call_operand.vmem [shape: f32[16,4], index: 7, kind: input, shape index: {}]   ;;  %s6348_s8 = inlined_call_operand.vmem [shape: f32[4,2], index: 8, kind: input, shape index: {}]   ;;  %s6349_s9 = inlined_call_operand.vmem [shape: f32[10,3,256], index: 9, kind: input, shape index: {}]   ;;  %s6350_s10 = inlined_call_operand.vmem [shape: f32[64,2], index: 10, kind: output, shape index: {}]  }
   0x1   :  { %s29_s14 = sshll.u32 %s5246_s13, 4  ;;  %s5222_s17 = scalar_lea.hbm %s6344_s4, 10240  ;;  %s30_s14 = int_to_ptr.vmem [resolvable:$true] %s29_s14 }
   0x2   :  { %p5223_p0 = scmp.ne.s32.totalorder %s6344_s4, %s5222_s17  ;;  %p5226_p1 = scmp.lt.u32.totalorder %s5222_s17, %s6344_s4 }
   0x4   :  { %p5228_p2 = pnand %p5226_p1, %p5223_p0 }
   0x6   :  { %5231 = shalt.err (!%p5228_p2)
}
   0x7   :  { %s5232_s22 = scalar_lea.vmem %s30_s14, 10240  ;;  %p5237_p4 = scmp.lt.s32.totalorder %s30_s14, %s30_s14 }
   0x8   :  { %p5233_p3 = scmp.ne.s32.totalorder %s30_s14, %s5232_s22  ;;  %p5238_p5 = scmp.lt.s32.totalorder %s5232_s22, %s5232_s22 }
   0xa   :  { %p5239_p6 = por %p5238_p5, %p5237_p4 }
   0xc   :  { %p5240_p7 = pnand %p5239_p6, %p5233_p3 }
   0xe   :  { %5243 = shalt.err (!%p5240_p7)
}
   0xf   :  { %s5247_s23 = smov 256   ;;  %s5248_s24 = smov 16  }
  0x10   :  { %35 = dma.hbm_to_vmem [thread:$0]  %s6344_s4, 10240, %s30_s14, [#allocation3], %s5247_s23, %s5247_s23, %s5248_s24  }
  0x11   :  { %5244 = dma.done.wait [#allocation3], 10240  }
  0x12   :  { %5245 = vsyncadd [#allocation3], 4294957056  ;;  %v62_v0 = vld [vmem:[%s6341_s1] sm:$0xff]  ;;  %v63_v1 = vld [vmem:[%s6341_s1 + $0x8] sm:$0xff]  ;;  %vm70_vm0 = vcmask 523264   ;;  %vm231_vm1 = vcmask 1042432   ;;  %v202_v42 = vlaneseq }
  0x13   :  { %v64_v2 = vld [vmem:[%s6341_s1 + $0x10] sm:$0xff]  ;;  %v4687_v3 = vpack.c.bf16 %v63_v1, %v62_v0  ;;  %v65_v4 = vld [vmem:[%s6341_s1 + $0x18] sm:$0xff]  ;;  %v66_v6 = vld [vmem:[%s6341_s1 + $0x20] sm:$0xff]  ;;  %vm206_vm2 = vcmask 23552   ;;  %vm3096_vm3 = vcmask 130048   ;;  %vm3579_vm4 = vcmask 1043456  }
  0x14   :  { %v4691_v5 = vpack.c.bf16 %v65_v4, %v64_v2  ;;  %v67_v7 = vld [vmem:[%s6341_s1 + $0x28] sm:$0xff]  ;;  %v50_v8 = vld [vmem:[%s6340_s0] sm:$0xff]  ;;  %v68_v10 = vld [vmem:[%s6341_s1 + $0x30] sm:$0xff]  ;;  %v5430_v43 = vshrl.u32 %v202_v42, 7  ;;  %vm3466_vm5 = vcmask 31744   ;;  %vm3839_vm6 = vcmask 15360  }
  0x15   :  { %4688 = vmatprep.subr.bf16.mxu0 %v4687_v3  ;;  %4399 = vmatprep.mubr.msk.f32.mxu0 %vm70_vm0, %v50_v8  ;;  %v4695_v9 = vpack.c.bf16 %v67_v7, %v66_v6  ;;  %v69_v11 = vld [vmem:[%s6341_s1 + $0x38] sm:$0xff]  ;;  %v51_v13 = vld [vmem:[%s6340_s0 + $0x8] sm:$0xff]  ;;  %v5351_v14 = vld [vmem:[%s6340_s0 + $0x10] sm:$0xff] }
  0x16   :  { %4690 = vmatpush3.bf16.msra.mxu0 %v4687_v3  ;;  %v4699_v12 = vpack.c.bf16 %v69_v11, %v68_v10  ;;  %v5359_v15 = vld [vmem:[%s6340_s0 + $0x18] sm:$0xff]  ;;  %v5364_v16 = vld [vmem:[%s6340_s0 + $0x20] sm:$0xff]  ;;  %v5373_v17 = vld [vmem:[%s6340_s0 + $0x28] sm:$0xff]  ;;  %v5382_v19 = vpack.c.bf16 %v51_v13, %v50_v8  ;;  %v5433_v44 = vsub.s32 0, %v5430_v43 }
  0x17   :  { %4692 = vmatprep.subr.bf16.mxu0 %v4691_v5  ;;  %v5378_v18 = vld [vmem:[%s6340_s0 + $0x30] sm:$0xff]  ;;  %v5389_v20 = vld [vmem:[%s6340_s0 + $0x38] sm:$0xff]  ;;  %v200_v21 = vld [vmem:[%s6342_s2] sm:$0x7] }
  0x18   :  { %4411 = vmatprep.subr.msk.mxu1 %vm231_vm1, %v200_v21  ;;  %v468_v30 = vld [vmem:[%s6343_s3] sm:$0xff]  ;;  %v469_v31 = vld [vmem:[%s6343_s3 + $0x8] sm:$0xff]  ;;  %v470_v32 = vld [vmem:[%s6343_s3 + $0x10] sm:$0xff] }
  0x19   :  { %4412 = vmatpush3.msk.msra.mxu1 %vm231_vm1, %v200_v21  ;;  %v480_v33 = vpack.c.bf16 %v469_v31, %v468_v30  ;;  %v471_v34 = vld [vmem:[%s6343_s3 + $0x18] sm:$0xff]  ;;  %v472_v36 = vld [vmem:[%s6343_s3 + $0x20] sm:$0xff]  ;;  %v473_v37 = vld [vmem:[%s6343_s3 + $0x28] sm:$0xff] }
  0x1a   :  { %4694 = vmatpush3.bf16.msra.mxu0 %v4691_v5  ;;  %v481_v35 = vpack.c.bf16 %v471_v34, %v470_v32  ;;  %v482_v38 = vpack.c.bf16 %v473_v37, %v472_v36  ;;  %v474_v39 = vld [vmem:[%s6343_s3 + $0x30] sm:$0xff]  ;;  %v475_v40 = vld [vmem:[%s6343_s3 + $0x38] sm:$0xff]  ;;  %v5438_v45 = vld [vmem:[%s6349_s9] sm:$0x77] }
  0x1b   :  { %4696 = vmatprep.subr.bf16.mxu0 %v4695_v9  ;;  %4425 = vmatprep.subr.bf16.mxu1 %v480_v33  ;;  %v483_v41 = vpack.c.bf16 %v475_v40, %v474_v39  ;;  %v205_v46 = vrot.slane %v5438_v45, %v5433_v44 }
  0x1e   :  { %4698 = vmatpush3.bf16.msra.mxu0 %v4695_v9 }
  0x1f   :  { %4700 = vmatprep.subr.bf16.mxu0 %v4699_v12 }
  0x22   :  { %4702 = vmatpush3.bf16.msra.mxu0 %v4699_v12 }
  0x25   :  { %4400 = vmatmul.mubr.msk.f32.vlgmr.msra.gmra.mrb[0].mxu0 %vm70_vm0, %v51_v13 }
  0x26   :  { %4402 = vmatprep.mubr.msk.f32.mxu0 %vm70_vm0, %v5351_v14 }
  0x29   :  { %4403 = vmatmul.mubr.msk.f32.gmra.mrb[2].mxu0 %vm70_vm0, %v5359_v15 }
  0x2a   :  { %4405 = vmatprep.mubr.msk.f32.mxu0 %vm70_vm0, %v5364_v16 }
  0x2d   :  { %4406 = vmatmul.mubr.msk.f32.gmra.mrb[4].mxu0 %vm70_vm0, %v5373_v17 }
  0x2e   :  { %4408 = vmatprep.mubr.msk.f32.mxu0 %vm70_vm0, %v5378_v18 }
  0x31   :  { %4409 = vmatmul.mubr.msk.f32.gmra.mrb[6].mxu0 %vm70_vm0, %v5389_v20 }
  0x32   :  { %4449 = vmatprep.mubr.msk.bf16.mxu0 %vm70_vm0, %v5382_v19 }
  0xf8   :  { %v4401_v22 = vpop.f32.mrb[0].mxu0 }
  0xf9   :  { %v161_v23 = vpop.f32.mrb[1].mxu0 }
  0xfa   :  { %4413 = vmatprep.mubr.msk.f32.mxu1 %vm206_vm2, %v161_v23 }
  0xfb   :  { %4414 = vmatmul.mubr.msk.f32.vlgmr.msra.gmra.mrb[0].mxu1 %vm206_vm2, %v4401_v22 }
  0xfc   :  { %v4404_v24 = vpop.f32.mrb[2].mxu0  ;;  %4426 = vmatpush3.bf16.msra.mxu1 %v480_v33 }
  0xfd   :  { %v171_v25 = vpop.f32.mrb[3].mxu0  ;;  %4427 = vmatprep.subr.bf16.mxu1 %v481_v35 }
  0xfe   :  { %4416 = vmatprep.mubr.msk.f32.mxu1 %vm206_vm2, %v171_v25 }
  0xff   :  { %4417 = vmatmul.mubr.msk.f32.gmra.mrb[2].mxu1 %vm206_vm2, %v4404_v24 }
 0x100   :  { %v4407_v26 = vpop.f32.mrb[4].mxu0  ;;  %4428 = vmatpush3.bf16.msra.mxu1 %v481_v35 }
 0x101   :  { %v181_v27 = vpop.f32.mrb[5].mxu0  ;;  %4429 = vmatprep.subr.bf16.mxu1 %v482_v38 }
 0x102   :  { %4419 = vmatprep.mubr.msk.f32.mxu1 %vm206_vm2, %v181_v27 }
 0x103   :  { %4420 = vmatmul.mubr.msk.f32.gmra.mrb[4].mxu1 %vm206_vm2, %v4407_v26 }
 0x104   :  { %v4410_v28 = vpop.f32.mrb[6].mxu0  ;;  %4430 = vmatpush3.bf16.msra.mxu1 %v482_v38 }
 0x105   :  { %v191_v29 = vpop.f32.mrb[7].mxu0  ;;  %4431 = vmatprep.subr.bf16.mxu1 %v483_v41 }
 0x106   :  { %4422 = vmatprep.mubr.msk.f32.mxu1 %vm206_vm2, %v191_v29 }
 0x107   :  { %4423 = vmatmul.mubr.msk.f32.gmra.mrb[6].mxu1 %vm206_vm2, %v4410_v28 }
 0x108   :  { %4432 = vmatpush3.bf16.msra.mxu1 %v483_v41 }
 0x1ce   :  { %v4415_v47 = vpop.f32.mrb[0].mxu1 }
 0x1cf   :  { %v307_v48 = vadd.f32 %v4415_v47, %v205_v46  ;;  %v301_v49 = vpop.f32.mrb[1].mxu1 }
 0x1d0   :  { %v302_v50 = vadd.f32 %v301_v49, %v205_v46 }
 0x1d1   :  { %v341_v51 = vsub.f32 0.0, %v307_v48 }
 0x1d2   :  { %v340_v52 = vsub.f32 0.0, %v302_v50  ;;  %v4418_v53 = vpop.f32.mrb[2].mxu1 }
 0x1d3   :  { %v350_v54 = vmul.f32 1.442695, %v341_v51  ;;  %v317_v55 = vadd.f32 %v4418_v53, %v205_v46  ;;  %v311_v56 = vpop.f32.mrb[3].mxu1 }
 0x1d4   :  { %v348_v57 = vmul.f32 1.442695, %v340_v52  ;;  %v312_v58 = vadd.f32 %v311_v56, %v205_v46 }
 0x1d5   :  { %4807 = vpow2.f32 %v350_v54  ;;  %v343_v59 = vsub.f32 0.0, %v317_v55 }
 0x1d6   :  { %4809 = vpow2.f32 %v348_v57  ;;  %v342_v60 = vsub.f32 0.0, %v312_v58  ;;  %v4421_v61 = vpop.f32.mrb[4].mxu1 }
 0x1d7   :  { %v354_v62 = vmul.f32 1.442695, %v343_v59  ;;  %v327_v63 = vadd.f32 %v4421_v61, %v205_v46  ;;  %v321_v0 = vpop.f32.mrb[5].mxu1 }
 0x1d8   :  { %v352_v1 = vmul.f32 1.442695, %v342_v60  ;;  %v322_v2 = vadd.f32 %v321_v0, %v205_v46 }
 0x1d9   :  { %4811 = vpow2.f32 %v354_v62  ;;  %v345_v3 = vsub.f32 0.0, %v327_v63 }
 0x1da   :  { %4813 = vpow2.f32 %v352_v1  ;;  %v344_v4 = vsub.f32 0.0, %v322_v2  ;;  %v4424_v5 = vpop.f32.mrb[6].mxu1 }
 0x1db   :  { %v358_v6 = vmul.f32 1.442695, %v345_v3  ;;  %v337_v7 = vadd.f32 %v4424_v5, %v205_v46  ;;  %v331_v8 = vpop.f32.mrb[7].mxu1 }
 0x1dc   :  { %v356_v9 = vmul.f32 1.442695, %v344_v4  ;;  %v332_v10 = vadd.f32 %v331_v8, %v205_v46 }
 0x1dd   :  { %4815 = vpow2.f32 %v358_v6  ;;  %v347_v11 = vsub.f32 0.0, %v337_v7 }
 0x1de   :  { %4817 = vpow2.f32 %v356_v9  ;;  %v346_v12 = vsub.f32 0.0, %v332_v10 }
 0x1df   :  { %v4808_v13 = vpop.eup %4807  ;;  %v362_v21 = vmul.f32 1.442695, %v347_v11 }
 0x1e0   :  { %v4810_v22 = vpop.eup %4809  ;;  %v365_v23 = vadd.f32 1.0, %v4808_v13  ;;  %v360_v24 = vmul.f32 1.442695, %v346_v12 }
 0x1e1   :  { %v364_v25 = vadd.f32 1.0, %v4810_v22  ;;  %4819 = vpow2.f32 %v362_v21 }
 0x1e2   :  { %4821 = vrcp.f32 %v365_v23 }
 0x1e3   :  { %v4812_v26 = vpop.eup %4811  ;;  %4823 = vrcp.f32 %v364_v25 }
 0x1e4   :  { %v4814_v27 = vpop.eup %4813  ;;  %v367_v28 = vadd.f32 1.0, %v4812_v26  ;;  %4825 = vpow2.f32 %v360_v24 }
 0x1e5   :  { %v366_v29 = vadd.f32 1.0, %v4814_v27 }
 0x1e6   :  { %4827 = vrcp.f32 %v367_v28 }
 0x1e7   :  { %v4816_v30 = vpop.eup %4815  ;;  %4829 = vrcp.f32 %v366_v29 }
 0x1e8   :  { %v4818_v31 = vpop.eup %4817  ;;  %v369_v32 = vadd.f32 1.0, %v4816_v30 }
 0x1e9   :  { %v368_v33 = vadd.f32 1.0, %v4818_v31 }
 0x1ea   :  { %4831 = vrcp.f32 %v369_v32 }
 0x1eb   :  { %v4820_v34 = vpop.eup %4819  ;;  %4833 = vrcp.f32 %v368_v33 }
 0x1ec   :  { %v4822_v35 = vpop.eup %4821  ;;  %v371_v36 = vadd.f32 1.0, %v4820_v34 }
 0x1ed   :  { %v4824_v37 = vpop.eup %4823  ;;  %v381_v38 = vsel %vm70_vm0, %v4822_v35, 0.0 }
 0x1ee   :  { %v4826_v39 = vpop.eup %4825  ;;  %v380_v40 = vsel %vm70_vm0, %v4824_v37, 0.0  ;;  %4835 = vrcp.f32 %v371_v36 }
 0x1ef   :  { %v382_v41 = vadd.f32 %v381_v38, %v380_v40  ;;  %v370_v42 = vadd.f32 1.0, %v4826_v39 }
 0x1f0   :  { %v4828_v46 = vpop.eup %4827 }
 0x1f1   :  { %v4830_v47 = vpop.eup %4829  ;;  %4837 = vrcp.f32 %v370_v42  ;;  %v385_v51 = vsel %vm70_vm0, %v4828_v46, 0.0 }
 0x1f2   :  { %v383_v48 = vsel %vm70_vm0, %v4830_v47, 0.0 }
 0x1f3   :  { %v384_v49 = vadd.f32 %v383_v48, %v382_v41 }
 0x1f4   :  { %v4832_v50 = vpop.eup %4831 }
 0x1f5   :  { %v4834_v52 = vpop.eup %4833  ;;  %v386_v53 = vadd.f32 %v385_v51, %v384_v49  ;;  %v389_v56 = vsel %vm70_vm0, %v4832_v50, 0.0 }
 0x1f6   :  { %v387_v54 = vsel %vm70_vm0, %v4834_v52, 0.0 }
 0x1f7   :  { %v388_v55 = vadd.f32 %v387_v54, %v386_v53 }
 0x1f8   :  { %v4836_v58 = vpop.eup %4835 }
 0x1f9   :  { %v390_v57 = vadd.f32 %v389_v56, %v388_v55  ;;  %v393_v62 = vsel %vm70_vm0, %v4836_v58, 0.0  ;;  %v5459_v56 = vsub.s32 2, %v5430_v43 }
 0x1fb   :  { %v4838_v59 = vpop.eup %4837 }
 0x1fc   :  { %v391_v60 = vsel %vm70_vm0, %v4838_v59, 0.0 }
 0x1fd   :  { %v392_v61 = vadd.f32 %v391_v60, %v390_v57  ;;  %v5462_v57 = vsub.s32 1, %v5430_v43  ;;  %v459_v60 = vrot.slane %v5438_v45, %v5459_v56 }
 0x1ff   :  { %v394_v63 = vadd.f32 %v393_v62, %v392_v61 }
 0x201   :  { %v395_v0 = vrot.slane %v394_v63, 4 }
 0x203   :  { %v396_v1 = vadd.f32 %v395_v0, %v394_v63 }
 0x205   :  { %v397_v2 = vrot.slane %v396_v1, 2 }
 0x207   :  { %v398_v3 = vadd.f32 %v397_v2, %v396_v1 }
 0x209   :  { %v399_v4 = vrot.slane %v398_v3, 1 }
 0x20b   :  { %v400_v5 = vadd.f32 %v399_v4, %v398_v3 }
 0x20d   :  { %v402_v6 = vmul.f32 0.015625, %v400_v5 }
 0x20f   :  { %v409_v7 = vsub.f32 %v4838_v59, %v402_v6  ;;  %v403_v8 = vsub.f32 %v4824_v37, %v402_v6  ;;  %v404_v9 = vsub.f32 %v4822_v35, %v402_v6  ;;  %v405_v10 = vsub.f32 %v4830_v47, %v402_v6 }
 0x210   :  { %v406_v11 = vsub.f32 %v4828_v46, %v402_v6  ;;  %v407_v12 = vsub.f32 %v4834_v52, %v402_v6  ;;  %v408_v13 = vsub.f32 %v4832_v50, %v402_v6  ;;  %v410_v21 = vsub.f32 %v4836_v58, %v402_v6 }
 0x211   :  { %v411_v22 = vmul.f32 %v403_v8, %v403_v8  ;;  %v412_v23 = vmul.f32 %v404_v9, %v404_v9  ;;  %v413_v24 = vmul.f32 %v405_v10, %v405_v10  ;;  %v417_v35 = vmul.f32 %v409_v7, %v409_v7 }
 0x212   :  { %v414_v25 = vmul.f32 %v406_v11, %v406_v11  ;;  %v415_v29 = vmul.f32 %v407_v12, %v407_v12  ;;  %v416_v32 = vmul.f32 %v408_v13, %v408_v13  ;;  %v418_v38 = vmul.f32 %v410_v21, %v410_v21 }
 0x213   :  { %v419_v26 = vsel %vm70_vm0, %v411_v22, 0.0  ;;  %v420_v27 = vsel %vm70_vm0, %v412_v23, 0.0  ;;  %v422_v30 = vsel %vm70_vm0, %v413_v24, 0.0  ;;  %v430_v41 = vsel %vm70_vm0, %v417_v35, 0.0 }
 0x214   :  { %v421_v28 = vadd.f32 %v420_v27, %v419_v26  ;;  %v424_v33 = vsel %vm70_vm0, %v414_v25, 0.0  ;;  %v426_v36 = vsel %vm70_vm0, %v415_v29, 0.0  ;;  %v428_v39 = vsel %vm70_vm0, %v416_v32, 0.0 }
 0x215   :  { %v432_v46 = vsel %vm70_vm0, %v418_v38, 0.0  ;;  %v5498_v38 = vpack.c.bf16 %v5389_v20, %v5378_v18  ;;  %v4057_v18 = vld [vmem:[%s6343_s3 + $0x58] sm:$0xff] }
 0x216   :  { %v423_v31 = vadd.f32 %v422_v30, %v421_v28 }
 0x218   :  { %v425_v34 = vadd.f32 %v424_v33, %v423_v31 }
 0x21a   :  { %v427_v37 = vadd.f32 %v426_v36, %v425_v34  ;;  %v5486_v36 = vpack.c.bf16 %v5359_v15, %v5351_v14  ;;  %v4054_v14 = vld [vmem:[%s6343_s3 + $0x40] sm:$0xff]  ;;  %v4055_v15 = vld [vmem:[%s6343_s3 + $0x48] sm:$0xff] }
 0x21c   :  { %v429_v40 = vadd.f32 %v428_v39, %v427_v37  ;;  %v5490_v37 = vpack.c.bf16 %v5373_v17, %v5364_v16  ;;  %v4056_v16 = vld [vmem:[%s6343_s3 + $0x50] sm:$0xff]  ;;  %v788_v17 = vpack.c.bf16 %v4055_v15, %v4054_v14  ;;  %v4058_v39 = vld [vmem:[%s6343_s3 + $0x60] sm:$0xff] }
 0x21d   :  { %v789_v20 = vpack.c.bf16 %v4057_v18, %v4056_v16 }
 0x21e   :  { %v431_v42 = vadd.f32 %v430_v41, %v429_v40  ;;  %v4059_v40 = vld [vmem:[%s6343_s3 + $0x68] sm:$0xff]  ;;  %4457 = vmatprep.subr.bf16.mxu1 %v788_v17 }
 0x21f   :  { %v790_v41 = vpack.c.bf16 %v4059_v40, %v4058_v39 }
 0x220   :  { %v433_v47 = vadd.f32 %v432_v46, %v431_v42  ;;  %v4060_v42 = vld [vmem:[%s6343_s3 + $0x70] sm:$0xff]  ;;  %v4061_v46 = vld [vmem:[%s6343_s3 + $0x78] sm:$0xff] }
 0x222   :  { %v434_v48 = vrot.slane %v433_v47, 4 }
 0x224   :  { %v435_v49 = vadd.f32 %v434_v48, %v433_v47  ;;  %v791_v47 = vpack.c.bf16 %v4061_v46, %v4060_v42  ;;  %v5531_v48 = vld [vmem:[%s6349_s9 + $0x8] sm:$0x77] }
 0x226   :  { %v436_v50 = vrot.slane %v435_v49, 2 }
 0x228   :  { %v437_v51 = vadd.f32 %v436_v50, %v435_v49  ;;  %v570_v49 = vrot.slane %v5531_v48, %v5433_v44 }
 0x22a   :  { %v438_v52 = vrot.slane %v437_v51, 1 }
 0x22c   :  { %v439_v53 = vadd.f32 %v438_v52, %v437_v51 }
 0x22e   :  { %v440_v54 = vmul.f32 0.015625, %v439_v53 }
 0x230   :  { %v441_v55 = vadd.f32 1e-05, %v440_v54 }
 0x232   :  { %4839 = vrsqrt.f32 %v441_v55 }
 0x23c   :  { %v4840_v58 = vpop.eup %4839 }
 0x23d   :  { %v443_v59 = vmul.f32 %v4840_v58, %v5438_v45 }
 0x23f   :  { %v447_v61 = vrot.slane %v443_v59, %v5462_v57 }
 0x241   :  { %v448_v62 = vmul.f32 %v447_v61, %v403_v8  ;;  %v449_v63 = vmul.f32 %v447_v61, %v404_v9  ;;  %v450_v0 = vmul.f32 %v447_v61, %v405_v10  ;;  %v451_v1 = vmul.f32 %v447_v61, %v406_v11 }
 0x242   :  { %v452_v2 = vmul.f32 %v447_v61, %v407_v12  ;;  %v453_v3 = vmul.f32 %v447_v61, %v408_v13  ;;  %v454_v4 = vmul.f32 %v447_v61, %v409_v7  ;;  %v455_v5 = vmul.f32 %v447_v61, %v410_v21 }
 0x243   :  { %v460_v6 = vadd.f32 %v459_v60, %v448_v62  ;;  %v461_v22 = vadd.f32 %v459_v60, %v449_v63  ;;  %v462_v23 = vadd.f32 %v459_v60, %v450_v0  ;;  %v463_v24 = vadd.f32 %v459_v60, %v451_v1 }
 0x244   :  { %v464_v25 = vadd.f32 %v459_v60, %v452_v2  ;;  %v465_v26 = vadd.f32 %v459_v60, %v453_v3  ;;  %v466_v27 = vadd.f32 %v459_v60, %v454_v4  ;;  %v467_v28 = vadd.f32 %v459_v60, %v455_v5 }
 0x245   :  { %v5468_v29 = vpack.c.bf16 %v461_v22, %v460_v6  ;;  %v5470_v45 = vpack.c.bf16 %v463_v24, %v462_v23 }
 0x246   :  { %v5472_v8 = vpack.c.bf16 %v465_v26, %v464_v25  ;;  %v5474_v9 = vpack.c.bf16 %v467_v28, %v466_v27 }
 0x247   :  { %4433 = vmatprep.mubr.msk.bf16.mxu1 %vm70_vm0, %v5468_v29 }
 0x248   :  { %4434 = vmatmul.mubr.msk.bf16.vlgmr.msra.gmra.mrb[8].mxu1 %vm70_vm0, %v5470_v45 }
 0x249   :  { %4437 = vmatprep.mubr.msk.bf16.mxu1 %vm70_vm0, %v5472_v8  ;;  %4458 = vmatpush3.bf16.msra.mxu1 %v788_v17 }
 0x24a   :  { %4459 = vmatprep.subr.bf16.mxu1 %v789_v20 }
 0x24d   :  { %4460 = vmatpush3.bf16.msra.mxu1 %v789_v20 }
 0x24e   :  { %4461 = vmatprep.subr.bf16.mxu1 %v790_v41 }
 0x250   :  { %4438 = vmatmul.mubr.msk.bf16.gmra.mrb[12].mxu1 %vm70_vm0, %v5474_v9 }
 0x251   :  { %4462 = vmatpush3.bf16.msra.mxu1 %v790_v41 }
 0x252   :  { %4463 = vmatprep.subr.bf16.mxu1 %v791_v47 }
 0x255   :  { %4464 = vmatpush3.bf16.msra.mxu1 %v791_v47 }
 0x31b   :  { %v4435_v7 = vpop.f32.mrb[8].mxu1 }
 0x31c   :  { %v530_v10 = vpop.f32.mrb[9].mxu1 }
 0x31d   :  { %v4436_v11 = vpop.f32.mrb[10].mxu1 }
 0x31e   :  { %v562_v12 = vpack.c.bf16 %v4436_v11, %v4435_v7  ;;  %v533_v13 = vpop.f32.mrb[11].mxu1 }
 0x31f   :  { %v561_v21 = vpack.c.bf16 %v533_v13, %v530_v10 }
 0x321   :  { %4441 = vmatprep.subr.bf16.mxu0 %v561_v21 }
 0x322   :  { %4442 = vmatpush3.bf16.msra.mxu0 %v561_v21 }
 0x323   :  { %v4439_v30 = vpop.f32.mrb[12].mxu1  ;;  %4443 = vmatprep.subr.bf16.mxu0 %v562_v12 }
 0x324   :  { %v546_v31 = vpop.f32.mrb[13].mxu1 }
 0x325   :  { %v4440_v32 = vpop.f32.mrb[14].mxu1 }
 0x326   :  { %v564_v33 = vpack.c.bf16 %v4440_v32, %v4439_v30  ;;  %v549_v34 = vpop.f32.mrb[15].mxu1  ;;  %4444 = vmatpush3.bf16.msra.mxu0 %v562_v12 }
 0x327   :  { %v563_v35 = vpack.c.bf16 %v549_v34, %v546_v31 }
 0x329   :  { %4445 = vmatprep.subr.bf16.mxu0 %v563_v35 }
 0x32a   :  { %4446 = vmatpush3.bf16.msra.mxu0 %v563_v35 }
 0x32b   :  { %4447 = vmatprep.subr.bf16.mxu0 %v564_v33 }
 0x32e   :  { %4448 = vmatpush3.bf16.msra.mxu0 %v564_v33 }
 0x331   :  { %4450 = vmatmul.mubr.msk.bf16.vlgmr.msra.gmra.mrb[8].mxu0 %vm70_vm0, %v5486_v36 }
 0x332   :  { %4453 = vmatprep.mubr.msk.bf16.mxu0 %vm70_vm0, %v5490_v37 }
 0x339   :  { %4454 = vmatmul.mubr.msk.bf16.gmra.mrb[12].mxu0 %vm70_vm0, %v5498_v38 }
 0x33a   :  { %4481 = vmatprep.mubr.msk.bf16.mxu0 %vm70_vm0, %v5382_v19 }
 0x404   :  { %v4451_v50 = vpop.f32.mrb[8].mxu0 }
 0x405   :  { %v626_v51 = vadd.f32 %v4451_v50, %v570_v49  ;;  %v617_v52 = vpop.f32.mrb[9].mxu0 }
 0x406   :  { %v618_v53 = vadd.f32 %v617_v52, %v570_v49  ;;  %v4452_v54 = vpop.f32.mrb[10].mxu0 }
 0x407   :  { %v650_v55 = vsub.f32 0.0, %v626_v51  ;;  %v629_v58 = vadd.f32 %v4452_v54, %v570_v49  ;;  %v620_v59 = vpop.f32.mrb[11].mxu0 }
 0x408   :  { %v648_v60 = vsub.f32 0.0, %v618_v53  ;;  %v621_v61 = vadd.f32 %v620_v59, %v570_v49 }
 0x409   :  { %v660_v62 = vmul.f32 1.442695, %v650_v55  ;;  %v651_v63 = vsub.f32 0.0, %v629_v58 }
 0x40a   :  { %v656_v0 = vmul.f32 1.442695, %v648_v60  ;;  %v649_v1 = vsub.f32 0.0, %v621_v61 }
 0x40b   :  { %4841 = vpow2.f32 %v660_v62  ;;  %v662_v2 = vmul.f32 1.442695, %v651_v63 }
 0x40c   :  { %4843 = vpow2.f32 %v656_v0  ;;  %v658_v3 = vmul.f32 1.442695, %v649_v1  ;;  %v4455_v4 = vpop.f32.mrb[12].mxu0 }
 0x40d   :  { %4845 = vpow2.f32 %v662_v2  ;;  %v642_v5 = vadd.f32 %v4455_v4, %v570_v49  ;;  %v633_v6 = vpop.f32.mrb[13].mxu0 }
 0x40e   :  { %4847 = vpow2.f32 %v658_v3  ;;  %v634_v22 = vadd.f32 %v633_v6, %v570_v49  ;;  %v4456_v23 = vpop.f32.mrb[14].mxu0 }
 0x40f   :  { %v654_v24 = vsub.f32 0.0, %v642_v5  ;;  %v645_v25 = vadd.f32 %v4456_v23, %v570_v49  ;;  %v636_v26 = vpop.f32.mrb[15].mxu0 }
 0x410   :  { %v652_v27 = vsub.f32 0.0, %v634_v22  ;;  %v637_v28 = vadd.f32 %v636_v26, %v570_v49 }
 0x411   :  { %v668_v7 = vmul.f32 1.442695, %v654_v24  ;;  %v655_v10 = vsub.f32 0.0, %v645_v25 }
 0x412   :  { %v664_v11 = vmul.f32 1.442695, %v652_v27  ;;  %v653_v12 = vsub.f32 0.0, %v637_v28 }
 0x413   :  { %4849 = vpow2.f32 %v668_v7  ;;  %v670_v13 = vmul.f32 1.442695, %v655_v10 }
 0x414   :  { %4851 = vpow2.f32 %v664_v11  ;;  %v666_v21 = vmul.f32 1.442695, %v653_v12 }
 0x415   :  { %v4842_v30 = vpop.eup %4841  ;;  %4853 = vpow2.f32 %v670_v13 }
 0x416   :  { %v4844_v31 = vpop.eup %4843  ;;  %v674_v32 = vadd.f32 1.0, %v4842_v30  ;;  %4855 = vpow2.f32 %v666_v21 }
 0x417   :  { %v4846_v33 = vpop.eup %4845  ;;  %v672_v34 = vadd.f32 1.0, %v4844_v31 }
 0x418   :  { %v4848_v35 = vpop.eup %4847  ;;  %v675_v14 = vadd.f32 1.0, %v4846_v33 }
 0x419   :  { %4857 = vrcp.f32 %v672_v34  ;;  %v673_v15 = vadd.f32 1.0, %v4848_v35 }
 0x41a   :  { %4859 = vrcp.f32 %v674_v32 }
 0x41b   :  { %4861 = vrcp.f32 %v673_v15 }
 0x41c   :  { %4863 = vrcp.f32 %v675_v14 }
 0x41d   :  { %v4850_v16 = vpop.eup %4849 }
 0x41e   :  { %v4852_v17 = vpop.eup %4851  ;;  %v678_v18 = vadd.f32 1.0, %v4850_v16 }
 0x41f   :  { %v4854_v20 = vpop.eup %4853  ;;  %v676_v39 = vadd.f32 1.0, %v4852_v17 }
 0x420   :  { %v4856_v40 = vpop.eup %4855  ;;  %v679_v41 = vadd.f32 1.0, %v4854_v20 }
 0x421   :  { %4865 = vrcp.f32 %v676_v39  ;;  %v677_v42 = vadd.f32 1.0, %v4856_v40 }
 0x422   :  { %4867 = vrcp.f32 %v678_v18 }
 0x423   :  { %v4858_v46 = vpop.eup %4857  ;;  %4869 = vrcp.f32 %v677_v42 }
 0x424   :  { %v4860_v47 = vpop.eup %4859  ;;  %4871 = vrcp.f32 %v679_v41  ;;  %v688_v50 = vsel %vm70_vm0, %v4858_v46, 0.0 }
 0x425   :  { %v4862_v49 = vpop.eup %4861  ;;  %v691_v54 = vsel %vm70_vm0, %v4860_v47, 0.0 }
 0x426   :  { %v689_v51 = vsel %vm70_vm0, %v4862_v49, 0.0  ;;  %v4864_v52 = vpop.eup %4863 }
 0x427   :  { %v690_v53 = vadd.f32 %v689_v51, %v688_v50  ;;  %v693_v58 = vsel %vm70_vm0, %v4864_v52, 0.0 }
 0x429   :  { %v692_v55 = vadd.f32 %v691_v54, %v690_v53 }
 0x42b   :  { %v4866_v59 = vpop.eup %4865  ;;  %v694_v60 = vadd.f32 %v693_v58, %v692_v55 }
 0x42c   :  { %v4868_v61 = vpop.eup %4867  ;;  %v695_v62 = vsel %vm70_vm0, %v4866_v59, 0.0 }
 0x42d   :  { %v4870_v63 = vpop.eup %4869  ;;  %v696_v0 = vadd.f32 %v695_v62, %v694_v60  ;;  %v699_v4 = vsel %vm70_vm0, %v4868_v61, 0.0 }
 0x42e   :  { %v697_v1 = vsel %vm70_vm0, %v4870_v63, 0.0  ;;  %v4872_v2 = vpop.eup %4871 }
 0x42f   :  { %v698_v3 = vadd.f32 %v697_v1, %v696_v0  ;;  %v701_v6 = vsel %vm70_vm0, %v4872_v2, 0.0 }
 0x431   :  { %v700_v5 = vadd.f32 %v699_v4, %v698_v3 }
 0x433   :  { %v702_v22 = vadd.f32 %v701_v6, %v700_v5  ;;  %v766_v5 = vrot.slane %v5531_v48, %v5459_v56 }
 0x435   :  { %v703_v23 = vrot.slane %v702_v22, 4 }
 0x437   :  { %v704_v24 = vadd.f32 %v703_v23, %v702_v22 }
 0x439   :  { %v705_v25 = vrot.slane %v704_v24, 2 }
 0x43b   :  { %v706_v26 = vadd.f32 %v705_v25, %v704_v24 }
 0x43d   :  { %v707_v27 = vrot.slane %v706_v26, 1 }
 0x43f   :  { %v708_v28 = vadd.f32 %v707_v27, %v706_v26 }
 0x441   :  { %v709_v7 = vmul.f32 0.015625, %v708_v28 }
 0x443   :  { %v715_v10 = vsub.f32 %v4870_v63, %v709_v7  ;;  %v710_v11 = vsub.f32 %v4858_v46, %v709_v7  ;;  %v711_v12 = vsub.f32 %v4862_v49, %v709_v7  ;;  %v712_v13 = vsub.f32 %v4860_v47, %v709_v7 }
 0x444   :  { %v713_v21 = vsub.f32 %v4864_v52, %v709_v7  ;;  %v714_v30 = vsub.f32 %v4866_v59, %v709_v7  ;;  %v716_v31 = vsub.f32 %v4868_v61, %v709_v7  ;;  %v717_v32 = vsub.f32 %v4872_v2, %v709_v7 }
 0x445   :  { %v718_v33 = vmul.f32 %v710_v11, %v710_v11  ;;  %v719_v34 = vmul.f32 %v711_v12, %v711_v12  ;;  %v720_v35 = vmul.f32 %v712_v13, %v712_v13  ;;  %v723_v40 = vmul.f32 %v715_v10, %v715_v10 }
 0x446   :  { %v721_v14 = vmul.f32 %v713_v21, %v713_v21  ;;  %v722_v18 = vmul.f32 %v714_v30, %v714_v30  ;;  %v724_v46 = vmul.f32 %v716_v31, %v716_v31  ;;  %v725_v51 = vmul.f32 %v717_v32, %v717_v32 }
 0x447   :  { %v726_v15 = vsel %vm70_vm0, %v718_v33, 0.0  ;;  %v727_v16 = vsel %vm70_vm0, %v719_v34, 0.0  ;;  %v729_v20 = vsel %vm70_vm0, %v720_v35, 0.0  ;;  %v735_v50 = vsel %vm70_vm0, %v723_v40, 0.0 }
 0x448   :  { %v728_v17 = vadd.f32 %v727_v16, %v726_v15  ;;  %v731_v41 = vsel %vm70_vm0, %v721_v14, 0.0  ;;  %v733_v47 = vsel %vm70_vm0, %v722_v18, 0.0  ;;  %v737_v53 = vsel %vm70_vm0, %v724_v46, 0.0 }
 0x449   :  { %v739_v55 = vsel %vm70_vm0, %v725_v51, 0.0  ;;  %v4073_v51 = vld [vmem:[%s6343_s3 + $0x90] sm:$0xff] }
 0x44a   :  { %v730_v39 = vadd.f32 %v729_v20, %v728_v17 }
 0x44c   :  { %v732_v42 = vadd.f32 %v731_v41, %v730_v39 }
 0x44e   :  { %v734_v49 = vadd.f32 %v733_v47, %v732_v42 }
 0x450   :  { %v736_v52 = vadd.f32 %v735_v50, %v734_v49  ;;  %v4071_v49 = vld [vmem:[%s6343_s3 + $0x80] sm:$0xff]  ;;  %v4072_v50 = vld [vmem:[%s6343_s3 + $0x88] sm:$0xff] }
 0x452   :  { %v738_v54 = vadd.f32 %v737_v53, %v736_v52  ;;  %v1084_v52 = vpack.c.bf16 %v4072_v50, %v4071_v49  ;;  %v4074_v53 = vld [vmem:[%s6343_s3 + $0x98] sm:$0xff] }
 0x454   :  { %v740_v58 = vadd.f32 %v739_v55, %v738_v54  ;;  %v1085_v54 = vpack.c.bf16 %v4074_v53, %v4073_v51  ;;  %v4075_v55 = vld [vmem:[%s6343_s3 + $0xa0] sm:$0xff]  ;;  %4489 = vmatprep.subr.bf16.mxu1 %v1084_v52 }
 0x456   :  { %v741_v59 = vrot.slane %v740_v58, 4 }
 0x458   :  { %v742_v60 = vadd.f32 %v741_v59, %v740_v58  ;;  %v4076_v58 = vld [vmem:[%s6343_s3 + $0xa8] sm:$0xff] }
 0x459   :  { %v1086_v59 = vpack.c.bf16 %v4076_v58, %v4075_v55 }
 0x45a   :  { %v743_v61 = vrot.slane %v742_v60, 2 }
 0x45c   :  { %v744_v62 = vadd.f32 %v743_v61, %v742_v60  ;;  %v4077_v60 = vld [vmem:[%s6343_s3 + $0xb0] sm:$0xff]  ;;  %v4078_v61 = vld [vmem:[%s6343_s3 + $0xb8] sm:$0xff] }
 0x45e   :  { %v745_v63 = vrot.slane %v744_v62, 1 }
 0x460   :  { %v746_v0 = vadd.f32 %v745_v63, %v744_v62  ;;  %v1087_v62 = vpack.c.bf16 %v4078_v61, %v4077_v60  ;;  %v5606_v63 = vld [vmem:[%s6349_s9 + $0x10] sm:$0x77] }
 0x462   :  { %v747_v1 = vmul.f32 0.015625, %v746_v0  ;;  %v878_v0 = vrot.slane %v5606_v63, %v5433_v44 }
 0x464   :  { %v748_v2 = vadd.f32 1e-05, %v747_v1 }
 0x466   :  { %4873 = vrsqrt.f32 %v748_v2 }
 0x470   :  { %v4874_v3 = vpop.eup %4873 }
 0x471   :  { %v750_v4 = vmul.f32 %v4874_v3, %v5531_v48 }
 0x473   :  { %v754_v6 = vrot.slane %v750_v4, %v5462_v57 }
 0x475   :  { %v755_v22 = vmul.f32 %v754_v6, %v710_v11  ;;  %v756_v23 = vmul.f32 %v754_v6, %v711_v12  ;;  %v757_v24 = vmul.f32 %v754_v6, %v712_v13  ;;  %v758_v25 = vmul.f32 %v754_v6, %v713_v21 }
 0x476   :  { %v759_v26 = vmul.f32 %v754_v6, %v714_v30  ;;  %v760_v27 = vmul.f32 %v754_v6, %v715_v10  ;;  %v761_v28 = vmul.f32 %v754_v6, %v716_v31  ;;  %v762_v7 = vmul.f32 %v754_v6, %v717_v32 }
 0x477   :  { %v767_v33 = vadd.f32 %v766_v5, %v755_v22  ;;  %v768_v34 = vadd.f32 %v766_v5, %v756_v23  ;;  %v769_v35 = vadd.f32 %v766_v5, %v757_v24  ;;  %v770_v14 = vadd.f32 %v766_v5, %v758_v25 }
 0x478   :  { %v771_v15 = vadd.f32 %v766_v5, %v759_v26  ;;  %v772_v16 = vadd.f32 %v766_v5, %v760_v27  ;;  %v773_v17 = vadd.f32 %v766_v5, %v761_v28  ;;  %v774_v18 = vadd.f32 %v766_v5, %v762_v7 }
 0x479   :  { %v5555_v20 = vpack.c.bf16 %v768_v34, %v767_v33  ;;  %v5557_v48 = vpack.c.bf16 %v770_v14, %v769_v35 }
 0x47a   :  { %v5559_v11 = vpack.c.bf16 %v772_v16, %v771_v15  ;;  %v5561_v12 = vpack.c.bf16 %v774_v18, %v773_v17 }
 0x47b   :  { %4465 = vmatprep.mubr.msk.bf16.mxu1 %vm70_vm0, %v5555_v20 }
 0x47c   :  { %4466 = vmatmul.mubr.msk.bf16.vlgmr.msra.gmra.mrb[16].mxu1 %vm70_vm0, %v5557_v48 }
 0x47d   :  { %4469 = vmatprep.mubr.msk.bf16.mxu1 %vm70_vm0, %v5559_v11  ;;  %4490 = vmatpush3.bf16.msra.mxu1 %v1084_v52 }
 0x47e   :  { %4491 = vmatprep.subr.bf16.mxu1 %v1085_v54 }
 0x481   :  { %4492 = vmatpush3.bf16.msra.mxu1 %v1085_v54 }
 0x482   :  { %4493 = vmatprep.subr.bf16.mxu1 %v1086_v59 }
 0x484   :  { %4470 = vmatmul.mubr.msk.bf16.gmra.mrb[20].mxu1 %vm70_vm0, %v5561_v12 }
 0x485   :  { %4494 = vmatpush3.bf16.msra.mxu1 %v1086_v59 }
 0x486   :  { %4495 = vmatprep.subr.bf16.mxu1 %v1087_v62 }
 0x489   :  { %4496 = vmatpush3.bf16.msra.mxu1 %v1087_v62 }
 0x54f   :  { %v4467_v10 = vpop.f32.mrb[16].mxu1 }
 0x550   :  { %v838_v13 = vpop.f32.mrb[17].mxu1 }
 0x551   :  { %v4468_v21 = vpop.f32.mrb[18].mxu1 }
 0x552   :  { %v870_v30 = vpack.c.bf16 %v4468_v21, %v4467_v10  ;;  %v841_v31 = vpop.f32.mrb[19].mxu1 }
 0x553   :  { %v869_v32 = vpack.c.bf16 %v841_v31, %v838_v13 }
 0x555   :  { %4473 = vmatprep.subr.bf16.mxu0 %v869_v32 }
 0x556   :  { %4474 = vmatpush3.bf16.msra.mxu0 %v869_v32 }
 0x557   :  { %v4471_v39 = vpop.f32.mrb[20].mxu1  ;;  %4475 = vmatprep.subr.bf16.mxu0 %v870_v30 }
 0x558   :  { %v854_v40 = vpop.f32.mrb[21].mxu1 }
 0x559   :  { %v4472_v41 = vpop.f32.mrb[22].mxu1 }
 0x55a   :  { %v872_v42 = vpack.c.bf16 %v4472_v41, %v4471_v39  ;;  %v857_v46 = vpop.f32.mrb[23].mxu1  ;;  %4476 = vmatpush3.bf16.msra.mxu0 %v870_v30 }
 0x55b   :  { %v871_v47 = vpack.c.bf16 %v857_v46, %v854_v40 }
 0x55d   :  { %4477 = vmatprep.subr.bf16.mxu0 %v871_v47 }
 0x55e   :  { %4478 = vmatpush3.bf16.msra.mxu0 %v871_v47 }
 0x55f   :  { %4479 = vmatprep.subr.bf16.mxu0 %v872_v42 }
 0x562   :  { %4480 = vmatpush3.bf16.msra.mxu0 %v872_v42 }
 0x565   :  { %4482 = vmatmul.mubr.msk.bf16.vlgmr.msra.gmra.mrb[16].mxu0 %vm70_vm0, %v5486_v36 }
 0x566   :  { %4485 = vmatprep.mubr.msk.bf16.mxu0 %vm70_vm0, %v5490_v37 }
 0x56d   :  { %4486 = vmatmul.mubr.msk.bf16.gmra.mrb[20].mxu0 %vm70_vm0, %v5498_v38 }
 0x56e   :  { %4513 = vmatprep.mubr.msk.bf16.mxu0 %vm70_vm0, %v5382_v19 }
 0x638   :  { %v4483_v1 = vpop.f32.mrb[16].mxu0 }
 0x639   :  { %v922_v2 = vadd.f32 %v4483_v1, %v878_v0  ;;  %v913_v3 = vpop.f32.mrb[17].mxu0 }
 0x63a   :  { %v914_v4 = vadd.f32 %v913_v3, %v878_v0  ;;  %v4484_v5 = vpop.f32.mrb[18].mxu0 }
 0x63b   :  { %v946_v6 = vsub.f32 0.0, %v922_v2  ;;  %v925_v22 = vadd.f32 %v4484_v5, %v878_v0  ;;  %v916_v23 = vpop.f32.mrb[19].mxu0 }
 0x63c   :  { %v944_v24 = vsub.f32 0.0, %v914_v4  ;;  %v917_v25 = vadd.f32 %v916_v23, %v878_v0 }
 0x63d   :  { %v956_v26 = vmul.f32 1.442695, %v946_v6  ;;  %v947_v27 = vsub.f32 0.0, %v925_v22 }
 0x63e   :  { %v952_v28 = vmul.f32 1.442695, %v944_v24  ;;  %v945_v7 = vsub.f32 0.0, %v917_v25 }
 0x63f   :  { %4875 = vpow2.f32 %v956_v26  ;;  %v958_v33 = vmul.f32 1.442695, %v947_v27 }
 0x640   :  { %4877 = vpow2.f32 %v952_v28  ;;  %v954_v34 = vmul.f32 1.442695, %v945_v7  ;;  %v4487_v35 = vpop.f32.mrb[20].mxu0 }
 0x641   :  { %4879 = vpow2.f32 %v958_v33  ;;  %v938_v14 = vadd.f32 %v4487_v35, %v878_v0  ;;  %v929_v15 = vpop.f32.mrb[21].mxu0 }
 0x642   :  { %4881 = vpow2.f32 %v954_v34  ;;  %v930_v16 = vadd.f32 %v929_v15, %v878_v0  ;;  %v4488_v17 = vpop.f32.mrb[22].mxu0 }
 0x643   :  { %v950_v18 = vsub.f32 0.0, %v938_v14  ;;  %v941_v10 = vadd.f32 %v4488_v17, %v878_v0  ;;  %v932_v13 = vpop.f32.mrb[23].mxu0 }
 0x644   :  { %v948_v21 = vsub.f32 0.0, %v930_v16  ;;  %v933_v30 = vadd.f32 %v932_v13, %v878_v0 }
 0x645   :  { %v964_v31 = vmul.f32 1.442695, %v950_v18  ;;  %v951_v32 = vsub.f32 0.0, %v941_v10 }
 0x646   :  { %v960_v39 = vmul.f32 1.442695, %v948_v21  ;;  %v949_v40 = vsub.f32 0.0, %v933_v30 }
 0x647   :  { %4883 = vpow2.f32 %v964_v31  ;;  %v966_v41 = vmul.f32 1.442695, %v951_v32 }
 0x648   :  { %4885 = vpow2.f32 %v960_v39  ;;  %v962_v42 = vmul.f32 1.442695, %v949_v40 }
 0x649   :  { %v4876_v46 = vpop.eup %4875  ;;  %4887 = vpow2.f32 %v966_v41 }
 0x64a   :  { %v4878_v47 = vpop.eup %4877  ;;  %v970_v49 = vadd.f32 1.0, %v4876_v46  ;;  %4889 = vpow2.f32 %v962_v42 }
 0x64b   :  { %v4880_v50 = vpop.eup %4879  ;;  %v968_v51 = vadd.f32 1.0, %v4878_v47 }
 0x64c   :  { %v4882_v52 = vpop.eup %4881  ;;  %v971_v53 = vadd.f32 1.0, %v4880_v50 }
 0x64d   :  { %4891 = vrcp.f32 %v968_v51  ;;  %v969_v54 = vadd.f32 1.0, %v4882_v52 }
 0x64e   :  { %4893 = vrcp.f32 %v970_v49 }
 0x64f   :  { %4895 = vrcp.f32 %v969_v54 }
 0x650   :  { %4897 = vrcp.f32 %v971_v53 }
 0x651   :  { %v4884_v55 = vpop.eup %4883 }
 0x652   :  { %v4886_v58 = vpop.eup %4885  ;;  %v974_v59 = vadd.f32 1.0, %v4884_v55 }
 0x653   :  { %v4888_v60 = vpop.eup %4887  ;;  %v972_v61 = vadd.f32 1.0, %v4886_v58 }
 0x654   :  { %v4890_v62 = vpop.eup %4889  ;;  %v975_v0 = vadd.f32 1.0, %v4888_v60 }
 0x655   :  { %4899 = vrcp.f32 %v972_v61  ;;  %v973_v1 = vadd.f32 1.0, %v4890_v62 }
 0x656   :  { %4901 = vrcp.f32 %v974_v59 }
 0x657   :  { %v4892_v2 = vpop.eup %4891  ;;  %4903 = vrcp.f32 %v973_v1 }
 0x658   :  { %v4894_v3 = vpop.eup %4893  ;;  %4905 = vrcp.f32 %v975_v0  ;;  %v984_v5 = vsel %vm70_vm0, %v4892_v2, 0.0 }
 0x659   :  { %v4896_v4 = vpop.eup %4895  ;;  %v987_v24 = vsel %vm70_vm0, %v4894_v3, 0.0 }
 0x65a   :  { %v985_v6 = vsel %vm70_vm0, %v4896_v4, 0.0  ;;  %v4898_v22 = vpop.eup %4897 }
 0x65b   :  { %v986_v23 = vadd.f32 %v985_v6, %v984_v5  ;;  %v989_v26 = vsel %vm70_vm0, %v4898_v22, 0.0 }
 0x65d   :  { %v988_v25 = vadd.f32 %v987_v24, %v986_v23 }
 0x65f   :  { %v4900_v27 = vpop.eup %4899  ;;  %v990_v28 = vadd.f32 %v989_v26, %v988_v25 }
 0x660   :  { %v4902_v7 = vpop.eup %4901  ;;  %v991_v33 = vsel %vm70_vm0, %v4900_v27, 0.0 }
 0x661   :  { %v4904_v34 = vpop.eup %4903  ;;  %v992_v35 = vadd.f32 %v991_v33, %v990_v28  ;;  %v995_v17 = vsel %vm70_vm0, %v4902_v7, 0.0 }
 0x662   :  { %v993_v14 = vsel %vm70_vm0, %v4904_v34, 0.0  ;;  %v4906_v15 = vpop.eup %4905 }
 0x663   :  { %v994_v16 = vadd.f32 %v993_v14, %v992_v35  ;;  %v997_v10 = vsel %vm70_vm0, %v4906_v15, 0.0 }
 0x665   :  { %v996_v18 = vadd.f32 %v995_v17, %v994_v16 }
 0x667   :  { %v998_v13 = vadd.f32 %v997_v10, %v996_v18 }
 0x669   :  { %v999_v21 = vrot.slane %v998_v13, 4 }
 0x66b   :  { %v1000_v30 = vadd.f32 %v999_v21, %v998_v13 }
 0x66d   :  { %v1001_v31 = vrot.slane %v1000_v30, 2 }
 0x66f   :  { %v1002_v32 = vadd.f32 %v1001_v31, %v1000_v30  ;;  %v1062_v30 = vrot.slane %v5606_v63, %v5459_v56 }
 0x671   :  { %v1003_v39 = vrot.slane %v1002_v32, 1 }
 0x673   :  { %v1004_v40 = vadd.f32 %v1003_v39, %v1002_v32 }
 0x675   :  { %v1005_v41 = vmul.f32 0.015625, %v1004_v40 }
 0x677   :  { %v1011_v42 = vsub.f32 %v4904_v34, %v1005_v41  ;;  %v1006_v46 = vsub.f32 %v4892_v2, %v1005_v41  ;;  %v1007_v47 = vsub.f32 %v4896_v4, %v1005_v41  ;;  %v1008_v49 = vsub.f32 %v4894_v3, %v1005_v41 }
 0x678   :  { %v1009_v50 = vsub.f32 %v4898_v22, %v1005_v41  ;;  %v1010_v51 = vsub.f32 %v4900_v27, %v1005_v41  ;;  %v1012_v52 = vsub.f32 %v4902_v7, %v1005_v41  ;;  %v1013_v53 = vsub.f32 %v4906_v15, %v1005_v41 }
 0x679   :  { %v1014_v54 = vmul.f32 %v1006_v46, %v1006_v46  ;;  %v1015_v55 = vmul.f32 %v1007_v47, %v1007_v47  ;;  %v1016_v58 = vmul.f32 %v1008_v49, %v1008_v49  ;;  %v1019_v2 = vmul.f32 %v1011_v42, %v1011_v42 }
 0x67a   :  { %v1017_v59 = vmul.f32 %v1009_v50, %v1009_v50  ;;  %v1018_v0 = vmul.f32 %v1010_v51, %v1010_v51  ;;  %v1020_v6 = vmul.f32 %v1012_v52, %v1012_v52  ;;  %v1021_v25 = vmul.f32 %v1013_v53, %v1013_v53 }
 0x67b   :  { %v1022_v60 = vsel %vm70_vm0, %v1014_v54, 0.0  ;;  %v1023_v61 = vsel %vm70_vm0, %v1015_v55, 0.0  ;;  %v1025_v1 = vsel %vm70_vm0, %v1016_v58, 0.0  ;;  %v1031_v24 = vsel %vm70_vm0, %v1019_v2, 0.0 }
 0x67c   :  { %v1024_v62 = vadd.f32 %v1023_v61, %v1022_v60  ;;  %v1027_v3 = vsel %vm70_vm0, %v1017_v59, 0.0  ;;  %v1029_v22 = vsel %vm70_vm0, %v1018_v0, 0.0  ;;  %v1033_v27 = vsel %vm70_vm0, %v1020_v6, 0.0 }
 0x67d   :  { %v1035_v7 = vsel %vm70_vm0, %v1021_v25, 0.0 }
 0x67e   :  { %v1026_v5 = vadd.f32 %v1025_v1, %v1024_v62 }
 0x680   :  { %v1028_v4 = vadd.f32 %v1027_v3, %v1026_v5 }
 0x682   :  { %v1030_v23 = vadd.f32 %v1029_v22, %v1028_v4 }
 0x684   :  { %v1032_v26 = vadd.f32 %v1031_v24, %v1030_v23 }
 0x686   :  { %v1034_v28 = vadd.f32 %v1033_v27, %v1032_v26  ;;  %v4088_v27 = vld [vmem:[%s6343_s3 + $0xc0] sm:$0xff] }
 0x688   :  { %v1036_v33 = vadd.f32 %v1035_v7, %v1034_v28  ;;  %v4089_v28 = vld [vmem:[%s6343_s3 + $0xc8] sm:$0xff]  ;;  %v4090_v7 = vld [vmem:[%s6343_s3 + $0xd0] sm:$0xff] }
 0x68a   :  { %v1037_v34 = vrot.slane %v1036_v33, 4 }
 0x68c   :  { %v1038_v35 = vadd.f32 %v1037_v34, %v1036_v33  ;;  %v1380_v33 = vpack.c.bf16 %v4089_v28, %v4088_v27  ;;  %v4091_v34 = vld [vmem:[%s6343_s3 + $0xd8] sm:$0xff] }
 0x68e   :  { %v1039_v14 = vrot.slane %v1038_v35, 2  ;;  %4521 = vmatprep.subr.bf16.mxu1 %v1380_v33 }
 0x690   :  { %v1040_v15 = vadd.f32 %v1039_v14, %v1038_v35  ;;  %v1381_v35 = vpack.c.bf16 %v4091_v34, %v4090_v7  ;;  %v4092_v14 = vld [vmem:[%s6343_s3 + $0xe0] sm:$0xff] }
 0x692   :  { %v1041_v16 = vrot.slane %v1040_v15, 1 }
 0x694   :  { %v1042_v17 = vadd.f32 %v1041_v16, %v1040_v15  ;;  %v4093_v15 = vld [vmem:[%s6343_s3 + $0xe8] sm:$0xff] }
 0x695   :  { %v1382_v16 = vpack.c.bf16 %v4093_v15, %v4092_v14 }
 0x696   :  { %v1043_v18 = vmul.f32 0.015625, %v1042_v17  ;;  %v4094_v17 = vld [vmem:[%s6343_s3 + $0xf0] sm:$0xff] }
 0x698   :  { %v1044_v10 = vadd.f32 1e-05, %v1043_v18  ;;  %v4095_v18 = vld [vmem:[%s6343_s3 + $0xf8] sm:$0xff] }
 0x69a   :  { %4907 = vrsqrt.f32 %v1044_v10  ;;  %v1383_v10 = vpack.c.bf16 %v4095_v18, %v4094_v17 }
 0x6a4   :  { %v4908_v13 = vpop.eup %4907 }
 0x6a5   :  { %v1046_v21 = vmul.f32 %v4908_v13, %v5606_v63  ;;  %v1693_v13 = vld [vmem:[#allocation2 + $0x88] sm:$0xff] }
 0x6a7   :  { %v1050_v31 = vrot.slane %v1046_v21, %v5462_v57  ;;  %v1695_v21 = vld [vmem:[#allocation2 + $0x98] sm:$0xff] }
 0x6a9   :  { %v1051_v32 = vmul.f32 %v1050_v31, %v1006_v46  ;;  %v1052_v39 = vmul.f32 %v1050_v31, %v1007_v47  ;;  %v1053_v40 = vmul.f32 %v1050_v31, %v1008_v49  ;;  %v1054_v41 = vmul.f32 %v1050_v31, %v1009_v50 }
 0x6aa   :  { %v1055_v54 = vmul.f32 %v1050_v31, %v1010_v51  ;;  %v1056_v55 = vmul.f32 %v1050_v31, %v1011_v42  ;;  %v1057_v58 = vmul.f32 %v1050_v31, %v1012_v52  ;;  %v1058_v59 = vmul.f32 %v1050_v31, %v1013_v53  ;;  %v5681_v31 = vld [vmem:[%s6349_s9 + $0x18] sm:$0x77] }
 0x6ab   :  { %v1063_v60 = vadd.f32 %v1062_v30, %v1051_v32  ;;  %v1064_v61 = vadd.f32 %v1062_v30, %v1052_v39  ;;  %v1065_v62 = vadd.f32 %v1062_v30, %v1053_v40  ;;  %v1066_v0 = vadd.f32 %v1062_v30, %v1054_v41 }
 0x6ac   :  { %v1067_v1 = vadd.f32 %v1062_v30, %v1055_v54  ;;  %v1068_v5 = vadd.f32 %v1062_v30, %v1056_v55  ;;  %v1069_v2 = vadd.f32 %v1062_v30, %v1057_v58  ;;  %v1070_v3 = vadd.f32 %v1062_v30, %v1058_v59 }
 0x6ad   :  { %v5630_v4 = vpack.c.bf16 %v1064_v61, %v1063_v60  ;;  %v5632_v63 = vpack.c.bf16 %v1066_v0, %v1065_v62  ;;  %v1709_v30 = vpack.c.bf16 %v1695_v21, %v1693_v13  ;;  %v1174_v32 = vrot.slane %v5681_v31, %v5433_v44 }
 0x6ae   :  { %v5634_v46 = vpack.c.bf16 %v1068_v5, %v1067_v1  ;;  %v5636_v47 = vpack.c.bf16 %v1070_v3, %v1069_v2 }
 0x6af   :  { %4497 = vmatprep.mubr.msk.bf16.mxu1 %vm70_vm0, %v5630_v4 }
 0x6b0   :  { %4498 = vmatmul.mubr.msk.bf16.vlgmr.msra.gmra.mrb[24].mxu1 %vm70_vm0, %v5632_v63 }
 0x6b1   :  { %4501 = vmatprep.mubr.msk.bf16.mxu1 %vm70_vm0, %v5634_v46  ;;  %4522 = vmatpush3.bf16.msra.mxu1 %v1380_v33 }
 0x6b2   :  { %4523 = vmatprep.subr.bf16.mxu1 %v1381_v35 }
 0x6b5   :  { %4524 = vmatpush3.bf16.msra.mxu1 %v1381_v35 }
 0x6b6   :  { %4525 = vmatprep.subr.bf16.mxu1 %v1382_v16 }
 0x6b8   :  { %4502 = vmatmul.mubr.msk.bf16.gmra.mrb[28].mxu1 %vm70_vm0, %v5636_v47 }
 0x6b9   :  { %4526 = vmatpush3.bf16.msra.mxu1 %v1382_v16 }
 0x6ba   :  { %4527 = vmatprep.subr.bf16.mxu1 %v1383_v10 }
 0x6bd   :  { %4528 = vmatpush3.bf16.msra.mxu1 %v1383_v10 }
 0x6be   :  { %1716 = vmatprep.subr.bf16.mxu1 %v1709_v30 }
 0x783   :  { %v4499_v42 = vpop.f32.mrb[24].mxu1 }
 0x784   :  { %v1134_v49 = vpop.f32.mrb[25].mxu1 }
 0x785   :  { %v4500_v50 = vpop.f32.mrb[26].mxu1 }
 0x786   :  { %v1166_v51 = vpack.c.bf16 %v4500_v50, %v4499_v42  ;;  %v1137_v52 = vpop.f32.mrb[27].mxu1 }
 0x787   :  { %v1165_v53 = vpack.c.bf16 %v1137_v52, %v1134_v49 }
 0x789   :  { %4505 = vmatprep.subr.bf16.mxu0 %v1165_v53 }
 0x78a   :  { %4506 = vmatpush3.bf16.msra.mxu0 %v1165_v53 }
 0x78b   :  { %v4503_v6 = vpop.f32.mrb[28].mxu1  ;;  %4507 = vmatprep.subr.bf16.mxu0 %v1166_v51 }
 0x78c   :  { %v1150_v22 = vpop.f32.mrb[29].mxu1 }
 0x78d   :  { %v4504_v23 = vpop.f32.mrb[30].mxu1 }
 0x78e   :  { %v1168_v24 = vpack.c.bf16 %v4504_v23, %v4503_v6  ;;  %v1153_v25 = vpop.f32.mrb[31].mxu1  ;;  %4508 = vmatpush3.bf16.msra.mxu0 %v1166_v51 }
 0x78f   :  { %v1167_v26 = vpack.c.bf16 %v1153_v25, %v1150_v22 }
 0x791   :  { %4509 = vmatprep.subr.bf16.mxu0 %v1167_v26 }
 0x792   :  { %4510 = vmatpush3.bf16.msra.mxu0 %v1167_v26 }
 0x793   :  { %4511 = vmatprep.subr.bf16.mxu0 %v1168_v24 }
 0x796   :  { %4512 = vmatpush3.bf16.msra.mxu0 %v1168_v24 }
 0x799   :  { %4514 = vmatmul.mubr.msk.bf16.vlgmr.msra.gmra.mrb[24].mxu0 %vm70_vm0, %v5486_v36 }
 0x79a   :  { %4517 = vmatprep.mubr.msk.bf16.mxu0 %vm70_vm0, %v5490_v37 }
 0x7a1   :  { %4518 = vmatmul.mubr.msk.bf16.gmra.mrb[28].mxu0 %vm70_vm0, %v5498_v38 }
 0x7a2   :  { %4545 = vmatprep.mubr.msk.bf16.mxu0 %vm70_vm0, %v5382_v19 }
 0x86c   :  { %v4515_v39 = vpop.f32.mrb[24].mxu0 }
 0x86d   :  { %v1218_v40 = vadd.f32 %v4515_v39, %v1174_v32  ;;  %v1209_v41 = vpop.f32.mrb[25].mxu0 }
 0x86e   :  { %v1210_v54 = vadd.f32 %v1209_v41, %v1174_v32  ;;  %v4516_v55 = vpop.f32.mrb[26].mxu0 }
 0x86f   :  { %v1242_v58 = vsub.f32 0.0, %v1218_v40  ;;  %v1221_v59 = vadd.f32 %v4516_v55, %v1174_v32  ;;  %v1212_v60 = vpop.f32.mrb[27].mxu0 }
 0x870   :  { %v1240_v61 = vsub.f32 0.0, %v1210_v54  ;;  %v1213_v62 = vadd.f32 %v1212_v60, %v1174_v32 }
 0x871   :  { %v1252_v0 = vmul.f32 1.442695, %v1242_v58  ;;  %v1243_v1 = vsub.f32 0.0, %v1221_v59 }
 0x872   :  { %v1248_v5 = vmul.f32 1.442695, %v1240_v61  ;;  %v1241_v2 = vsub.f32 0.0, %v1213_v62 }
 0x873   :  { %4909 = vpow2.f32 %v1252_v0  ;;  %v1254_v3 = vmul.f32 1.442695, %v1243_v1 }
 0x874   :  { %4911 = vpow2.f32 %v1248_v5  ;;  %v1250_v42 = vmul.f32 1.442695, %v1241_v2  ;;  %v4519_v49 = vpop.f32.mrb[28].mxu0 }
 0x875   :  { %4913 = vpow2.f32 %v1254_v3  ;;  %v1234_v50 = vadd.f32 %v4519_v49, %v1174_v32  ;;  %v1225_v51 = vpop.f32.mrb[29].mxu0 }
 0x876   :  { %4915 = vpow2.f32 %v1250_v42  ;;  %v1226_v52 = vadd.f32 %v1225_v51, %v1174_v32  ;;  %v4520_v53 = vpop.f32.mrb[30].mxu0 }
 0x877   :  { %v1246_v6 = vsub.f32 0.0, %v1234_v50  ;;  %v1237_v22 = vadd.f32 %v4520_v53, %v1174_v32  ;;  %v1228_v23 = vpop.f32.mrb[31].mxu0 }
 0x878   :  { %v1244_v24 = vsub.f32 0.0, %v1226_v52  ;;  %v1229_v25 = vadd.f32 %v1228_v23, %v1174_v32 }
 0x879   :  { %v1260_v26 = vmul.f32 1.442695, %v1246_v6  ;;  %v1247_v27 = vsub.f32 0.0, %v1237_v22 }
 0x87a   :  { %v1256_v28 = vmul.f32 1.442695, %v1244_v24  ;;  %v1245_v7 = vsub.f32 0.0, %v1229_v25 }
 0x87b   :  { %4917 = vpow2.f32 %v1260_v26  ;;  %v1262_v33 = vmul.f32 1.442695, %v1247_v27 }
 0x87c   :  { %4919 = vpow2.f32 %v1256_v28  ;;  %v1258_v34 = vmul.f32 1.442695, %v1245_v7 }
 0x87d   :  { %v4910_v35 = vpop.eup %4909  ;;  %4921 = vpow2.f32 %v1262_v33 }
 0x87e   :  { %v4912_v14 = vpop.eup %4911  ;;  %v1266_v15 = vadd.f32 1.0, %v4910_v35  ;;  %4923 = vpow2.f32 %v1258_v34 }
 0x87f   :  { %v4914_v16 = vpop.eup %4913  ;;  %v1264_v17 = vadd.f32 1.0, %v4912_v14 }
 0x880   :  { %v4916_v18 = vpop.eup %4915  ;;  %v1267_v10 = vadd.f32 1.0, %v4914_v16 }
 0x881   :  { %4925 = vrcp.f32 %v1264_v17  ;;  %v1265_v13 = vadd.f32 1.0, %v4916_v18 }
 0x882   :  { %4927 = vrcp.f32 %v1266_v15 }
 0x883   :  { %4929 = vrcp.f32 %v1265_v13 }
 0x884   :  { %4931 = vrcp.f32 %v1267_v10 }
 0x885   :  { %v4918_v21 = vpop.eup %4917 }
 0x886   :  { %v4920_v30 = vpop.eup %4919  ;;  %v1270_v32 = vadd.f32 1.0, %v4918_v21 }
 0x887   :  { %v4922_v39 = vpop.eup %4921  ;;  %v1268_v40 = vadd.f32 1.0, %v4920_v30 }
 0x888   :  { %v4924_v41 = vpop.eup %4923  ;;  %v1271_v54 = vadd.f32 1.0, %v4922_v39 }
 0x889   :  { %4933 = vrcp.f32 %v1268_v40  ;;  %v1269_v55 = vadd.f32 1.0, %v4924_v41 }
 0x88a   :  { %4935 = vrcp.f32 %v1270_v32 }
 0x88b   :  { %v4926_v58 = vpop.eup %4925  ;;  %4937 = vrcp.f32 %v1269_v55 }
 0x88c   :  { %v4928_v59 = vpop.eup %4927  ;;  %4939 = vrcp.f32 %v1271_v54  ;;  %v1280_v61 = vsel %vm70_vm0, %v4926_v58, 0.0 }
 0x88d   :  { %v4930_v60 = vpop.eup %4929  ;;  %v1283_v5 = vsel %vm70_vm0, %v4928_v59, 0.0 }
 0x88e   :  { %v1281_v62 = vsel %vm70_vm0, %v4930_v60, 0.0  ;;  %v4932_v0 = vpop.eup %4931 }
 0x88f   :  { %v1282_v1 = vadd.f32 %v1281_v62, %v1280_v61  ;;  %v1285_v3 = vsel %vm70_vm0, %v4932_v0, 0.0 }
 0x891   :  { %v1284_v2 = vadd.f32 %v1283_v5, %v1282_v1 }
 0x893   :  { %v4934_v42 = vpop.eup %4933  ;;  %v1286_v49 = vadd.f32 %v1285_v3, %v1284_v2 }
 0x894   :  { %v4936_v50 = vpop.eup %4935  ;;  %v1287_v51 = vsel %vm70_vm0, %v4934_v42, 0.0 }
 0x895   :  { %v4938_v52 = vpop.eup %4937  ;;  %v1288_v53 = vadd.f32 %v1287_v51, %v1286_v49  ;;  %v1291_v24 = vsel %vm70_vm0, %v4936_v50, 0.0 }
 0x896   :  { %v1289_v6 = vsel %vm70_vm0, %v4938_v52, 0.0  ;;  %v4940_v22 = vpop.eup %4939 }
 0x897   :  { %v1290_v23 = vadd.f32 %v1289_v6, %v1288_v53  ;;  %v1293_v26 = vsel %vm70_vm0, %v4940_v22, 0.0 }
 0x899   :  { %v1292_v25 = vadd.f32 %v1291_v24, %v1290_v23 }
 0x89b   :  { %v1294_v27 = vadd.f32 %v1293_v26, %v1292_v25 }
 0x89d   :  { %v1295_v28 = vrot.slane %v1294_v27, 4 }
 0x89f   :  { %v1296_v7 = vadd.f32 %v1295_v28, %v1294_v27 }
 0x8a1   :  { %v1297_v33 = vrot.slane %v1296_v7, 2 }
 0x8a3   :  { %v1298_v34 = vadd.f32 %v1297_v33, %v1296_v7 }
 0x8a5   :  { %v1299_v35 = vrot.slane %v1298_v34, 1 }
 0x8a7   :  { %v1300_v14 = vadd.f32 %v1299_v35, %v1298_v34 }
 0x8a9   :  { %v1301_v15 = vmul.f32 0.015625, %v1300_v14  ;;  %v1358_v14 = vrot.slane %v5681_v31, %v5459_v56 }
 0x8ab   :  { %v1307_v16 = vsub.f32 %v4938_v52, %v1301_v15  ;;  %v1302_v17 = vsub.f32 %v4926_v58, %v1301_v15  ;;  %v1303_v18 = vsub.f32 %v4930_v60, %v1301_v15  ;;  %v1304_v10 = vsub.f32 %v4928_v59, %v1301_v15 }
 0x8ac   :  { %v1305_v13 = vsub.f32 %v4932_v0, %v1301_v15  ;;  %v1306_v21 = vsub.f32 %v4934_v42, %v1301_v15  ;;  %v1308_v30 = vsub.f32 %v4936_v50, %v1301_v15  ;;  %v1309_v32 = vsub.f32 %v4940_v22, %v1301_v15 }
 0x8ad   :  { %v1310_v39 = vmul.f32 %v1302_v17, %v1302_v17  ;;  %v1311_v40 = vmul.f32 %v1303_v18, %v1303_v18  ;;  %v1312_v41 = vmul.f32 %v1304_v10, %v1304_v10  ;;  %v1315_v58 = vmul.f32 %v1307_v16, %v1307_v16 }
 0x8ae   :  { %v1313_v54 = vmul.f32 %v1305_v13, %v1305_v13  ;;  %v1314_v1 = vmul.f32 %v1306_v21, %v1306_v21  ;;  %v1316_v0 = vmul.f32 %v1308_v30, %v1308_v30  ;;  %v1317_v50 = vmul.f32 %v1309_v32, %v1309_v32 }
 0x8af   :  { %v1318_v55 = vsel %vm70_vm0, %v1310_v39, 0.0  ;;  %v1319_v61 = vsel %vm70_vm0, %v1311_v40, 0.0  ;;  %v1321_v5 = vsel %vm70_vm0, %v1312_v41, 0.0  ;;  %v1327_v49 = vsel %vm70_vm0, %v1315_v58, 0.0 }
 0x8b0   :  { %v1320_v62 = vadd.f32 %v1319_v61, %v1318_v55  ;;  %v1323_v59 = vsel %vm70_vm0, %v1313_v54, 0.0  ;;  %v1325_v3 = vsel %vm70_vm0, %v1314_v1, 0.0  ;;  %v1329_v52 = vsel %vm70_vm0, %v1316_v0, 0.0  ;;  %v1694_v1 = vld [vmem:[#allocation2 + $0x90] sm:$0xff] }
 0x8b1   :  { %v1331_v6 = vsel %vm70_vm0, %v1317_v50, 0.0 }
 0x8b2   :  { %v1322_v2 = vadd.f32 %v1321_v5, %v1320_v62  ;;  %v1692_v62 = vld [vmem:[#allocation2 + $0x80] sm:$0xff] }
 0x8b4   :  { %v1324_v60 = vadd.f32 %v1323_v59, %v1322_v2 }
 0x8b6   :  { %v1326_v42 = vadd.f32 %v1325_v3, %v1324_v60  ;;  %v1697_v3 = vld [vmem:[#allocation2 + $0xa8] sm:$0xff] }
 0x8b8   :  { %v1328_v51 = vadd.f32 %v1327_v49, %v1326_v42  ;;  %v1699_v42 = vld [vmem:[#allocation2 + $0xb8] sm:$0xff] }
 0x8ba   :  { %v1330_v53 = vadd.f32 %v1329_v52, %v1328_v51  ;;  %v1698_v52 = vld [vmem:[#allocation2 + $0xb0] sm:$0xff] }
 0x8bc   :  { %v1332_v22 = vadd.f32 %v1331_v6, %v1330_v53 }
 0x8be   :  { %v1333_v23 = vrot.slane %v1332_v22, 4 }
 0x8c0   :  { %v1334_v24 = vadd.f32 %v1333_v23, %v1332_v22  ;;  %v1700_v23 = vld [vmem:[#allocation2 + $0xc0] sm:$0xff] }
 0x8c2   :  { %v1335_v25 = vrot.slane %v1334_v24, 2 }
 0x8c4   :  { %v1336_v26 = vadd.f32 %v1335_v25, %v1334_v24  ;;  %v1702_v24 = vld [vmem:[#allocation2 + $0xd0] sm:$0xff]  ;;  %v1705_v25 = vld [vmem:[#allocation2 + $0xe8] sm:$0xff] }
 0x8c6   :  { %v1337_v27 = vrot.slane %v1336_v26, 1 }
 0x8c8   :  { %v1338_v28 = vadd.f32 %v1337_v27, %v1336_v26  ;;  %v1707_v26 = vld [vmem:[#allocation2 + $0xf8] sm:$0xff]  ;;  %v1712_v27 = vpack.c.bf16 %v1702_v24, %v1700_v23 }
 0x8ca   :  { %v1339_v7 = vmul.f32 0.015625, %v1338_v28  ;;  %v1715_v28 = vpack.c.bf16 %v1707_v26, %v1705_v25  ;;  %v5728_v25 = vld [vmem:[%s6349_s9 + $0x20] sm:$0x77] }
 0x8cb   :  { %v1470_v26 = vrot.slane %v5728_v25, %v5433_v44 }
 0x8cc   :  { %v1340_v33 = vadd.f32 1e-05, %v1339_v7  ;;  %v1704_v7 = vld [vmem:[#allocation2 + $0xe0] sm:$0xff] }
 0x8ce   :  { %4941 = vrsqrt.f32 %v1340_v33  ;;  %v1706_v33 = vld [vmem:[#allocation2 + $0xf0] sm:$0xff] }
 0x8d8   :  { %v4942_v34 = vpop.eup %4941 }
 0x8d9   :  { %v1342_v35 = vmul.f32 %v4942_v34, %v5681_v31  ;;  %v1714_v34 = vpack.c.bf16 %v1706_v33, %v1704_v7 }
 0x8db   :  { %v1346_v15 = vrot.slane %v1342_v35, %v5462_v57  ;;  %v5249_v35 = vmov 0  }
 0x8dd   :  { %v1347_v39 = vmul.f32 %v1346_v15, %v1302_v17  ;;  %v1348_v40 = vmul.f32 %v1346_v15, %v1303_v18  ;;  %v1349_v41 = vmul.f32 %v1346_v15, %v1304_v10  ;;  %v1350_v54 = vmul.f32 %v1346_v15, %v1305_v13 }
 0x8de   :  { %v1351_v55 = vmul.f32 %v1346_v15, %v1306_v21  ;;  %v1352_v61 = vmul.f32 %v1346_v15, %v1307_v16  ;;  %v1353_v5 = vmul.f32 %v1346_v15, %v1308_v30  ;;  %v1354_v2 = vmul.f32 %v1346_v15, %v1309_v32  ;;  %v1696_v16 = vld [vmem:[#allocation2 + $0xa0] sm:$0xff]  ;;  %v1701_v30 = vld [vmem:[#allocation2 + $0xc8] sm:$0xff]  ;;  %v1703_v32 = vld [vmem:[#allocation2 + $0xd8] sm:$0xff] }
 0x8df   :  { %v1359_v58 = vadd.f32 %v1358_v14, %v1347_v39  ;;  %v1360_v59 = vadd.f32 %v1358_v14, %v1348_v40  ;;  %v1361_v60 = vadd.f32 %v1358_v14, %v1349_v41  ;;  %v1362_v0 = vadd.f32 %v1358_v14, %v1350_v54 }
 0x8e0   :  { %v1363_v49 = vadd.f32 %v1358_v14, %v1351_v55  ;;  %v1364_v31 = vadd.f32 %v1358_v14, %v1352_v61  ;;  %v1365_v50 = vadd.f32 %v1358_v14, %v1353_v5  ;;  %v1366_v51 = vadd.f32 %v1358_v14, %v1354_v2 }
 0x8e1   :  { %v1376_v17 = vpack.c.bf16 %v1360_v59, %v1359_v58  ;;  %v1377_v18 = vpack.c.bf16 %v1362_v0, %v1361_v60  ;;  %v1708_v10 = vpack.c.bf16 %v1694_v1, %v1692_v62  ;;  %v1711_v21 = vpack.c.bf16 %v1699_v42, %v1697_v3  ;;  %v1664_v58 = vld [vmem:[#allocation2 + $0x8] sm:$0xff]  ;;  %v1666_v59 = vld [vmem:[#allocation2 + $0x18] sm:$0xff]  ;;  %v1663_v0 = vld [vmem:[#allocation2] sm:$0xff] }
 0x8e2   :  { %v1378_v13 = vpack.c.bf16 %v1364_v31, %v1363_v49  ;;  %v1379_v53 = vpack.c.bf16 %v1366_v51, %v1365_v50  ;;  %v1710_v6 = vpack.c.bf16 %v1698_v52, %v1696_v16  ;;  %v1713_v22 = vpack.c.bf16 %v1703_v32, %v1701_v30  ;;  %v1665_v3 = vld [vmem:[#allocation2 + $0x10] sm:$0xff]  ;;  %v1668_v49 = vld [vmem:[#allocation2 + $0x28] sm:$0xff]  ;;  %v1670_v31 = vld [vmem:[#allocation2 + $0x38] sm:$0xff] }
 0x8e3   :  { %4529 = vmatprep.mubr.msk.bf16.mxu1 %vm70_vm0, %v1376_v17  ;;  %v1684_v60 = vpack.c.bf16 %v1666_v59, %v1664_v58  ;;  %v1683_v42 = vpack.c.bf16 %v1665_v3, %v1663_v0  ;;  %v1686_v50 = vpack.c.bf16 %v1670_v31, %v1668_v49  ;;  %v1667_v51 = vld [vmem:[#allocation2 + $0x20] sm:$0xff]  ;;  %v1673_v52 = vld [vmem:[#allocation2 + $0x50] sm:$0xff]  ;;  %v1678_v32 = vld [vmem:[#allocation2 + $0x78] sm:$0xff] }
 0x8e4   :  { %4530 = vmatmul.mubr.msk.bf16.vlgmr.msra.gmra.mrb[32].mxu1 %vm70_vm0, %v1377_v18  ;;  %v1671_v16 = vld [vmem:[#allocation2 + $0x40] sm:$0xff] }
 0x8e5   :  { %4533 = vmatprep.mubr.msk.bf16.mxu1 %vm70_vm0, %v1378_v13  ;;  %1717 = vmatpush1.bf16.msra.mxu1 %v1708_v10  ;;  %v1672_v10 = vld [vmem:[#allocation2 + $0x48] sm:$0xff]  ;;  %v1687_v30 = vpack.c.bf16 %v1673_v52, %v1671_v16 }
 0x8e6   :  { %1718 = vmatprep.subr.bf16.mxu1 %v1711_v21 }
 0x8e9   :  { %1719 = vmatpush1.bf16.msra.mxu1 %v1710_v6  ;;  %v1675_v6 = vld [vmem:[#allocation2 + $0x60] sm:$0xff] }
 0x8ea   :  { %1720 = vmatprep.subr.bf16.mxu1 %v1713_v22  ;;  %v1677_v22 = vld [vmem:[#allocation2 + $0x70] sm:$0xff] }
 0x8eb   :  { %v1689_v24 = vpack.c.bf16 %v1677_v22, %v1675_v6 }
 0x8ec   :  { %4534 = vmatmul.mubr.msk.bf16.gmra.mrb[36].mxu1 %vm70_vm0, %v1379_v53 }
 0x8ed   :  { %1721 = vmatpush1.bf16.msra.mxu1 %v1712_v27  ;;  %1748 = vmatprep.mubr.bf16.mxu1 %v5249_v35 }
 0x8ee   :  { %1722 = vmatprep.subr.bf16.mxu1 %v1715_v28 }
 0x8f1   :  { %1723 = vmatpush1.bf16.msra.mxu1 %v1714_v34 }
 0x8f2   :  { %1801 = vmatprep.subr.bf16.mxu1 %v1684_v60 }
 0x8f4   :  { %4105 = vmatmul.mubr.msk.bf16.vlgmr.msra.gmra.mrb[40].mxu1 %vm70_vm0, %v1376_v17  ;;  %v1669_v17 = vld [vmem:[#allocation2 + $0x30] sm:$0xff] }
 0x8f5   :  { %1758 = vmatprep.mubr.bf16.mxu1 %v5249_v35  ;;  %1802 = vmatpush1.bf16.msra.mxu1 %v1683_v42 }
 0x8f6   :  { %1803 = vmatprep.subr.bf16.mxu1 %v1686_v50 }
 0x8fc   :  { %4106 = vmatmul.mubr.msk.bf16.gmra.mrb[44].mxu1 %vm70_vm0, %v1377_v18  ;;  %v1685_v18 = vpack.c.bf16 %v1669_v17, %v1667_v51 }
 0x8fd   :  { %1768 = vmatprep.mubr.bf16.mxu1 %v5249_v35 }
 0x8fe   :  { %1804 = vmatpush1.bf16.msra.mxu1 %v1685_v18 }
 0x904   :  { %4107 = vmatmul.mubr.msk.bf16.gmra.mrb[48].mxu1 %vm70_vm0, %v1378_v13  ;;  %v1674_v13 = vld [vmem:[#allocation2 + $0x58] sm:$0xff] }
 0x905   :  { %1778 = vmatprep.mubr.bf16.mxu1 %v5249_v35  ;;  %v1688_v21 = vpack.c.bf16 %v1674_v13, %v1672_v10 }
 0x907   :  { %1805 = vmatprep.subr.bf16.mxu1 %v1688_v21 }
 0x908   :  { %1806 = vmatpush1.bf16.msra.mxu1 %v1687_v30 }
 0x90c   :  { %4108 = vmatmul.mubr.msk.bf16.gmra.mrb[52].mxu1 %vm70_vm0, %v1379_v53  ;;  %v1676_v53 = vld [vmem:[#allocation2 + $0x68] sm:$0xff] }
 0x90d   :  { %1833 = vmatprep.mubr.bf16.mxu1 %v5249_v35  ;;  %v1690_v23 = vpack.c.bf16 %v1678_v32, %v1676_v53 }
 0x90f   :  { %1807 = vmatprep.subr.bf16.mxu1 %v1690_v23 }
 0x910   :  { %1808 = vmatpush1.bf16.msra.mxu1 %v1689_v24 }
 0x9b7   :  { %v4531_v14 = vpop.f32.mrb[32].mxu1 }
 0x9b8   :  { %v1430_v15 = vpop.f32.mrb[33].mxu1 }
 0x9b9   :  { %v4532_v39 = vpop.f32.mrb[34].mxu1 }
 0x9ba   :  { %v1462_v40 = vpack.c.bf16 %v4532_v39, %v4531_v14  ;;  %v1433_v41 = vpop.f32.mrb[35].mxu1 }
 0x9bb   :  { %v1461_v54 = vpack.c.bf16 %v1433_v41, %v1430_v15 }
 0x9bd   :  { %4537 = vmatprep.subr.bf16.mxu0 %v1461_v54 }
 0x9be   :  { %4538 = vmatpush3.bf16.msra.mxu0 %v1461_v54 }
 0x9bf   :  { %v4535_v55 = vpop.f32.mrb[36].mxu1  ;;  %4539 = vmatprep.subr.bf16.mxu0 %v1462_v40 }
 0x9c0   :  { %v1446_v61 = vpop.f32.mrb[37].mxu1 }
 0x9c1   :  { %v4536_v62 = vpop.f32.mrb[38].mxu1 }
 0x9c2   :  { %v1464_v1 = vpack.c.bf16 %v4536_v62, %v4535_v55  ;;  %v1449_v5 = vpop.f32.mrb[39].mxu1  ;;  %4540 = vmatpush3.bf16.msra.mxu0 %v1462_v40 }
 0x9c3   :  { %v1463_v2 = vpack.c.bf16 %v1449_v5, %v1446_v61  ;;  %v1878_v5 = vld [vmem:[#allocation2 + $0x118] sm:$0xff] }
 0x9c5   :  { %4541 = vmatprep.subr.bf16.mxu0 %v1463_v2 }
 0x9c6   :  { %4542 = vmatpush3.bf16.msra.mxu0 %v1463_v2 }
 0x9c7   :  { %4543 = vmatprep.subr.bf16.mxu0 %v1464_v1 }
 0x9ca   :  { %4544 = vmatpush3.bf16.msra.mxu0 %v1464_v1  ;;  %v1876_v1 = vld [vmem:[#allocation2 + $0x108] sm:$0xff] }
 0x9cb   :  { %v1892_v58 = vpack.c.bf16 %v1878_v5, %v1876_v1 }
 0x9cd   :  { %4546 = vmatmul.mubr.msk.bf16.vlgmr.msra.gmra.mrb[32].mxu0 %vm70_vm0, %v5486_v36  ;;  %1899 = vmatprep.subr.bf16.mxu1 %v1892_v58 }
 0x9ce   :  { %4549 = vmatprep.mubr.msk.bf16.mxu0 %vm70_vm0, %v5490_v37 }
 0x9d5   :  { %4550 = vmatmul.mubr.msk.bf16.gmra.mrb[36].mxu0 %vm70_vm0, %v5498_v38 }
 0x9d6   :  { %2277 = vmatprep.mubr.bf16.mxu0 %v5249_v35 }
 0xaa0   :  { %v4547_v27 = vpop.f32.mrb[32].mxu0 }
 0xaa1   :  { %v1514_v28 = vadd.f32 %v4547_v27, %v1470_v26  ;;  %v1505_v7 = vpop.f32.mrb[33].mxu0 }
 0xaa2   :  { %v1506_v33 = vadd.f32 %v1505_v7, %v1470_v26  ;;  %v4548_v34 = vpop.f32.mrb[34].mxu0 }
 0xaa3   :  { %v1538_v14 = vsub.f32 0.0, %v1514_v28  ;;  %v1517_v15 = vadd.f32 %v4548_v34, %v1470_v26  ;;  %v1508_v39 = vpop.f32.mrb[35].mxu0 }
 0xaa4   :  { %v1536_v40 = vsub.f32 0.0, %v1506_v33  ;;  %v1509_v41 = vadd.f32 %v1508_v39, %v1470_v26 }
 0xaa5   :  { %v1548_v54 = vmul.f32 1.442695, %v1538_v14  ;;  %v1539_v55 = vsub.f32 0.0, %v1517_v15 }
 0xaa6   :  { %v1544_v61 = vmul.f32 1.442695, %v1536_v40  ;;  %v1537_v62 = vsub.f32 0.0, %v1509_v41 }
 0xaa7   :  { %4943 = vpow2.f32 %v1548_v54  ;;  %v1550_v2 = vmul.f32 1.442695, %v1539_v55 }
 0xaa8   :  { %4945 = vpow2.f32 %v1544_v61  ;;  %v1546_v59 = vmul.f32 1.442695, %v1537_v62  ;;  %v4551_v60 = vpop.f32.mrb[36].mxu0 }
 0xaa9   :  { %4947 = vpow2.f32 %v1550_v2  ;;  %v1530_v0 = vadd.f32 %v4551_v60, %v1470_v26  ;;  %v1521_v3 = vpop.f32.mrb[37].mxu0 }
 0xaaa   :  { %4949 = vpow2.f32 %v1546_v59  ;;  %v1522_v42 = vadd.f32 %v1521_v3, %v1470_v26  ;;  %v4552_v49 = vpop.f32.mrb[38].mxu0 }
 0xaab   :  { %v1542_v31 = vsub.f32 0.0, %v1530_v0  ;;  %v1533_v50 = vadd.f32 %v4552_v49, %v1470_v26  ;;  %v1524_v51 = vpop.f32.mrb[39].mxu0 }
 0xaac   :  { %v1540_v17 = vsub.f32 0.0, %v1522_v42  ;;  %v1525_v18 = vadd.f32 %v1524_v51, %v1470_v26 }
 0xaad   :  { %v1556_v10 = vmul.f32 1.442695, %v1542_v31  ;;  %v1543_v13 = vsub.f32 0.0, %v1533_v50 }
 0xaae   :  { %v1552_v21 = vmul.f32 1.442695, %v1540_v17  ;;  %v1541_v16 = vsub.f32 0.0, %v1525_v18 }
 0xaaf   :  { %4951 = vpow2.f32 %v1556_v10  ;;  %v1558_v52 = vmul.f32 1.442695, %v1543_v13 }
 0xab0   :  { %4953 = vpow2.f32 %v1552_v21  ;;  %v1554_v53 = vmul.f32 1.442695, %v1541_v16 }
 0xab1   :  { %v4944_v30 = vpop.eup %4943  ;;  %4955 = vpow2.f32 %v1558_v52 }
 0xab2   :  { %v4946_v32 = vpop.eup %4945  ;;  %v1562_v6 = vadd.f32 1.0, %v4944_v30  ;;  %4957 = vpow2.f32 %v1554_v53 }
 0xab3   :  { %v4948_v22 = vpop.eup %4947  ;;  %v1560_v23 = vadd.f32 1.0, %v4946_v32 }
 0xab4   :  { %v4950_v24 = vpop.eup %4949  ;;  %v1563_v27 = vadd.f32 1.0, %v4948_v22 }
 0xab5   :  { %4959 = vrcp.f32 %v1560_v23  ;;  %v1561_v28 = vadd.f32 1.0, %v4950_v24 }
 0xab6   :  { %4961 = vrcp.f32 %v1562_v6 }
 0xab7   :  { %4963 = vrcp.f32 %v1561_v28 }
 0xab8   :  { %4965 = vrcp.f32 %v1563_v27 }
 0xab9   :  { %v4952_v26 = vpop.eup %4951 }
 0xaba   :  { %v4954_v7 = vpop.eup %4953  ;;  %v1566_v33 = vadd.f32 1.0, %v4952_v26 }
 0xabb   :  { %v4956_v34 = vpop.eup %4955  ;;  %v1564_v14 = vadd.f32 1.0, %v4954_v7 }
 0xabc   :  { %v4958_v15 = vpop.eup %4957  ;;  %v1567_v39 = vadd.f32 1.0, %v4956_v34 }
 0xabd   :  { %4967 = vrcp.f32 %v1564_v14  ;;  %v1565_v40 = vadd.f32 1.0, %v4958_v15 }
 0xabe   :  { %4969 = vrcp.f32 %v1566_v33 }
 0xabf   :  { %v4960_v41 = vpop.eup %4959  ;;  %4971 = vrcp.f32 %v1565_v40 }
 0xac0   :  { %v4962_v54 = vpop.eup %4961  ;;  %4973 = vrcp.f32 %v1567_v39  ;;  %v1576_v61 = vsel %vm70_vm0, %v4960_v41, 0.0 }
 0xac1   :  { %v4964_v55 = vpop.eup %4963  ;;  %v1579_v2 = vsel %vm70_vm0, %v4962_v54, 0.0 }
 0xac2   :  { %v1577_v62 = vsel %vm70_vm0, %v4964_v55, 0.0  ;;  %v4966_v1 = vpop.eup %4965 }
 0xac3   :  { %v1578_v5 = vadd.f32 %v1577_v62, %v1576_v61  ;;  %v1581_v59 = vsel %vm70_vm0, %v4966_v1, 0.0 }
 0xac5   :  { %v1580_v58 = vadd.f32 %v1579_v2, %v1578_v5 }
 0xac7   :  { %v4968_v60 = vpop.eup %4967  ;;  %v1582_v0 = vadd.f32 %v1581_v59, %v1580_v58 }
 0xac8   :  { %v4970_v3 = vpop.eup %4969  ;;  %v1583_v42 = vsel %vm70_vm0, %v4968_v60, 0.0 }
 0xac9   :  { %v4972_v49 = vpop.eup %4971  ;;  %v1584_v31 = vadd.f32 %v1583_v42, %v1582_v0  ;;  %v1587_v18 = vsel %vm70_vm0, %v4970_v3, 0.0 }
 0xaca   :  { %v1585_v50 = vsel %vm70_vm0, %v4972_v49, 0.0  ;;  %v4974_v51 = vpop.eup %4973 }
 0xacb   :  { %v1586_v17 = vadd.f32 %v1585_v50, %v1584_v31  ;;  %v1589_v13 = vsel %vm70_vm0, %v4974_v51, 0.0 }
 0xacd   :  { %v1588_v10 = vadd.f32 %v1587_v18, %v1586_v17 }
 0xacf   :  { %v1590_v21 = vadd.f32 %v1589_v13, %v1588_v10 }
 0xad1   :  { %v1591_v16 = vrot.slane %v1590_v21, 4 }
 0xad3   :  { %v1592_v52 = vadd.f32 %v1591_v16, %v1590_v21 }
 0xad5   :  { %v1593_v53 = vrot.slane %v1592_v52, 2 }
 0xad7   :  { %v1594_v30 = vadd.f32 %v1593_v53, %v1592_v52 }
 0xad9   :  { %v1595_v32 = vrot.slane %v1594_v30, 1 }
 0xadb   :  { %v1596_v6 = vadd.f32 %v1595_v32, %v1594_v30 }
 0xadd   :  { %v1597_v22 = vmul.f32 0.015625, %v1596_v6 }
 0xadf   :  { %v1598_v23 = vsub.f32 %v4960_v41, %v1597_v22  ;;  %v1599_v24 = vsub.f32 %v4964_v55, %v1597_v22  ;;  %v1600_v27 = vsub.f32 %v4962_v54, %v1597_v22  ;;  %v1601_v28 = vsub.f32 %v4966_v1, %v1597_v22 }
 0xae0   :  { %v1602_v26 = vsub.f32 %v4968_v60, %v1597_v22  ;;  %v1603_v7 = vsub.f32 %v4972_v49, %v1597_v22  ;;  %v1604_v33 = vsub.f32 %v4970_v3, %v1597_v22  ;;  %v1605_v34 = vsub.f32 %v4974_v51, %v1597_v22  ;;  %v1875_v22 = vld [vmem:[#allocation2 + $0x100] sm:$0xff] }
 0xae1   :  { %v1606_v14 = vmul.f32 %v1598_v23, %v1598_v23  ;;  %v1607_v15 = vmul.f32 %v1599_v24, %v1599_v24  ;;  %v1608_v39 = vmul.f32 %v1600_v27, %v1600_v27  ;;  %v1609_v40 = vmul.f32 %v1601_v28, %v1601_v28 }
 0xae2   :  { %v1610_v2 = vmul.f32 %v1602_v26, %v1602_v26  ;;  %v1611_v55 = vmul.f32 %v1603_v7, %v1603_v7  ;;  %v1612_v59 = vmul.f32 %v1604_v33, %v1604_v33  ;;  %v1613_v3 = vmul.f32 %v1605_v34, %v1605_v34 }
 0xae3   :  { %v1614_v61 = vsel %vm70_vm0, %v1606_v14, 0.0  ;;  %v1615_v62 = vsel %vm70_vm0, %v1607_v15, 0.0  ;;  %v1617_v58 = vsel %vm70_vm0, %v1608_v39, 0.0  ;;  %v1619_v54 = vsel %vm70_vm0, %v1609_v40, 0.0  ;;  %v1877_v14 = vld [vmem:[#allocation2 + $0x110] sm:$0xff] }
 0xae4   :  { %v1616_v5 = vadd.f32 %v1615_v62, %v1614_v61  ;;  %v1621_v60 = vsel %vm70_vm0, %v1610_v2, 0.0  ;;  %v1623_v42 = vsel %vm70_vm0, %v1611_v55, 0.0  ;;  %v1625_v31 = vsel %vm70_vm0, %v1612_v59, 0.0  ;;  %v1880_v55 = vld [vmem:[#allocation2 + $0x128] sm:$0xff] }
 0xae5   :  { %v1627_v51 = vsel %vm70_vm0, %v1613_v3, 0.0  ;;  %v1654_v15 = vrot.slane %v5728_v25, %v5459_v56  ;;  %v1891_v40 = vpack.c.bf16 %v1877_v14, %v1875_v22  ;;  %v1992_v22 = vld [vmem:[#allocation2 + $0x198] sm:$0xff] }
 0xae6   :  { %v1618_v41 = vadd.f32 %v1617_v58, %v1616_v5 }
 0xae8   :  { %v1620_v1 = vadd.f32 %v1619_v54, %v1618_v41  ;;  %v1882_v54 = vld [vmem:[#allocation2 + $0x138] sm:$0xff] }
 0xaea   :  { %v1622_v0 = vadd.f32 %v1621_v60, %v1620_v1 }
 0xaec   :  { %v1624_v49 = vadd.f32 %v1623_v42, %v1622_v0 }
 0xaee   :  { %v1626_v50 = vadd.f32 %v1625_v31, %v1624_v49 }
 0xaf0   :  { %v1628_v17 = vadd.f32 %v1627_v51, %v1626_v50 }
 0xaf2   :  { %v1629_v18 = vrot.slane %v1628_v17, 4 }
 0xaf4   :  { %v1630_v10 = vadd.f32 %v1629_v18, %v1628_v17  ;;  %v1886_v18 = vld [vmem:[#allocation2 + $0x158] sm:$0xff] }
 0xaf6   :  { %v1631_v13 = vrot.slane %v1630_v10, 2 }
 0xaf8   :  { %v1632_v21 = vadd.f32 %v1631_v13, %v1630_v10  ;;  %v1883_v10 = vld [vmem:[#allocation2 + $0x140] sm:$0xff]  ;;  %v1885_v13 = vld [vmem:[#allocation2 + $0x150] sm:$0xff] }
 0xafa   :  { %v1633_v16 = vrot.slane %v1632_v21, 1 }
 0xafc   :  { %v1634_v52 = vadd.f32 %v1633_v16, %v1632_v21  ;;  %v1888_v21 = vld [vmem:[#allocation2 + $0x168] sm:$0xff]  ;;  %v1890_v16 = vld [vmem:[#allocation2 + $0x178] sm:$0xff] }
 0xafe   :  { %v1635_v53 = vmul.f32 0.015625, %v1634_v52  ;;  %v1895_v52 = vpack.c.bf16 %v1885_v13, %v1883_v10  ;;  %v2114_v10 = vld [vmem:[#allocation2 + $0x258] sm:$0xff]  ;;  %v2111_v13 = vld [vmem:[#allocation2 + $0x240] sm:$0xff] }
 0xb00   :  { %v1636_v30 = vadd.f32 1e-05, %v1635_v53  ;;  %v1898_v53 = vpack.c.bf16 %v1890_v16, %v1888_v21  ;;  %v2113_v21 = vld [vmem:[#allocation2 + $0x250] sm:$0xff]  ;;  %v2116_v16 = vld [vmem:[#allocation2 + $0x268] sm:$0xff] }
 0xb02   :  { %4975 = vrsqrt.f32 %v1636_v30  ;;  %v1887_v30 = vld [vmem:[#allocation2 + $0x160] sm:$0xff] }
 0xb0c   :  { %v4976_v32 = vpop.eup %4975 }
 0xb0d   :  { %v1638_v6 = vmul.f32 %v4976_v32, %v5728_v25  ;;  %v1889_v32 = vld [vmem:[#allocation2 + $0x170] sm:$0xff] }
 0xb0e   :  { %v1897_v14 = vpack.c.bf16 %v1889_v32, %v1887_v30  ;;  %v2115_v32 = vld [vmem:[#allocation2 + $0x260] sm:$0xff] }
 0xb0f   :  { %v1642_v39 = vrot.slane %v1638_v6, %v5462_v57  ;;  %v1990_v6 = vld [vmem:[#allocation2 + $0x188] sm:$0xff] }
 0xb11   :  { %v1643_v61 = vmul.f32 %v1642_v39, %v1598_v23  ;;  %v1644_v62 = vmul.f32 %v1642_v39, %v1599_v24  ;;  %v1645_v5 = vmul.f32 %v1642_v39, %v1600_v27  ;;  %v1646_v2 = vmul.f32 %v1642_v39, %v1601_v28  ;;  %v1879_v24 = vld [vmem:[#allocation2 + $0x120] sm:$0xff]  ;;  %v1881_v27 = vld [vmem:[#allocation2 + $0x130] sm:$0xff] }
 0xb12   :  { %v1647_v58 = vmul.f32 %v1642_v39, %v1602_v26  ;;  %v1648_v41 = vmul.f32 %v1642_v39, %v1603_v7  ;;  %v1649_v1 = vmul.f32 %v1642_v39, %v1604_v33  ;;  %v1650_v59 = vmul.f32 %v1642_v39, %v1605_v34  ;;  %v1884_v7 = vld [vmem:[#allocation2 + $0x148] sm:$0xff]  ;;  %v1989_v39 = vld [vmem:[#allocation2 + $0x180] sm:$0xff] }
 0xb13   :  { %v1655_v60 = vadd.f32 %v1654_v15, %v1643_v61  ;;  %v1656_v0 = vadd.f32 %v1654_v15, %v1644_v62  ;;  %v1657_v3 = vadd.f32 %v1654_v15, %v1645_v5  ;;  %v1658_v42 = vadd.f32 %v1654_v15, %v1646_v2  ;;  %v1994_v61 = vld [vmem:[#allocation2 + $0x1a8] sm:$0xff]  ;;  %v1996_v62 = vld [vmem:[#allocation2 + $0x1b8] sm:$0xff] }
 0xb14   :  { %v1659_v49 = vadd.f32 %v1654_v15, %v1647_v58  ;;  %v1660_v31 = vadd.f32 %v1654_v15, %v1648_v41  ;;  %v1661_v25 = vadd.f32 %v1654_v15, %v1649_v1  ;;  %v1662_v50 = vadd.f32 %v1654_v15, %v1650_v59  ;;  %v1993_v58 = vld [vmem:[#allocation2 + $0x1a0] sm:$0xff]  ;;  %v1995_v41 = vld [vmem:[#allocation2 + $0x1b0] sm:$0xff] }
 0xb15   :  { %v1679_v51 = vpack.c.bf16 %v1656_v0, %v1655_v60  ;;  %v1680_v17 = vpack.c.bf16 %v1658_v42, %v1657_v3  ;;  %v1894_v23 = vpack.c.bf16 %v1882_v54, %v1880_v55  ;;  %v1893_v33 = vpack.c.bf16 %v1881_v27, %v1879_v24  ;;  %v1998_v55 = vld [vmem:[#allocation2 + $0x1c8] sm:$0xff]  ;;  %v2000_v54 = vld [vmem:[#allocation2 + $0x1d8] sm:$0xff]  ;;  %v1997_v60 = vld [vmem:[#allocation2 + $0x1c0] sm:$0xff] }
 0xb16   :  { %v1681_v28 = vpack.c.bf16 %v1660_v31, %v1659_v49  ;;  %v1682_v26 = vpack.c.bf16 %v1662_v50, %v1661_v25  ;;  %v1896_v34 = vpack.c.bf16 %v1886_v18, %v1884_v7  ;;  %v2006_v15 = vpack.c.bf16 %v1992_v22, %v1990_v6  ;;  %v1999_v0 = vld [vmem:[#allocation2 + $0x1d0] sm:$0xff]  ;;  %v2002_v3 = vld [vmem:[#allocation2 + $0x1e8] sm:$0xff]  ;;  %v2004_v42 = vld [vmem:[#allocation2 + $0x1f8] sm:$0xff] }
 0xb17   :  { %4109 = vmatmul.mubr.msk.bf16.vlgmr.msra.gmra.mrb[40].mxu1 %vm70_vm0, %v1679_v51  ;;  %v2008_v2 = vpack.c.bf16 %v1996_v62, %v1994_v61  ;;  %v2007_v1 = vpack.c.bf16 %v1995_v41, %v1993_v58  ;;  %v2010_v59 = vpack.c.bf16 %v2000_v54, %v1998_v55  ;;  %v2009_v49 = vpack.c.bf16 %v1999_v0, %v1997_v60  ;;  %v2001_v25 = vld [vmem:[#allocation2 + $0x1e0] sm:$0xff]  ;;  %v2003_v50 = vld [vmem:[#allocation2 + $0x1f0] sm:$0xff]  ;;  %v2104_v51 = vld [vmem:[#allocation2 + $0x208] sm:$0xff] }
 0xb18   :  { %1843 = vmatprep.mubr.bf16.mxu1 %v5249_v35  ;;  %1900 = vmatpush1.bf16.msra.mxu1 %v1891_v40  ;;  %v1991_v40 = vld [vmem:[#allocation2 + $0x190] sm:$0xff]  ;;  %v2012_v31 = vpack.c.bf16 %v2004_v42, %v2002_v3  ;;  %v2103_v24 = vld [vmem:[#allocation2 + $0x200] sm:$0xff]  ;;  %v2108_v27 = vld [vmem:[#allocation2 + $0x228] sm:$0xff] }
 0xb19   :  { %1901 = vmatprep.subr.bf16.mxu1 %v1894_v23  ;;  %v2005_v5 = vpack.c.bf16 %v1991_v40, %v1989_v39  ;;  %v2107_v18 = vld [vmem:[#allocation2 + $0x220] sm:$0xff]  ;;  %v2117_v6 = vld [vmem:[#allocation2 + $0x270] sm:$0xff] }
 0xb1a   :  { %v2581_v42 = vld [vmem:[%s6345_s5 + $0x80] sm:$0xff] }
 0xb1c   :  { %1902 = vmatpush1.bf16.msra.mxu1 %v1893_v33  ;;  %v2109_v33 = vld [vmem:[#allocation2 + $0x230] sm:$0xff] }
 0xb1d   :  { %1903 = vmatprep.subr.bf16.mxu1 %v1896_v34  ;;  %v2112_v34 = vld [vmem:[#allocation2 + $0x248] sm:$0xff] }
 0xb1f   :  { %4110 = vmatmul.mubr.msk.bf16.gmra.mrb[44].mxu1 %vm70_vm0, %v1680_v17  ;;  %v2106_v17 = vld [vmem:[#allocation2 + $0x218] sm:$0xff] }
 0xb20   :  { %1853 = vmatprep.mubr.bf16.mxu1 %v5249_v35  ;;  %1904 = vmatpush1.bf16.msra.mxu1 %v1895_v52  ;;  %v2120_v23 = vpack.c.bf16 %v2106_v17, %v2104_v51  ;;  %v2118_v52 = vld [vmem:[#allocation2 + $0x278] sm:$0xff]  ;;  %v2583_v51 = vld [vmem:[%s6345_s5 + $0x90] sm:$0xff] }
 0xb21   :  { %1905 = vmatprep.subr.bf16.mxu1 %v1898_v53  ;;  %v2123_v53 = vpack.c.bf16 %v2113_v21, %v2111_v13  ;;  %v2126_v30 = vpack.c.bf16 %v2118_v52, %v2116_v16  ;;  %v2584_v17 = vld [vmem:[%s6345_s5 + $0x98] sm:$0xff]  ;;  %v2589_v21 = vld [vmem:[%s6345_s5 + $0xc0] sm:$0xff]  ;;  %v2590_v16 = vld [vmem:[%s6345_s5 + $0xc8] sm:$0xff] }
 0xb22   :  { %v2572_v13 = vld [vmem:[%s6345_s5 + $0x38] sm:$0xff] }
 0xb24   :  { %1906 = vmatpush1.bf16.msra.mxu1 %v1897_v14 }
 0xb25   :  { %2013 = vmatprep.subr.bf16.mxu1 %v2006_v15 }
 0xb27   :  { %4111 = vmatmul.mubr.msk.bf16.gmra.mrb[48].mxu1 %vm70_vm0, %v1681_v28  ;;  %v2110_v28 = vld [vmem:[#allocation2 + $0x238] sm:$0xff] }
 0xb28   :  { %1863 = vmatprep.mubr.bf16.mxu1 %v5249_v35  ;;  %v2122_v7 = vpack.c.bf16 %v2110_v28, %v2108_v27  ;;  %v2586_v27 = vld [vmem:[%s6345_s5 + $0xa8] sm:$0xff] }
 0xb2f   :  { %4112 = vmatmul.mubr.msk.bf16.gmra.mrb[52].mxu1 %vm70_vm0, %v1682_v26 }
 0xb30   :  { %1931 = vmatprep.mubr.bf16.mxu1 %v5249_v35 }
 0xb37   :  { %4113 = vmatmul.mubr.msk.bf16.vlgmr.msra.gmra.mrb[40].mxu1 %vm70_vm0, %v5630_v4  ;;  %v2011_v4 = vpack.c.bf16 %v2003_v50, %v2001_v25  ;;  %v2565_v25 = vld [vmem:[%s6345_s5] sm:$0xff] }
 0xb38   :  { %1941 = vmatprep.mubr.bf16.mxu1 %v5249_v35  ;;  %2014 = vmatpush1.bf16.msra.mxu1 %v2005_v5 }
 0xb39   :  { %2015 = vmatprep.subr.bf16.mxu1 %v2008_v2 }
 0xb3c   :  { %2016 = vmatpush1.bf16.msra.mxu1 %v2007_v1 }
 0xb3d   :  { %2017 = vmatprep.subr.bf16.mxu1 %v2010_v59 }
 0xb3f   :  { %4114 = vmatmul.mubr.msk.bf16.gmra.mrb[44].mxu1 %vm70_vm0, %v5632_v63  ;;  %v2105_v63 = vld [vmem:[#allocation2 + $0x210] sm:$0xff] }
 0xb40   :  { %1951 = vmatprep.mubr.bf16.mxu1 %v5249_v35  ;;  %2018 = vmatpush1.bf16.msra.mxu1 %v2009_v49  ;;  %v2119_v26 = vpack.c.bf16 %v2105_v63, %v2103_v24  ;;  %v2582_v49 = vld [vmem:[%s6345_s5 + $0x88] sm:$0xff]  ;;  %v2568_v24 = vld [vmem:[%s6345_s5 + $0x18] sm:$0xff]  ;;  %v2585_v63 = vld [vmem:[%s6345_s5 + $0xa0] sm:$0xff] }
 0xb41   :  { %2019 = vmatprep.subr.bf16.mxu1 %v2012_v31  ;;  %v2613_v31 = vpack.c.bf16 %v2582_v49, %v2581_v42  ;;  %v2579_v42 = vld [vmem:[%s6345_s5 + $0x70] sm:$0xff]  ;;  %v2580_v49 = vld [vmem:[%s6345_s5 + $0x78] sm:$0xff] }
 0xb44   :  { %2020 = vmatpush1.bf16.msra.mxu1 %v2011_v4  ;;  %v2567_v4 = vld [vmem:[%s6345_s5 + $0x10] sm:$0xff] }
 0xb45   :  { %2127 = vmatprep.subr.bf16.mxu1 %v2120_v23  ;;  %v2614_v23 = vpack.c.bf16 %v2584_v17, %v2583_v51  ;;  %v2606_v28 = vpack.c.bf16 %v2568_v24, %v2567_v4 }
 0xb47   :  { %4115 = vmatmul.mubr.msk.bf16.gmra.mrb[48].mxu1 %vm70_vm0, %v5634_v46  ;;  %v2121_v46 = vpack.c.bf16 %v2109_v33, %v2107_v18  ;;  %v2570_v18 = vld [vmem:[%s6345_s5 + $0x28] sm:$0xff]  ;;  %v2587_v33 = vld [vmem:[%s6345_s5 + $0xb0] sm:$0xff] }
 0xb48   :  { %1961 = vmatprep.mubr.bf16.mxu1 %v5249_v35 }
 0xb4f   :  { %4116 = vmatmul.mubr.msk.bf16.gmra.mrb[52].mxu1 %vm70_vm0, %v5636_v47  ;;  %v2124_v47 = vpack.c.bf16 %v2114_v10, %v2112_v34  ;;  %v2588_v34 = vld [vmem:[%s6345_s5 + $0xb8] sm:$0xff] }
 0xb50   :  { %2045 = vmatprep.mubr.bf16.mxu1 %v5249_v35 }
 0xb57   :  { %4117 = vmatmul.mubr.msk.bf16.vlgmr.msra.gmra.mrb[40].mxu1 %vm70_vm0, %v5555_v20  ;;  %v2125_v20 = vpack.c.bf16 %v2117_v6, %v2115_v32  ;;  %v2617_v32 = vpack.c.bf16 %v2590_v16, %v2589_v21  ;;  %v2573_v6 = vld [vmem:[%s6345_s5 + $0x40] sm:$0xff] }
 0xb58   :  { %2055 = vmatprep.mubr.bf16.mxu1 %v5249_v35  ;;  %2128 = vmatpush1.bf16.msra.mxu1 %v2119_v26  ;;  %v2615_v26 = vpack.c.bf16 %v2586_v27, %v2585_v63 }
 0xb59   :  { %2129 = vmatprep.subr.bf16.mxu1 %v2122_v7  ;;  %v2569_v7 = vld [vmem:[%s6345_s5 + $0x20] sm:$0xff] }
 0xb5a   :  { %v2607_v10 = vpack.c.bf16 %v2570_v18, %v2569_v7 }
 0xb5c   :  { %2130 = vmatpush1.bf16.msra.mxu1 %v2121_v46  ;;  %v2616_v46 = vpack.c.bf16 %v2588_v34, %v2587_v33 }
 0xb5d   :  { %2131 = vmatprep.subr.bf16.mxu1 %v2124_v47  ;;  %v2571_v47 = vld [vmem:[%s6345_s5 + $0x30] sm:$0xff] }
 0xb5e   :  { %v2608_v52 = vpack.c.bf16 %v2572_v13, %v2571_v47 }
 0xb5f   :  { %4118 = vmatmul.mubr.msk.bf16.gmra.mrb[44].mxu1 %vm70_vm0, %v5557_v48  ;;  %v5213_v48 = vld [vmem:[%s6340_s0] sm:$0xff] }
 0xb60   :  { %2065 = vmatprep.mubr.bf16.mxu1 %v5249_v35  ;;  %2132 = vmatpush1.bf16.msra.mxu1 %v2123_v53  ;;  %v5867_v53 = vld [vmem:[%s6349_s9 + $0x28] sm:$0x77] }
 0xb61   :  { %2133 = vmatprep.subr.bf16.mxu1 %v2126_v30  ;;  %v2233_v30 = vsub.s32 4, %v5430_v43 }
 0xb64   :  { %2134 = vmatpush1.bf16.msra.mxu1 %v2125_v20  ;;  %v2574_v20 = vld [vmem:[%s6345_s5 + $0x48] sm:$0xff] }
 0xb67   :  { %4119 = vmatmul.mubr.msk.bf16.gmra.mrb[48].mxu1 %vm70_vm0, %v5559_v11 }
 0xb68   :  { %2075 = vmatprep.mubr.bf16.mxu1 %v5249_v35 }
 0xb6f   :  { %4120 = vmatmul.mubr.msk.bf16.gmra.mrb[52].mxu1 %vm70_vm0, %v5561_v12 }
 0xb70   :  { %2159 = vmatprep.mubr.bf16.mxu1 %v5249_v35 }
 0xb77   :  { %4121 = vmatmul.mubr.msk.bf16.vlgmr.msra.gmra.mrb[40].mxu1 %vm70_vm0, %v5468_v29 }
 0xb78   :  { %2169 = vmatprep.mubr.bf16.mxu1 %v5249_v35 }
 0xb7f   :  { %4122 = vmatmul.mubr.msk.bf16.gmra.mrb[44].mxu1 %vm70_vm0, %v5470_v45 }
 0xb80   :  { %2179 = vmatprep.mubr.bf16.mxu1 %v5249_v35 }
 0xb87   :  { %4123 = vmatmul.mubr.msk.bf16.gmra.mrb[48].mxu1 %vm70_vm0, %v5472_v8 }
 0xb88   :  { %2189 = vmatprep.mubr.bf16.mxu1 %v5249_v35 }
 0xb8f   :  { %4124 = vmatmul.mubr.msk.bf16.gmra.mrb[52].mxu1 %vm70_vm0, %v5474_v9 }
 0xb90   :  { %4675 = vmatprep.mubr.msk.f32.mxu1 %vm70_vm0, %v5213_v48  ;;  %v2591_v48 = vld [vmem:[%s6345_s5 + $0xd0] sm:$0xff] }
 0xc4a   :  { %v2161_v29 = vpop.f32.mrb[40].mxu1 }
 0xc4b   :  { %v2163_v11 = vpop.f32.mrb[41].mxu1 }
 0xc4c   :  { %v2165_v12 = vpop.f32.mrb[42].mxu1 }
 0xc4d   :  { %v2216_v45 = vpack.c.bf16 %v2165_v12, %v2161_v29  ;;  %v2167_v22 = vpop.f32.mrb[43].mxu1  ;;  %v2592_v29 = vld [vmem:[%s6345_s5 + $0xd8] sm:$0xff]  ;;  %v2609_v12 = vpack.c.bf16 %v2574_v20, %v2573_v6 }
 0xc4e   :  { %v2217_v14 = vpack.c.bf16 %v2167_v22, %v2163_v11  ;;  %v2230_v11 = vrot.slane %v5867_v53, %v5433_v44  ;;  %v2618_v22 = vpack.c.bf16 %v2592_v29, %v2591_v48 }
 0xc50   :  { %2245 = vmatprep.subr.bf16.mxu0 %v2217_v14  ;;  %v2575_v14 = vld [vmem:[%s6345_s5 + $0x50] sm:$0xff] }
 0xc51   :  { %2246 = vmatpush1.bf16.msra.mxu0 %v2216_v45  ;;  %v2234_v45 = vrot.slane %v5867_v53, %v2233_v30 }
 0xc52   :  { %v2171_v8 = vpop.f32.mrb[44].mxu1 }
 0xc53   :  { %v2173_v15 = vpop.f32.mrb[45].mxu1 }
 0xc54   :  { %v2175_v39 = vpop.f32.mrb[46].mxu1 }
 0xc55   :  { %v2218_v40 = vpack.c.bf16 %v2175_v39, %v2171_v8  ;;  %v2177_v61 = vpop.f32.mrb[47].mxu1  ;;  %v2576_v8 = vld [vmem:[%s6345_s5 + $0x58] sm:$0xff]  ;;  %v2594_v39 = vld [vmem:[%s6345_s5 + $0xe8] sm:$0xff] }
 0xc56   :  { %v2219_v9 = vpack.c.bf16 %v2177_v61, %v2173_v15  ;;  %v2593_v15 = vld [vmem:[%s6345_s5 + $0xe0] sm:$0xff]  ;;  %v2610_v61 = vpack.c.bf16 %v2576_v8, %v2575_v14 }
 0xc58   :  { %2247 = vmatprep.subr.bf16.mxu0 %v2219_v9  ;;  %v5901_v9 = vrot.slane %v2234_v45, %v5433_v44 }
 0xc59   :  { %2248 = vmatpush1.bf16.msra.mxu0 %v2218_v40  ;;  %v5898_v40 = vrot.slane %v2230_v11, %v5433_v44 }
 0xc5a   :  { %v2181_v62 = vpop.f32.mrb[48].mxu1 }
 0xc5b   :  { %v2183_v5 = vpop.f32.mrb[49].mxu1 }
 0xc5c   :  { %v2185_v2 = vpop.f32.mrb[50].mxu1 }
 0xc5d   :  { %v2220_v58 = vpack.c.bf16 %v2185_v2, %v2181_v62  ;;  %v2187_v41 = vpop.f32.mrb[51].mxu1  ;;  %v2619_v62 = vpack.c.bf16 %v2594_v39, %v2593_v15  ;;  %v2578_v2 = vld [vmem:[%s6345_s5 + $0x68] sm:$0xff] }
 0xc5e   :  { %v2221_v55 = vpack.c.bf16 %v2187_v41, %v2183_v5  ;;  %v2577_v5 = vld [vmem:[%s6345_s5 + $0x60] sm:$0xff]  ;;  %v2596_v41 = vld [vmem:[%s6345_s5 + $0xf8] sm:$0xff] }
 0xc60   :  { %2249 = vmatprep.subr.bf16.mxu0 %v2221_v55 }
 0xc61   :  { %2250 = vmatpush1.bf16.msra.mxu0 %v2220_v58  ;;  %v2595_v58 = vld [vmem:[%s6345_s5 + $0xf0] sm:$0xff] }
 0xc62   :  { %v2191_v54 = vpop.f32.mrb[52].mxu1 }
 0xc63   :  { %v2193_v1 = vpop.f32.mrb[53].mxu1 }
 0xc64   :  { %v2195_v59 = vpop.f32.mrb[54].mxu1 }
 0xc65   :  { %v2222_v60 = vpack.c.bf16 %v2195_v59, %v2191_v54  ;;  %v2197_v0 = vpop.f32.mrb[55].mxu1  ;;  %v2611_v59 = vpack.c.bf16 %v2578_v2, %v2577_v5 }
 0xc66   :  { %v2223_v3 = vpack.c.bf16 %v2197_v0, %v2193_v1 }
 0xc68   :  { %2251 = vmatprep.subr.bf16.mxu0 %v2223_v3  ;;  %v2620_v3 = vpack.c.bf16 %v2596_v41, %v2595_v58 }
 0xc69   :  { %2252 = vmatpush1.bf16.msra.mxu0 %v2222_v60 }
 0xc6a   :  { %4268 = vmatprep.subr.bf16.mxu0 %v2613_v31 }
 0xc6c   :  { %4126 = vmatmul.mubr.msk.bf16.vlgmr.msra.gmra.mrb[40].mxu0 %vm70_vm0, %v5382_v19 }
 0xc6d   :  { %2287 = vmatprep.mubr.bf16.mxu0 %v5249_v35 }
 0xc74   :  { %4127 = vmatmul.mubr.msk.bf16.gmra.mrb[44].mxu0 %vm70_vm0, %v5486_v36 }
 0xc75   :  { %2297 = vmatprep.mubr.bf16.mxu0 %v5249_v35 }
 0xc7c   :  { %4128 = vmatmul.mubr.msk.bf16.gmra.mrb[48].mxu0 %vm70_vm0, %v5490_v37 }
 0xc7d   :  { %2307 = vmatprep.mubr.bf16.mxu0 %v5249_v35  ;;  %v2566_v35 = vld [vmem:[%s6345_s5 + $0x8] sm:$0xff] }
 0xc7e   :  { %v2605_v50 = vpack.c.bf16 %v2566_v35, %v2565_v25 }
 0xc80   :  { %4269 = vmatpush3.bf16.msra.mxu0 %v2605_v50 }
 0xc81   :  { %4270 = vmatprep.subr.bf16.mxu0 %v2614_v23  ;;  %v2612_v23 = vpack.c.bf16 %v2580_v49, %v2579_v42 }
 0xc84   :  { %4129 = vmatmul.mubr.msk.bf16.gmra.mrb[52].mxu0 %vm70_vm0, %v5498_v38 }
 0xc85   :  { %4271 = vmatpush3.bf16.msra.mxu0 %v2606_v28 }
 0xc86   :  { %4272 = vmatprep.subr.bf16.mxu0 %v2615_v26 }
 0xc89   :  { %4273 = vmatpush3.bf16.msra.mxu0 %v2607_v10 }
 0xc8a   :  { %4274 = vmatprep.subr.bf16.mxu0 %v2616_v46 }
 0xc8d   :  { %4275 = vmatpush3.bf16.msra.mxu0 %v2608_v52 }
 0xc8e   :  { %4276 = vmatprep.subr.bf16.mxu0 %v2617_v32 }
 0xc91   :  { %4277 = vmatpush3.bf16.msra.mxu0 %v2609_v12 }
 0xc92   :  { %4278 = vmatprep.subr.bf16.mxu0 %v2618_v22 }
 0xc95   :  { %4279 = vmatpush3.bf16.msra.mxu0 %v2610_v61 }
 0xc96   :  { %4280 = vmatprep.subr.bf16.mxu0 %v2619_v62 }
 0xc99   :  { %4281 = vmatpush3.bf16.msra.mxu0 %v2611_v59 }
 0xc9a   :  { %4282 = vmatprep.subr.bf16.mxu0 %v2620_v3 }
 0xc9d   :  { %4283 = vmatpush3.bf16.msra.mxu0 %v2612_v23 }
 0xd3f   :  { %v2279_v55 = vpop.f32.mrb[40].mxu0 }
 0xd40   :  { %v2280_v54 = vadd.f32 %v2279_v55, %v5898_v40  ;;  %v2281_v1 = vpop.f32.mrb[41].mxu0 }
 0xd41   :  { %v2282_v60 = vadd.f32 %v2281_v1, %v5901_v9  ;;  %v2283_v0 = vpop.f32.mrb[42].mxu0 }
 0xd42   :  { %v2318_v31 = vsub.f32 0.0, %v2280_v54  ;;  %v2284_v25 = vadd.f32 %v2283_v0, %v5898_v40  ;;  %v2285_v35 = vpop.f32.mrb[43].mxu0 }
 0xd43   :  { %v2319_v50 = vsub.f32 0.0, %v2282_v60  ;;  %v2286_v51 = vadd.f32 %v2285_v35, %v5901_v9 }
 0xd44   :  { %v2334_v17 = vmul.f32 1.442695, %v2318_v31  ;;  %v2320_v4 = vsub.f32 0.0, %v2284_v25 }
 0xd45   :  { %v2336_v24 = vmul.f32 1.442695, %v2319_v50  ;;  %v2321_v63 = vsub.f32 0.0, %v2286_v51 }
 0xd46   :  { %4977 = vpow2.f32 %v2334_v17  ;;  %v2338_v27 = vmul.f32 1.442695, %v2320_v4 }
 0xd47   :  { %4979 = vpow2.f32 %v2336_v24  ;;  %v2340_v28 = vmul.f32 1.442695, %v2321_v63  ;;  %v2289_v26 = vpop.f32.mrb[44].mxu0 }
 0xd48   :  { %4981 = vpow2.f32 %v2338_v27  ;;  %v2290_v7 = vadd.f32 %v2289_v26, %v5898_v40  ;;  %v2291_v18 = vpop.f32.mrb[45].mxu0 }
 0xd49   :  { %4983 = vpow2.f32 %v2340_v28  ;;  %v2292_v33 = vadd.f32 %v2291_v18, %v5901_v9  ;;  %v2293_v34 = vpop.f32.mrb[46].mxu0 }
 0xd4a   :  { %v2322_v10 = vsub.f32 0.0, %v2290_v7  ;;  %v2294_v46 = vadd.f32 %v2293_v34, %v5898_v40  ;;  %v2295_v47 = vpop.f32.mrb[47].mxu0 }
 0xd4b   :  { %v2323_v13 = vsub.f32 0.0, %v2292_v33  ;;  %v2296_v21 = vadd.f32 %v2295_v47, %v5901_v9 }
 0xd4c   :  { %v2342_v16 = vmul.f32 1.442695, %v2322_v10  ;;  %v2324_v52 = vsub.f32 0.0, %v2294_v46 }
 0xd4d   :  { %v2344_v30 = vmul.f32 1.442695, %v2323_v13  ;;  %v2325_v32 = vsub.f32 0.0, %v2296_v21 }
 0xd4e   :  { %4985 = vpow2.f32 %v2342_v16  ;;  %v2346_v6 = vmul.f32 1.442695, %v2324_v52 }
 0xd4f   :  { %4987 = vpow2.f32 %v2344_v30  ;;  %v2348_v20 = vmul.f32 1.442695, %v2325_v32  ;;  %v2299_v48 = vpop.f32.mrb[48].mxu0 }
 0xd50   :  { %v4978_v29 = vpop.eup %4977  ;;  %4989 = vpow2.f32 %v2346_v6  ;;  %v2300_v11 = vadd.f32 %v2299_v48, %v5898_v40  ;;  %v2301_v12 = vpop.f32.mrb[49].mxu0 }
 0xd51   :  { %v4980_v45 = vpop.eup %4979  ;;  %v2366_v22 = vadd.f32 1.0, %v4978_v29  ;;  %4991 = vpow2.f32 %v2348_v20  ;;  %v2302_v14 = vadd.f32 %v2301_v12, %v5901_v9  ;;  %v2303_v8 = vpop.f32.mrb[50].mxu0 }
 0xd52   :  { %v4982_v15 = vpop.eup %4981  ;;  %v2367_v39 = vadd.f32 1.0, %v4980_v45  ;;  %v2326_v61 = vsub.f32 0.0, %v2300_v11  ;;  %v2304_v62 = vadd.f32 %v2303_v8, %v5898_v40  ;;  %v2305_v5 = vpop.f32.mrb[51].mxu0 }
 0xd53   :  { %v4984_v2 = vpop.eup %4983  ;;  %4993 = vrcp.f32 %v2366_v22  ;;  %v2368_v58 = vadd.f32 1.0, %v4982_v15  ;;  %v2327_v41 = vsub.f32 0.0, %v2302_v14  ;;  %v2306_v55 = vadd.f32 %v2305_v5, %v5901_v9 }
 0xd54   :  { %4995 = vrcp.f32 %v2367_v39  ;;  %v2369_v54 = vadd.f32 1.0, %v4984_v2  ;;  %v2350_v1 = vmul.f32 1.442695, %v2326_v61  ;;  %v2328_v59 = vsub.f32 0.0, %v2304_v62 }
 0xd55   :  { %4997 = vrcp.f32 %v2368_v58  ;;  %v2352_v60 = vmul.f32 1.442695, %v2327_v41  ;;  %v2329_v0 = vsub.f32 0.0, %v2306_v55 }
 0xd56   :  { %4999 = vrcp.f32 %v2369_v54  ;;  %v2354_v3 = vmul.f32 1.442695, %v2328_v59 }
 0xd57   :  { %5001 = vpow2.f32 %v2350_v1  ;;  %v2356_v42 = vmul.f32 1.442695, %v2329_v0  ;;  %v2309_v49 = vpop.f32.mrb[52].mxu0 }
 0xd58   :  { %v4986_v31 = vpop.eup %4985  ;;  %5003 = vpow2.f32 %v2352_v60  ;;  %v2310_v25 = vadd.f32 %v2309_v49, %v5898_v40  ;;  %v2311_v35 = vpop.f32.mrb[53].mxu0 }
 0xd59   :  { %v4988_v50 = vpop.eup %4987  ;;  %v2370_v51 = vadd.f32 1.0, %v4986_v31  ;;  %5005 = vpow2.f32 %v2354_v3  ;;  %v2312_v17 = vadd.f32 %v2311_v35, %v5901_v9  ;;  %v2313_v4 = vpop.f32.mrb[54].mxu0 }
 0xd5a   :  { %v4990_v23 = vpop.eup %4989  ;;  %v2371_v24 = vadd.f32 1.0, %v4988_v50  ;;  %5007 = vpow2.f32 %v2356_v42  ;;  %v2330_v63 = vsub.f32 0.0, %v2310_v25  ;;  %v2314_v27 = vadd.f32 %v2313_v4, %v5898_v40  ;;  %v2315_v28 = vpop.f32.mrb[55].mxu0 }
 0xd5b   :  { %v4992_v26 = vpop.eup %4991  ;;  %5009 = vrcp.f32 %v2370_v51  ;;  %v2372_v7 = vadd.f32 1.0, %v4990_v23  ;;  %v2331_v18 = vsub.f32 0.0, %v2312_v17  ;;  %v2316_v33 = vadd.f32 %v2315_v28, %v5901_v9 }
 0xd5c   :  { %5011 = vrcp.f32 %v2371_v24  ;;  %v2373_v34 = vadd.f32 1.0, %v4992_v26  ;;  %v2358_v10 = vmul.f32 1.442695, %v2330_v63  ;;  %v2332_v46 = vsub.f32 0.0, %v2314_v27 }
 0xd5d   :  { %v5937_v47 = vpop.eup %4993  ;;  %5013 = vrcp.f32 %v2372_v7  ;;  %v2360_v13 = vmul.f32 1.442695, %v2331_v18  ;;  %v2333_v21 = vsub.f32 0.0, %v2316_v33 }
 0xd5e   :  { %v5939_v16 = vpop.eup %4995  ;;  %5015 = vrcp.f32 %v2373_v34  ;;  %v2362_v40 = vmul.f32 1.442695, %v2332_v46 }
 0xd5f   :  { %v5941_v52 = vpop.eup %4997  ;;  %5017 = vpow2.f32 %v2358_v10  ;;  %v2364_v30 = vmul.f32 1.442695, %v2333_v21 }
 0xd60   :  { %v5943_v32 = vpop.eup %4999  ;;  %v2398_v9 = vadd.f32 %v5941_v52, %v5937_v47  ;;  %5019 = vpow2.f32 %v2360_v13 }
 0xd61   :  { %v5002_v6 = vpop.eup %5001  ;;  %v2411_v20 = vadd.f32 %v5943_v32, %v5939_v16  ;;  %5021 = vpow2.f32 %v2362_v40 }
 0xd62   :  { %v5004_v48 = vpop.eup %5003  ;;  %v2374_v29 = vadd.f32 1.0, %v5002_v6  ;;  %5023 = vpow2.f32 %v2364_v30 }
 0xd63   :  { %v5006_v11 = vpop.eup %5005  ;;  %v2375_v12 = vadd.f32 1.0, %v5004_v48 }
 0xd64   :  { %v5008_v45 = vpop.eup %5007  ;;  %5025 = vrcp.f32 %v2374_v29  ;;  %v2376_v22 = vadd.f32 1.0, %v5006_v11 }
 0xd65   :  { %v5010_v14 = vpop.eup %5009  ;;  %5027 = vrcp.f32 %v2375_v12  ;;  %v2377_v8 = vadd.f32 1.0, %v5008_v45 }
 0xd66   :  { %v5949_v15 = vpop.eup %5011  ;;  %v2399_v39 = vadd.f32 %v5010_v14, %v2398_v9  ;;  %5029 = vrcp.f32 %v2376_v22 }
 0xd67   :  { %v5014_v61 = vpop.eup %5013  ;;  %v2412_v62 = vadd.f32 %v5949_v15, %v2411_v20  ;;  %5031 = vrcp.f32 %v2377_v8 }
 0xd68   :  { %v5016_v5 = vpop.eup %5015  ;;  %v2400_v2 = vadd.f32 %v5014_v61, %v2399_v39 }
 0xd69   :  { %v5018_v58 = vpop.eup %5017  ;;  %v2413_v41 = vadd.f32 %v5016_v5, %v2412_v62 }
 0xd6a   :  { %v5020_v55 = vpop.eup %5019  ;;  %v2378_v54 = vadd.f32 1.0, %v5018_v58 }
 0xd6b   :  { %v5022_v1 = vpop.eup %5021  ;;  %v2379_v59 = vadd.f32 1.0, %v5020_v55 }
 0xd6c   :  { %v5024_v60 = vpop.eup %5023  ;;  %5033 = vrcp.f32 %v2378_v54  ;;  %v2380_v0 = vadd.f32 1.0, %v5022_v1 }
 0xd6d   :  { %5035 = vrcp.f32 %v2379_v59  ;;  %v2381_v3 = vadd.f32 1.0, %v5024_v60 }
 0xd6e   :  { %v5026_v42 = vpop.eup %5025  ;;  %5037 = vrcp.f32 %v2380_v0 }
 0xd6f   :  { %v5028_v49 = vpop.eup %5027  ;;  %v2401_v31 = vadd.f32 %v5026_v42, %v2400_v2  ;;  %5039 = vrcp.f32 %v2381_v3 }
 0xd70   :  { %v5030_v25 = vpop.eup %5029  ;;  %v2414_v35 = vadd.f32 %v5028_v49, %v2413_v41 }
 0xd71   :  { %v5032_v50 = vpop.eup %5031  ;;  %v2402_v51 = vadd.f32 %v5030_v25, %v2401_v31 }
 0xd72   :  { %v2415_v17 = vadd.f32 %v5032_v50, %v2414_v35 }
 0xd76   :  { %v5034_v4 = vpop.eup %5033 }
 0xd77   :  { %v5036_v23 = vpop.eup %5035  ;;  %v2403_v24 = vadd.f32 %v5034_v4, %v2402_v51 }
 0xd78   :  { %v5038_v63 = vpop.eup %5037  ;;  %v2416_v27 = vadd.f32 %v5036_v23, %v2415_v17 }
 0xd79   :  { %v5040_v28 = vpop.eup %5039  ;;  %v2404_v26 = vadd.f32 %v5038_v63, %v2403_v24 }
 0xd7a   :  { %v2417_v7 = vadd.f32 %v5040_v28, %v2416_v27 }
 0xd7b   :  { %v2405_v18 = vrot.slane %v2404_v26, 4 }
 0xd7c   :  { %v2418_v33 = vrot.slane %v2417_v7, 4 }
 0xd7d   :  { %v2406_v34 = vadd.f32 %v2405_v18, %v2404_v26 }
 0xd7e   :  { %v2419_v10 = vadd.f32 %v2418_v33, %v2417_v7 }
 0xd7f   :  { %v2407_v46 = vrot.slane %v2406_v34, 2 }
 0xd80   :  { %v2420_v13 = vrot.slane %v2419_v10, 2 }
 0xd81   :  { %v2408_v21 = vadd.f32 %v2407_v46, %v2406_v34 }
 0xd82   :  { %v2421_v40 = vadd.f32 %v2420_v13, %v2419_v10 }
 0xd83   :  { %v2409_v30 = vrot.slane %v2408_v21, 1 }
 0xd84   :  { %v2422_v9 = vrot.slane %v2421_v40, 1 }
 0xd85   :  { %v2410_v6 = vadd.f32 %v2409_v30, %v2408_v21 }
 0xd86   :  { %v2423_v20 = vadd.f32 %v2422_v9, %v2421_v40 }
 0xd87   :  { %v2424_v48 = vmul.f32 0.015625, %v2410_v6 }
 0xd88   :  { %v2425_v29 = vmul.f32 0.015625, %v2423_v20 }
 0xd89   :  { %v5953_v11 = vsub.f32 %v5937_v47, %v2424_v48  ;;  %v5956_v12 = vsub.f32 %v5941_v52, %v2424_v48  ;;  %v5958_v45 = vsub.f32 %v5010_v14, %v2424_v48  ;;  %v5960_v22 = vsub.f32 %v5014_v61, %v2424_v48 }
 0xd8a   :  { %v5962_v8 = vsub.f32 %v5026_v42, %v2424_v48  ;;  %v5964_v39 = vsub.f32 %v5030_v25, %v2424_v48  ;;  %v5966_v62 = vsub.f32 %v5034_v4, %v2424_v48  ;;  %v5968_v2 = vsub.f32 %v5038_v63, %v2424_v48 }
 0xd8b   :  { %v2442_v58 = vmul.f32 %v5953_v11, %v5953_v11  ;;  %v2444_v47 = vmul.f32 %v5956_v12, %v5956_v12  ;;  %v2446_v52 = vmul.f32 %v5958_v45, %v5958_v45  ;;  %v5976_v61 = vsub.f32 %v5040_v28, %v2425_v29 }
 0xd8c   :  { %v5979_v41 = vsub.f32 %v5939_v16, %v2425_v29  ;;  %v5982_v55 = vsub.f32 %v5943_v32, %v2425_v29  ;;  %v5985_v54 = vsub.f32 %v5949_v15, %v2425_v29  ;;  %v5987_v1 = vsub.f32 %v5016_v5, %v2425_v29 }
 0xd8d   :  { %v2458_v14 = vadd.f32 %v2444_v47, %v2442_v58  ;;  %v5989_v59 = vsub.f32 %v5028_v49, %v2425_v29  ;;  %v5991_v60 = vsub.f32 %v5032_v50, %v2425_v29  ;;  %v2448_v0 = vmul.f32 %v5960_v22, %v5960_v22 }
 0xd8e   :  { %v5995_v42 = vsub.f32 %v5036_v23, %v2425_v29  ;;  %v2443_v16 = vmul.f32 %v5979_v41, %v5979_v41  ;;  %v2445_v32 = vmul.f32 %v5982_v55, %v5982_v55  ;;  %v2450_v15 = vmul.f32 %v5962_v8, %v5962_v8 }
 0xd8f   :  { %v2459_v3 = vadd.f32 %v2458_v14, %v2446_v52  ;;  %v2447_v49 = vmul.f32 %v5985_v54, %v5985_v54  ;;  %v2452_v25 = vmul.f32 %v5964_v39, %v5964_v39  ;;  %v2449_v50 = vmul.f32 %v5987_v1, %v5987_v1 }
 0xd90   :  { %v2471_v31 = vadd.f32 %v2445_v32, %v2443_v16  ;;  %v2454_v17 = vmul.f32 %v5966_v62, %v5966_v62  ;;  %v2451_v23 = vmul.f32 %v5989_v59, %v5989_v59  ;;  %v2456_v63 = vmul.f32 %v5968_v2, %v5968_v2 }
 0xd91   :  { %v2460_v5 = vadd.f32 %v2459_v3, %v2448_v0  ;;  %v2453_v28 = vmul.f32 %v5991_v60, %v5991_v60  ;;  %v2455_v18 = vmul.f32 %v5995_v42, %v5995_v42  ;;  %v2457_v10 = vmul.f32 %v5976_v61, %v5976_v61 }
 0xd92   :  { %v2472_v51 = vadd.f32 %v2471_v31, %v2447_v49  ;;  %v2537_v49 = vsub.s32 6, %v5430_v43 }
 0xd93   :  { %v2461_v35 = vadd.f32 %v2460_v5, %v2450_v15 }
 0xd94   :  { %v2473_v24 = vadd.f32 %v2472_v51, %v2449_v50  ;;  %v2538_v51 = vrot.slane %v5867_v53, %v2537_v49 }
 0xd95   :  { %v2462_v4 = vadd.f32 %v2461_v35, %v2452_v25  ;;  %v2503_v25 = vsub.s32 5, %v5430_v43  ;;  %v2534_v35 = vrot.slane %v5867_v53, %v5459_v56 }
 0xd96   :  { %v2474_v26 = vadd.f32 %v2473_v24, %v2451_v23  ;;  %v2548_v24 = vrot.slane %v2538_v51, %v5459_v56 }
 0xd97   :  { %v2463_v27 = vadd.f32 %v2462_v4, %v2454_v17 }
 0xd98   :  { %v2475_v33 = vadd.f32 %v2474_v26, %v2453_v28 }
 0xd99   :  { %v2464_v7 = vadd.f32 %v2463_v27, %v2456_v63  ;;  %v2544_v27 = vrot.slane %v2534_v35, %v5459_v56 }
 0xd9a   :  { %v2476_v46 = vadd.f32 %v2475_v33, %v2455_v18 }
 0xd9b   :  { %v2465_v34 = vrot.slane %v2464_v7, 4 }
 0xd9c   :  { %v2477_v21 = vadd.f32 %v2476_v46, %v2457_v10 }
 0xd9d   :  { %v2466_v13 = vadd.f32 %v2465_v34, %v2464_v7 }
 0xd9e   :  { %v2478_v30 = vrot.slane %v2477_v21, 4 }
 0xd9f   :  { %v2467_v40 = vrot.slane %v2466_v13, 2 }
 0xda0   :  { %v2479_v6 = vadd.f32 %v2478_v30, %v2477_v21 }
 0xda1   :  { %v2468_v9 = vadd.f32 %v2467_v40, %v2466_v13 }
 0xda2   :  { %v2480_v48 = vrot.slane %v2479_v6, 2 }
 0xda3   :  { %v2469_v20 = vrot.slane %v2468_v9, 1 }
 0xda4   :  { %v2481_v58 = vadd.f32 %v2480_v48, %v2479_v6 }
 0xda5   :  { %v2470_v29 = vadd.f32 %v2469_v20, %v2468_v9 }
 0xda6   :  { %v2482_v52 = vrot.slane %v2481_v58, 1 }
 0xda7   :  { %v2484_v47 = vmul.f32 0.015625, %v2470_v29 }
 0xda8   :  { %v2483_v0 = vadd.f32 %v2482_v52, %v2481_v58 }
 0xda9   :  { %v2486_v14 = vadd.f32 1e-05, %v2484_v47 }
 0xdaa   :  { %v2485_v3 = vmul.f32 0.015625, %v2483_v0 }
 0xdab   :  { %5041 = vrsqrt.f32 %v2486_v14 }
 0xdac   :  { %v2487_v16 = vadd.f32 1e-05, %v2485_v3 }
 0xdae   :  { %5043 = vrsqrt.f32 %v2487_v16 }
 0xdb5   :  { %v5042_v32 = vpop.eup %5041 }
 0xdb8   :  { %v5044_v15 = vpop.eup %5043 }
 0xdb9   :  { %v2492_v5 = vcombine.low %v5042_v32, %v5044_v15 }
 0xdbb   :  { %v2493_v31 = vrot.slane %v2492_v5, 7 }
 0xdbd   :  { %v2495_v50 = vmul.f32 %v5867_v53, %v2493_v31 }
 0xdbf   :  { %v2500_v17 = vrot.slane %v2495_v50, %v5462_v57  ;;  %v2504_v4 = vrot.slane %v2495_v50, %v2503_v25 }
 0xdc1   :  { %v2514_v23 = vrot.slane %v2504_v4, %v5462_v57  ;;  %v2510_v63 = vrot.slane %v2500_v17, %v5462_v57 }
 0xdc3   :  { %v2516_v43 = vmul.f32 %v2514_v23, %v5979_v41  ;;  %v2518_v28 = vmul.f32 %v2514_v23, %v5982_v55  ;;  %v2515_v26 = vmul.f32 %v2510_v63, %v5953_v11  ;;  %v2517_v7 = vmul.f32 %v2510_v63, %v5956_v12 }
 0xdc4   :  { %v2520_v53 = vmul.f32 %v2514_v23, %v5985_v54  ;;  %v2522_v18 = vmul.f32 %v2514_v23, %v5987_v1  ;;  %v2519_v33 = vmul.f32 %v2510_v63, %v5958_v45  ;;  %v2521_v34 = vmul.f32 %v2510_v63, %v5960_v22 }
 0xdc5   :  { %v2550_v10 = vadd.f32 %v2548_v24, %v2516_v43  ;;  %v2552_v46 = vadd.f32 %v2548_v24, %v2518_v28  ;;  %v2549_v13 = vadd.f32 %v2544_v27, %v2515_v26  ;;  %v2551_v21 = vadd.f32 %v2544_v27, %v2517_v7 }
 0xdc6   :  { %v2554_v40 = vadd.f32 %v2548_v24, %v2520_v53  ;;  %v2556_v41 = vadd.f32 %v2548_v24, %v2522_v18  ;;  %v2553_v30 = vadd.f32 %v2544_v27, %v2519_v33  ;;  %v2555_v55 = vadd.f32 %v2544_v27, %v2521_v34 }
 0xdc7   :  { %v2598_v9 = vpack.c.bf16 %v2552_v46, %v2550_v10  ;;  %v2597_v11 = vpack.c.bf16 %v2551_v21, %v2549_v13  ;;  %v2524_v12 = vmul.f32 %v2514_v23, %v5989_v59  ;;  %v2526_v54 = vmul.f32 %v2514_v23, %v5991_v60  ;;  %v2888_v21 = vld [vmem:[%s6346_s6] sm:$0xff] }
 0xdc8   :  { %v2600_v6 = vpack.c.bf16 %v2556_v41, %v2554_v40  ;;  %v2599_v1 = vpack.c.bf16 %v2555_v55, %v2553_v30  ;;  %v2523_v45 = vmul.f32 %v2510_v63, %v5962_v8  ;;  %v2525_v22 = vmul.f32 %v2510_v63, %v5964_v39  ;;  %v2889_v40 = vld [vmem:[%s6346_s6 + $0x8] sm:$0xff]  ;;  %v2890_v41 = vld [vmem:[%s6346_s6 + $0x10] sm:$0xff]  ;;  %v2891_v55 = vld [vmem:[%s6346_s6 + $0x18] sm:$0xff] }
 0xdc9   :  { %2653 = vmatprep.mubr.bf16.mxu0 %v2598_v9  ;;  %v2558_v20 = vadd.f32 %v2548_v24, %v2524_v12  ;;  %v2560_v48 = vadd.f32 %v2548_v24, %v2526_v54  ;;  %v2528_v29 = vmul.f32 %v2514_v23, %v5995_v42  ;;  %v2530_v58 = vmul.f32 %v2514_v23, %v5976_v61  ;;  %v2893_v12 = vld [vmem:[%s6346_s6 + $0x28] sm:$0xff] }
 0xdca   :  { %2654 = vmatmul.mubr.bf16.vlgmr.msra.gmra.mrb[56].mxu0 %v2597_v11  ;;  %v2557_v47 = vadd.f32 %v2544_v27, %v2523_v45  ;;  %v2559_v52 = vadd.f32 %v2544_v27, %v2525_v22  ;;  %v2527_v59 = vmul.f32 %v2510_v63, %v5966_v62  ;;  %v2529_v60 = vmul.f32 %v2510_v63, %v5968_v2  ;;  %v2892_v11 = vld [vmem:[%s6346_s6 + $0x20] sm:$0xff]  ;;  %v6083_v22 = vld [vmem:[%s6349_s9 + $0x30] sm:$0x77] }
 0xdcb   :  { %2661 = vmatprep.mubr.bf16.mxu0 %v2600_v6  ;;  %v2602_v14 = vpack.c.bf16 %v2560_v48, %v2558_v20  ;;  %v2562_v0 = vadd.f32 %v2548_v24, %v2528_v29  ;;  %v2564_v8 = vadd.f32 %v2548_v24, %v2530_v58  ;;  %v2900_v30 = vpack.c.bf16 %v2889_v40, %v2888_v21  ;;  %v2894_v6 = vld [vmem:[%s6346_s6 + $0x30] sm:$0xff] }
 0xdcc   :  { %v2601_v3 = vpack.c.bf16 %v2559_v52, %v2557_v47  ;;  %v2561_v39 = vadd.f32 %v2544_v27, %v2527_v59  ;;  %v2563_v16 = vadd.f32 %v2544_v27, %v2529_v60  ;;  %v2901_v9 = vpack.c.bf16 %v2891_v55, %v2890_v41 }
 0xdcd   :  { %v2604_v32 = vpack.c.bf16 %v2564_v8, %v2562_v0  ;;  %v2902_v54 = vpack.c.bf16 %v2893_v12, %v2892_v11  ;;  %v2695_v20 = vrot.slane %v6083_v22, %v5433_v44 }
 0xdce   :  { %v2603_v15 = vpack.c.bf16 %v2563_v16, %v2561_v39 }
 0xdd2   :  { %2662 = vmatmul.mubr.bf16.gmra.mrb[60].mxu0 %v2599_v1  ;;  %v2895_v1 = vld [vmem:[%s6346_s6 + $0x38] sm:$0xff] }
 0xdd3   :  { %2669 = vmatprep.mubr.bf16.mxu0 %v2602_v14  ;;  %v2903_v45 = vpack.c.bf16 %v2895_v1, %v2894_v6 }
 0xdda   :  { %2670 = vmatmul.mubr.bf16.gmra.mrb[64].mxu0 %v2601_v3 }
 0xddb   :  { %2677 = vmatprep.mubr.bf16.mxu0 %v2604_v32 }
 0xde2   :  { %2678 = vmatmul.mubr.bf16.gmra.mrb[68].mxu0 %v2603_v15 }
 0xde3   :  { %4561 = vmatprep.mubr.msk.bf16.mxu0 %vm70_vm0, %v5382_v19 }
 0xe9d   :  { %v4284_v62 = vpop.f32.mrb[56].mxu0 }
 0xe9e   :  { %v4285_v61 = vpop.f32.mrb[57].mxu0 }
 0xe9f   :  { %v4286_v2 = vadd.f32 %v4285_v61, %v4284_v62  ;;  %v4287_v42 = vpop.f32.mrb[58].mxu0 }
 0xea0   :  { %v4288_v5 = vpop.f32.mrb[59].mxu0 }
 0xea1   :  { %v4289_v49 = vadd.f32 %v4288_v5, %v4287_v42 }
 0xea3   :  { %v2686_v31 = vpack.c.bf16 %v4289_v49, %v4286_v2 }
 0xea5   :  { %v4290_v25 = vpop.f32.mrb[60].mxu0  ;;  %4553 = vmatprep.subr.bf16.mxu0 %v2686_v31 }
 0xea6   :  { %v4291_v35 = vpop.f32.mrb[61].mxu0  ;;  %4554 = vmatpush3.bf16.msra.mxu0 %v2686_v31 }
 0xea7   :  { %v4292_v50 = vadd.f32 %v4291_v35, %v4290_v25  ;;  %v4293_v51 = vpop.f32.mrb[62].mxu0 }
 0xea8   :  { %v4294_v17 = vpop.f32.mrb[63].mxu0 }
 0xea9   :  { %v4295_v4 = vadd.f32 %v4294_v17, %v4293_v51 }
 0xeab   :  { %v2687_v23 = vpack.c.bf16 %v4295_v4, %v4292_v50 }
 0xead   :  { %v4296_v24 = vpop.f32.mrb[64].mxu0  ;;  %4555 = vmatprep.subr.bf16.mxu0 %v2687_v23 }
 0xeae   :  { %v4297_v63 = vpop.f32.mrb[65].mxu0  ;;  %4556 = vmatpush3.bf16.msra.mxu0 %v2687_v23 }
 0xeaf   :  { %v4298_v27 = vadd.f32 %v4297_v63, %v4296_v24  ;;  %v4299_v43 = vpop.f32.mrb[66].mxu0 }
 0xeb0   :  { %v4300_v28 = vpop.f32.mrb[67].mxu0 }
 0xeb1   :  { %v4301_v26 = vadd.f32 %v4300_v28, %v4299_v43 }
 0xeb3   :  { %v2688_v7 = vpack.c.bf16 %v4301_v26, %v4298_v27 }
 0xeb5   :  { %v4302_v53 = vpop.f32.mrb[68].mxu0  ;;  %4557 = vmatprep.subr.bf16.mxu0 %v2688_v7 }
 0xeb6   :  { %v4303_v18 = vpop.f32.mrb[69].mxu0  ;;  %4558 = vmatpush3.bf16.msra.mxu0 %v2688_v7 }
 0xeb7   :  { %v4304_v33 = vadd.f32 %v4303_v18, %v4302_v53  ;;  %v4305_v34 = vpop.f32.mrb[70].mxu0 }
 0xeb8   :  { %v4306_v10 = vpop.f32.mrb[71].mxu0 }
 0xeb9   :  { %v4307_v46 = vadd.f32 %v4306_v10, %v4305_v34 }
 0xebb   :  { %v2689_v13 = vpack.c.bf16 %v4307_v46, %v4304_v33 }
 0xebd   :  { %4559 = vmatprep.subr.bf16.mxu0 %v2689_v13 }
 0xebe   :  { %4560 = vmatpush3.bf16.msra.mxu0 %v2689_v13 }
 0xebf   :  { %4569 = vmatprep.subr.bf16.mxu0 %v2900_v30 }
 0xec1   :  { %4562 = vmatmul.mubr.msk.bf16.vlgmr.msra.gmra.mrb[72].mxu0 %vm70_vm0, %v5486_v36 }
 0xec2   :  { %4565 = vmatprep.mubr.msk.bf16.mxu0 %vm70_vm0, %v5490_v37  ;;  %4570 = vmatpush3.bf16.msra.mxu0 %v2900_v30 }
 0xec3   :  { %4571 = vmatprep.subr.bf16.mxu0 %v2901_v9 }
 0xec6   :  { %4572 = vmatpush3.bf16.msra.mxu0 %v2901_v9 }
 0xec7   :  { %4573 = vmatprep.subr.bf16.mxu0 %v2902_v54 }
 0xec9   :  { %4566 = vmatmul.mubr.msk.bf16.gmra.mrb[76].mxu0 %vm70_vm0, %v5498_v38 }
 0xeca   :  { %4574 = vmatpush3.bf16.msra.mxu0 %v2902_v54 }
 0xecb   :  { %4575 = vmatprep.subr.bf16.mxu0 %v2903_v45 }
 0xece   :  { %4576 = vmatpush3.bf16.msra.mxu0 %v2903_v45 }
 0xf94   :  { %v4563_v48 = vpop.f32.mrb[72].mxu0 }
 0xf95   :  { %v2739_v29 = vadd.f32 %v4563_v48, %v2695_v20  ;;  %v2730_v58 = vpop.f32.mrb[73].mxu0 }
 0xf96   :  { %v2731_v47 = vadd.f32 %v2730_v58, %v2695_v20  ;;  %v4564_v52 = vpop.f32.mrb[74].mxu0 }
 0xf97   :  { %v2763_v59 = vsub.f32 0.0, %v2739_v29  ;;  %v2742_v60 = vadd.f32 %v4564_v52, %v2695_v20  ;;  %v2733_v14 = vpop.f32.mrb[75].mxu0 }
 0xf98   :  { %v2761_v0 = vsub.f32 0.0, %v2731_v47  ;;  %v2734_v8 = vadd.f32 %v2733_v14, %v2695_v20 }
 0xf99   :  { %v2773_v3 = vmul.f32 1.442695, %v2763_v59  ;;  %v2764_v39 = vsub.f32 0.0, %v2742_v60 }
 0xf9a   :  { %v2769_v16 = vmul.f32 1.442695, %v2761_v0  ;;  %v2762_v32 = vsub.f32 0.0, %v2734_v8 }
 0xf9b   :  { %5045 = vpow2.f32 %v2773_v3  ;;  %v2775_v15 = vmul.f32 1.442695, %v2764_v39 }
 0xf9c   :  { %5047 = vpow2.f32 %v2769_v16  ;;  %v2771_v62 = vmul.f32 1.442695, %v2762_v32  ;;  %v4567_v61 = vpop.f32.mrb[76].mxu0 }
 0xf9d   :  { %5049 = vpow2.f32 %v2775_v15  ;;  %v2755_v2 = vadd.f32 %v4567_v61, %v2695_v20  ;;  %v2746_v42 = vpop.f32.mrb[77].mxu0 }
 0xf9e   :  { %5051 = vpow2.f32 %v2771_v62  ;;  %v2747_v5 = vadd.f32 %v2746_v42, %v2695_v20  ;;  %v4568_v49 = vpop.f32.mrb[78].mxu0 }
 0xf9f   :  { %v2767_v31 = vsub.f32 0.0, %v2755_v2  ;;  %v2758_v25 = vadd.f32 %v4568_v49, %v2695_v20  ;;  %v2749_v35 = vpop.f32.mrb[79].mxu0 }
 0xfa0   :  { %v2765_v50 = vsub.f32 0.0, %v2747_v5  ;;  %v2750_v51 = vadd.f32 %v2749_v35, %v2695_v20 }
 0xfa1   :  { %v2781_v17 = vmul.f32 1.442695, %v2767_v31  ;;  %v2768_v4 = vsub.f32 0.0, %v2758_v25 }
 0xfa2   :  { %v2777_v23 = vmul.f32 1.442695, %v2765_v50  ;;  %v2766_v24 = vsub.f32 0.0, %v2750_v51 }
 0xfa3   :  { %5053 = vpow2.f32 %v2781_v17  ;;  %v2783_v63 = vmul.f32 1.442695, %v2768_v4 }
 0xfa4   :  { %5055 = vpow2.f32 %v2777_v23  ;;  %v2779_v27 = vmul.f32 1.442695, %v2766_v24 }
 0xfa5   :  { %v5046_v43 = vpop.eup %5045  ;;  %5057 = vpow2.f32 %v2783_v63 }
 0xfa6   :  { %v5048_v28 = vpop.eup %5047  ;;  %v2787_v26 = vadd.f32 1.0, %v5046_v43  ;;  %5059 = vpow2.f32 %v2779_v27 }
 0xfa7   :  { %v5050_v7 = vpop.eup %5049  ;;  %v2785_v53 = vadd.f32 1.0, %v5048_v28 }
 0xfa8   :  { %v5052_v18 = vpop.eup %5051  ;;  %v2788_v33 = vadd.f32 1.0, %v5050_v7 }
 0xfa9   :  { %5061 = vrcp.f32 %v2785_v53  ;;  %v2786_v34 = vadd.f32 1.0, %v5052_v18 }
 0xfaa   :  { %5063 = vrcp.f32 %v2787_v26 }
 0xfab   :  { %5065 = vrcp.f32 %v2786_v34 }
 0xfac   :  { %5067 = vrcp.f32 %v2788_v33 }
 0xfad   :  { %v5054_v10 = vpop.eup %5053 }
 0xfae   :  { %v5056_v46 = vpop.eup %5055  ;;  %v2791_v13 = vadd.f32 1.0, %v5054_v10 }
 0xfaf   :  { %v5058_v21 = vpop.eup %5057  ;;  %v2789_v40 = vadd.f32 1.0, %v5056_v46 }
 0xfb0   :  { %v5060_v41 = vpop.eup %5059  ;;  %v2792_v30 = vadd.f32 1.0, %v5058_v21 }
 0xfb1   :  { %5069 = vrcp.f32 %v2789_v40  ;;  %v2790_v55 = vadd.f32 1.0, %v5060_v41 }
 0xfb2   :  { %5071 = vrcp.f32 %v2791_v13 }
 0xfb3   :  { %v5062_v9 = vpop.eup %5061  ;;  %5073 = vrcp.f32 %v2790_v55 }
 0xfb4   :  { %v5064_v11 = vpop.eup %5063  ;;  %5075 = vrcp.f32 %v2792_v30  ;;  %v2801_v54 = vsel %vm70_vm0, %v5062_v9, 0.0 }
 0xfb5   :  { %v5066_v12 = vpop.eup %5065  ;;  %v2804_v20 = vsel %vm70_vm0, %v5064_v11, 0.0 }
 0xfb6   :  { %v2802_v6 = vsel %vm70_vm0, %v5066_v12, 0.0  ;;  %v5068_v1 = vpop.eup %5067 }
 0xfb7   :  { %v2803_v45 = vadd.f32 %v2802_v6, %v2801_v54  ;;  %v2806_v29 = vsel %vm70_vm0, %v5068_v1, 0.0 }
 0xfb9   :  { %v2805_v48 = vadd.f32 %v2804_v20, %v2803_v45 }
 0xfbb   :  { %v5070_v58 = vpop.eup %5069  ;;  %v2807_v47 = vadd.f32 %v2806_v29, %v2805_v48 }
 0xfbc   :  { %v5072_v52 = vpop.eup %5071  ;;  %v2808_v59 = vsel %vm70_vm0, %v5070_v58, 0.0 }
 0xfbd   :  { %v5074_v60 = vpop.eup %5073  ;;  %v2809_v14 = vadd.f32 %v2808_v59, %v2807_v47  ;;  %v2812_v39 = vsel %vm70_vm0, %v5072_v52, 0.0 }
 0xfbe   :  { %v2810_v0 = vsel %vm70_vm0, %v5074_v60, 0.0  ;;  %v5076_v8 = vpop.eup %5075 }
 0xfbf   :  { %v2811_v3 = vadd.f32 %v2810_v0, %v2809_v14  ;;  %v2814_v32 = vsel %vm70_vm0, %v5076_v8, 0.0  ;;  %v2879_v14 = vrot.slane %v6083_v22, %v5459_v56 }
 0xfc1   :  { %v2813_v16 = vadd.f32 %v2812_v39, %v2811_v3 }
 0xfc3   :  { %v2815_v15 = vadd.f32 %v2814_v32, %v2813_v16 }
 0xfc5   :  { %v2816_v62 = vrot.slane %v2815_v15, 4 }
 0xfc7   :  { %v2817_v61 = vadd.f32 %v2816_v62, %v2815_v15 }
 0xfc9   :  { %v2818_v2 = vrot.slane %v2817_v61, 2 }
 0xfcb   :  { %v2819_v42 = vadd.f32 %v2818_v2, %v2817_v61 }
 0xfcd   :  { %v2820_v5 = vrot.slane %v2819_v42, 1 }
 0xfcf   :  { %v2821_v49 = vadd.f32 %v2820_v5, %v2819_v42 }
 0xfd1   :  { %v2822_v31 = vmul.f32 0.015625, %v2821_v49 }
 0xfd3   :  { %v2828_v25 = vsub.f32 %v5074_v60, %v2822_v31  ;;  %v2823_v35 = vsub.f32 %v5062_v9, %v2822_v31  ;;  %v2824_v50 = vsub.f32 %v5066_v12, %v2822_v31  ;;  %v2825_v51 = vsub.f32 %v5064_v11, %v2822_v31 }
 0xfd4   :  { %v2826_v17 = vsub.f32 %v5068_v1, %v2822_v31  ;;  %v2827_v4 = vsub.f32 %v5070_v58, %v2822_v31  ;;  %v2829_v23 = vsub.f32 %v5072_v52, %v2822_v31  ;;  %v2830_v24 = vsub.f32 %v5076_v8, %v2822_v31 }
 0xfd5   :  { %v2831_v63 = vmul.f32 %v2823_v35, %v2823_v35  ;;  %v2832_v27 = vmul.f32 %v2824_v50, %v2824_v50  ;;  %v2833_v43 = vmul.f32 %v2825_v51, %v2825_v51  ;;  %v2836_v10 = vmul.f32 %v2828_v25, %v2828_v25 }
 0xfd6   :  { %v2834_v28 = vmul.f32 %v2826_v17, %v2826_v17  ;;  %v2835_v18 = vmul.f32 %v2827_v4, %v2827_v4  ;;  %v2837_v21 = vmul.f32 %v2829_v23, %v2829_v23  ;;  %v2838_v55 = vmul.f32 %v2830_v24, %v2830_v24 }
 0xfd7   :  { %v2839_v26 = vsel %vm70_vm0, %v2831_v63, 0.0  ;;  %v2840_v7 = vsel %vm70_vm0, %v2832_v27, 0.0  ;;  %v2842_v33 = vsel %vm70_vm0, %v2833_v43, 0.0  ;;  %v2848_v30 = vsel %vm70_vm0, %v2836_v10, 0.0  ;;  %v3185_v10 = vld [vmem:[%s6347_s7 + $0x8] sm:$0xff] }
 0xfd8   :  { %v2841_v53 = vadd.f32 %v2840_v7, %v2839_v26  ;;  %v2844_v46 = vsel %vm70_vm0, %v2834_v28, 0.0  ;;  %v2846_v40 = vsel %vm70_vm0, %v2835_v18, 0.0  ;;  %v2850_v11 = vsel %vm70_vm0, %v2837_v21, 0.0 }
 0xfd9   :  { %v2852_v54 = vsel %vm70_vm0, %v2838_v55, 0.0 }
 0xfda   :  { %v2843_v34 = vadd.f32 %v2842_v33, %v2841_v53 }
 0xfdc   :  { %v2845_v13 = vadd.f32 %v2844_v46, %v2843_v34 }
 0xfde   :  { %v2847_v41 = vadd.f32 %v2846_v40, %v2845_v13 }
 0xfe0   :  { %v2849_v9 = vadd.f32 %v2848_v30, %v2847_v41 }
 0xfe2   :  { %v2851_v12 = vadd.f32 %v2850_v11, %v2849_v9 }
 0xfe4   :  { %v2853_v6 = vadd.f32 %v2852_v54, %v2851_v12 }
 0xfe6   :  { %v2854_v1 = vrot.slane %v2853_v6, 4 }
 0xfe8   :  { %v2855_v45 = vadd.f32 %v2854_v1, %v2853_v6 }
 0xfea   :  { %v2856_v20 = vrot.slane %v2855_v45, 2 }
 0xfec   :  { %v2857_v48 = vadd.f32 %v2856_v20, %v2855_v45 }
 0xfee   :  { %v2858_v29 = vrot.slane %v2857_v48, 1 }
 0xff0   :  { %v2859_v58 = vadd.f32 %v2858_v29, %v2857_v48 }
 0xff2   :  { %v2860_v47 = vmul.f32 0.015625, %v2859_v58 }
 0xff4   :  { %v2861_v52 = vadd.f32 1e-05, %v2860_v47 }
 0xff6   :  { %5077 = vrsqrt.f32 %v2861_v52 }
0x1000   :  { %v5078_v59 = vpop.eup %5077 }
0x1001   :  { %v2863_v60 = vmul.f32 %v5078_v59, %v6083_v22 }
0x1003   :  { %v2867_v0 = vrot.slane %v2863_v60, %v5462_v57 }
0x1005   :  { %v2868_v8 = vmul.f32 %v2867_v0, %v2823_v35  ;;  %v2869_v3 = vmul.f32 %v2867_v0, %v2824_v50  ;;  %v2870_v39 = vmul.f32 %v2867_v0, %v2825_v51  ;;  %v2871_v16 = vmul.f32 %v2867_v0, %v2826_v17 }
0x1006   :  { %v2872_v32 = vmul.f32 %v2867_v0, %v2827_v4  ;;  %v2873_v15 = vmul.f32 %v2867_v0, %v2828_v25  ;;  %v2874_v62 = vmul.f32 %v2867_v0, %v2829_v23  ;;  %v2875_v61 = vmul.f32 %v2867_v0, %v2830_v24 }
0x1007   :  { %v2880_v2 = vadd.f32 %v2879_v14, %v2868_v8  ;;  %v2881_v42 = vadd.f32 %v2879_v14, %v2869_v3  ;;  %v2882_v5 = vadd.f32 %v2879_v14, %v2870_v39  ;;  %v2883_v49 = vadd.f32 %v2879_v14, %v2871_v16 }
0x1008   :  { %v2884_v31 = vadd.f32 %v2879_v14, %v2872_v32  ;;  %v2885_v63 = vadd.f32 %v2879_v14, %v2873_v15  ;;  %v2886_v27 = vadd.f32 %v2879_v14, %v2874_v62  ;;  %v2887_v43 = vadd.f32 %v2879_v14, %v2875_v61 }
0x1009   :  { %v2896_v28 = vpack.c.bf16 %v2881_v42, %v2880_v2  ;;  %v2897_v22 = vpack.c.bf16 %v2883_v49, %v2882_v5 }
0x100a   :  { %v2898_v26 = vpack.c.bf16 %v2885_v63, %v2884_v31  ;;  %v2899_v7 = vpack.c.bf16 %v2887_v43, %v2886_v27 }
0x100b   :  { %4577 = vmatprep.mubr.msk.bf16.mxu0 %vm70_vm0, %v2896_v28 }
0x100c   :  { %4578 = vmatmul.mubr.msk.bf16.vlgmr.msra.gmra.mrb[80].mxu0 %vm70_vm0, %v2897_v22 }
0x100d   :  { %4581 = vmatprep.mubr.msk.bf16.mxu0 %vm70_vm0, %v2898_v26 }
0x1014   :  { %4582 = vmatmul.mubr.msk.bf16.gmra.mrb[84].mxu0 %vm70_vm0, %v2899_v7 }
0x1015   :  { %4593 = vmatprep.mubr.msk.bf16.mxu0 %vm70_vm0, %v5382_v19  ;;  %v3184_v19 = vld [vmem:[%s6347_s7] sm:$0xff] }
0x1016   :  { %v4703_v46 = vpack.c.bf16 %v3185_v10, %v3184_v19 }
0x10df   :  { %v4579_v25 = vpop.f32.mrb[80].mxu0 }
0x10e0   :  { %v2950_v35 = vpop.f32.mrb[81].mxu0 }
0x10e1   :  { %v4580_v50 = vpop.f32.mrb[82].mxu0 }
0x10e2   :  { %v2982_v51 = vpack.c.bf16 %v4580_v50, %v4579_v25  ;;  %v2953_v17 = vpop.f32.mrb[83].mxu0 }
0x10e3   :  { %v2981_v4 = vpack.c.bf16 %v2953_v17, %v2950_v35 }
0x10e5   :  { %4585 = vmatprep.subr.bf16.mxu0 %v2981_v4 }
0x10e6   :  { %4586 = vmatpush3.bf16.msra.mxu0 %v2981_v4 }
0x10e7   :  { %v4583_v23 = vpop.f32.mrb[84].mxu0  ;;  %4587 = vmatprep.subr.bf16.mxu0 %v2982_v51 }
0x10e8   :  { %v2966_v24 = vpop.f32.mrb[85].mxu0 }
0x10e9   :  { %v4584_v53 = vpop.f32.mrb[86].mxu0 }
0x10ea   :  { %v2984_v18 = vpack.c.bf16 %v4584_v53, %v4583_v23  ;;  %v2969_v33 = vpop.f32.mrb[87].mxu0  ;;  %4588 = vmatpush3.bf16.msra.mxu0 %v2982_v51 }
0x10eb   :  { %v2983_v34 = vpack.c.bf16 %v2969_v33, %v2966_v24 }
0x10ed   :  { %4589 = vmatprep.subr.bf16.mxu0 %v2983_v34 }
0x10ee   :  { %4590 = vmatpush3.bf16.msra.mxu0 %v2983_v34 }
0x10ef   :  { %4591 = vmatprep.subr.bf16.mxu0 %v2984_v18 }
0x10f2   :  { %4592 = vmatpush3.bf16.msra.mxu0 %v2984_v18 }
0x10f3   :  { %4704 = vmatprep.subr.bf16.mxu0 %v4703_v46 }
0x10f5   :  { %4594 = vmatmul.mubr.msk.bf16.vlgmr.msra.gmra.mrb[88].mxu0 %vm70_vm0, %v5486_v36  ;;  %v6128_v36 = vld [vmem:[%s6349_s9 + $0x38] sm:$0x77] }
0x10f6   :  { %4597 = vmatprep.mubr.msk.bf16.mxu0 %vm70_vm0, %v5490_v37  ;;  %4706 = vmatpush3.bf16.msra.mxu0 %v4703_v46  ;;  %v2990_v37 = vrot.slane %v6128_v36, %v5433_v44 }
0x10fd   :  { %4598 = vmatmul.mubr.msk.bf16.gmra.mrb[92].mxu0 %vm70_vm0, %v5498_v38 }
0x11c8   :  { %v4595_v38 = vpop.f32.mrb[88].mxu0 }
0x11c9   :  { %v3034_v13 = vadd.f32 %v4595_v38, %v2990_v37  ;;  %v3025_v21 = vpop.f32.mrb[89].mxu0 }
0x11ca   :  { %v3026_v40 = vadd.f32 %v3025_v21, %v2990_v37  ;;  %v4596_v41 = vpop.f32.mrb[90].mxu0 }
0x11cb   :  { %v3058_v30 = vsub.f32 0.0, %v3034_v13  ;;  %v3037_v55 = vadd.f32 %v4596_v41, %v2990_v37  ;;  %v3028_v9 = vpop.f32.mrb[91].mxu0 }
0x11cc   :  { %v3056_v11 = vsub.f32 0.0, %v3026_v40  ;;  %v3029_v12 = vadd.f32 %v3028_v9, %v2990_v37 }
0x11cd   :  { %v3068_v54 = vmul.f32 1.442695, %v3058_v30  ;;  %v3059_v6 = vsub.f32 0.0, %v3037_v55 }
0x11ce   :  { %v3064_v1 = vmul.f32 1.442695, %v3056_v11  ;;  %v3057_v45 = vsub.f32 0.0, %v3029_v12 }
0x11cf   :  { %5079 = vpow2.f32 %v3068_v54  ;;  %v3070_v20 = vmul.f32 1.442695, %v3059_v6 }
0x11d0   :  { %5081 = vpow2.f32 %v3064_v1  ;;  %v3066_v48 = vmul.f32 1.442695, %v3057_v45  ;;  %v4599_v29 = vpop.f32.mrb[92].mxu0 }
0x11d1   :  { %5083 = vpow2.f32 %v3070_v20  ;;  %v3050_v58 = vadd.f32 %v4599_v29, %v2990_v37  ;;  %v3041_v47 = vpop.f32.mrb[93].mxu0 }
0x11d2   :  { %5085 = vpow2.f32 %v3066_v48  ;;  %v3042_v52 = vadd.f32 %v3041_v47, %v2990_v37  ;;  %v4600_v59 = vpop.f32.mrb[94].mxu0 }
0x11d3   :  { %v3062_v60 = vsub.f32 0.0, %v3050_v58  ;;  %v3053_v14 = vadd.f32 %v4600_v59, %v2990_v37  ;;  %v3044_v0 = vpop.f32.mrb[95].mxu0 }
0x11d4   :  { %v3060_v8 = vsub.f32 0.0, %v3042_v52  ;;  %v3045_v3 = vadd.f32 %v3044_v0, %v2990_v37 }
0x11d5   :  { %v3076_v39 = vmul.f32 1.442695, %v3062_v60  ;;  %v3063_v16 = vsub.f32 0.0, %v3053_v14 }
0x11d6   :  { %v3072_v32 = vmul.f32 1.442695, %v3060_v8  ;;  %v3061_v15 = vsub.f32 0.0, %v3045_v3 }
0x11d7   :  { %5087 = vpow2.f32 %v3076_v39  ;;  %v3078_v62 = vmul.f32 1.442695, %v3063_v16 }
0x11d8   :  { %5089 = vpow2.f32 %v3072_v32  ;;  %v3074_v61 = vmul.f32 1.442695, %v3061_v15 }
0x11d9   :  { %v5080_v2 = vpop.eup %5079  ;;  %5091 = vpow2.f32 %v3078_v62 }
0x11da   :  { %v5082_v42 = vpop.eup %5081  ;;  %v3082_v5 = vadd.f32 1.0, %v5080_v2  ;;  %5093 = vpow2.f32 %v3074_v61 }
0x11db   :  { %v5084_v49 = vpop.eup %5083  ;;  %v3080_v31 = vadd.f32 1.0, %v5082_v42 }
0x11dc   :  { %v5086_v63 = vpop.eup %5085  ;;  %v3083_v27 = vadd.f32 1.0, %v5084_v49 }
0x11dd   :  { %5095 = vrcp.f32 %v3080_v31  ;;  %v3081_v43 = vadd.f32 1.0, %v5086_v63 }
0x11de   :  { %5097 = vrcp.f32 %v3082_v5 }
0x11df   :  { %5099 = vrcp.f32 %v3081_v43 }
0x11e0   :  { %5101 = vrcp.f32 %v3083_v27 }
0x11e1   :  { %v5088_v28 = vpop.eup %5087 }
0x11e2   :  { %v5090_v22 = vpop.eup %5089  ;;  %v3086_v26 = vadd.f32 1.0, %v5088_v28 }
0x11e3   :  { %v5092_v7 = vpop.eup %5091  ;;  %v3084_v25 = vadd.f32 1.0, %v5090_v22 }
0x11e4   :  { %v5094_v35 = vpop.eup %5093  ;;  %v3087_v50 = vadd.f32 1.0, %v5092_v7 }
0x11e5   :  { %5103 = vrcp.f32 %v3084_v25  ;;  %v3085_v51 = vadd.f32 1.0, %v5094_v35 }
0x11e6   :  { %5105 = vrcp.f32 %v3086_v26 }
0x11e7   :  { %v5096_v17 = vpop.eup %5095  ;;  %5107 = vrcp.f32 %v3085_v51 }
0x11e8   :  { %v5098_v4 = vpop.eup %5097  ;;  %5109 = vrcp.f32 %v3087_v50  ;;  %v3097_v24 = vsel %vm3096_vm3, %v5096_v17, 0.0 }
0x11e9   :  { %v5100_v23 = vpop.eup %5099  ;;  %v3100_v34 = vsel %vm3096_vm3, %v5098_v4, 0.0 }
0x11ea   :  { %v3098_v53 = vsel %vm3096_vm3, %v5100_v23, 0.0  ;;  %v5102_v18 = vpop.eup %5101 }
0x11eb   :  { %v3099_v33 = vadd.f32 %v3098_v53, %v3097_v24  ;;  %v3102_v10 = vsel %vm3096_vm3, %v5102_v18, 0.0 }
0x11ed   :  { %v3101_v19 = vadd.f32 %v3100_v34, %v3099_v33 }
0x11ef   :  { %v5104_v46 = vpop.eup %5103  ;;  %v3103_v37 = vadd.f32 %v3102_v10, %v3101_v19 }
0x11f0   :  { %v5106_v38 = vpop.eup %5105  ;;  %v3104_v13 = vsel %vm3096_vm3, %v5104_v46, 0.0 }
0x11f1   :  { %v5108_v21 = vpop.eup %5107  ;;  %v3105_v40 = vadd.f32 %v3104_v13, %v3103_v37  ;;  %v3108_v9 = vsel %vm3096_vm3, %v5106_v38, 0.0  ;;  %v3175_v37 = vrot.slane %v6128_v36, %v5459_v56 }
0x11f2   :  { %v3106_v41 = vsel %vm3096_vm3, %v5108_v21, 0.0  ;;  %v5110_v30 = vpop.eup %5109 }
0x11f3   :  { %v3107_v55 = vadd.f32 %v3106_v41, %v3105_v40  ;;  %v3110_v12 = vsel %vm3096_vm3, %v5110_v30, 0.0 }
0x11f5   :  { %v3109_v11 = vadd.f32 %v3108_v9, %v3107_v55 }
0x11f7   :  { %v3111_v54 = vadd.f32 %v3110_v12, %v3109_v11 }
0x11f9   :  { %v3112_v6 = vrot.slane %v3111_v54, 4 }
0x11fb   :  { %v3113_v1 = vadd.f32 %v3112_v6, %v3111_v54 }
0x11fd   :  { %v3114_v45 = vrot.slane %v3113_v1, 2 }
0x11ff   :  { %v3115_v20 = vadd.f32 %v3114_v45, %v3113_v1 }
0x1201   :  { %v3116_v48 = vrot.slane %v3115_v20, 1 }
0x1203   :  { %v3117_v29 = vadd.f32 %v3116_v48, %v3115_v20 }
0x1205   :  { %v3118_v58 = vmul.f32 0.015625, %v3117_v29  ;;  %v5214_v29 = vld [vmem:[%s6340_s0] sm:$0xff] }
0x1207   :  { %v3124_v47 = vsub.f32 %v5108_v21, %v3118_v58  ;;  %v3119_v52 = vsub.f32 %v5096_v17, %v3118_v58  ;;  %v3120_v59 = vsub.f32 %v5100_v23, %v3118_v58  ;;  %v3121_v60 = vsub.f32 %v5098_v4, %v3118_v58 }
0x1208   :  { %v3122_v14 = vsub.f32 %v5102_v18, %v3118_v58  ;;  %v3123_v0 = vsub.f32 %v5104_v46, %v3118_v58  ;;  %v3125_v8 = vsub.f32 %v5106_v38, %v3118_v58  ;;  %v3126_v3 = vsub.f32 %v5110_v30, %v3118_v58 }
0x1209   :  { %v3127_v39 = vmul.f32 %v3119_v52, %v3119_v52  ;;  %v3128_v16 = vmul.f32 %v3120_v59, %v3120_v59  ;;  %v3129_v32 = vmul.f32 %v3121_v60, %v3121_v60  ;;  %v3132_v31 = vmul.f32 %v3124_v47, %v3124_v47 }
0x120a   :  { %v3130_v15 = vmul.f32 %v3122_v14, %v3122_v14  ;;  %v3131_v42 = vmul.f32 %v3123_v0, %v3123_v0  ;;  %v3133_v43 = vmul.f32 %v3125_v8, %v3125_v8  ;;  %v3134_v7 = vmul.f32 %v3126_v3, %v3126_v3 }
0x120b   :  { %v3135_v62 = vsel %vm3096_vm3, %v3127_v39, 0.0  ;;  %v3136_v61 = vsel %vm3096_vm3, %v3128_v16, 0.0  ;;  %v3138_v5 = vsel %vm3096_vm3, %v3129_v32, 0.0  ;;  %v3144_v26 = vsel %vm3096_vm3, %v3132_v31, 0.0  ;;  %v3554_v31 = vld [vmem:[%s6348_s8] sm:$0xf] }
0x120c   :  { %v3137_v2 = vadd.f32 %v3136_v61, %v3135_v62  ;;  %v3140_v63 = vsel %vm3096_vm3, %v3130_v15, 0.0  ;;  %v3142_v28 = vsel %vm3096_vm3, %v3131_v42, 0.0  ;;  %v3146_v35 = vsel %vm3096_vm3, %v3133_v43, 0.0  ;;  %v6167_v15 = vld [vmem:[%s6340_s0 + $0x8] sm:$0xff]  ;;  %v6174_v62 = vld [vmem:[%s6340_s0 + $0x10] sm:$0xff]  ;;  %v6181_v61 = vld [vmem:[%s6340_s0 + $0x18] sm:$0xff] }
0x120d   :  { %v3148_v51 = vsel %vm3096_vm3, %v3134_v7, 0.0  ;;  %v6195_v42 = vld [vmem:[%s6340_s0 + $0x28] sm:$0xff] }
0x120e   :  { %v3139_v49 = vadd.f32 %v3138_v5, %v3137_v2  ;;  %v6188_v2 = vld [vmem:[%s6340_s0 + $0x20] sm:$0xff]  ;;  %v6202_v5 = vld [vmem:[%s6340_s0 + $0x30] sm:$0xff] }
0x1210   :  { %v3141_v27 = vadd.f32 %v3140_v63, %v3139_v49  ;;  %v6209_v49 = vld [vmem:[%s6340_s0 + $0x38] sm:$0xff]  ;;  %v6219_v63 = vld [vmem:[%s6349_s9 + $0x40] sm:$0x77] }
0x1212   :  { %v3143_v22 = vadd.f32 %v3142_v28, %v3141_v27  ;;  %v3320_v27 = vrot.slane %v6219_v63, %v5433_v44 }
0x1214   :  { %v3145_v25 = vadd.f32 %v3144_v26, %v3143_v22 }
0x1216   :  { %v3147_v50 = vadd.f32 %v3146_v35, %v3145_v25 }
0x1218   :  { %v3149_v17 = vadd.f32 %v3148_v51, %v3147_v50 }
0x121a   :  { %v3150_v4 = vrot.slane %v3149_v17, 4 }
0x121c   :  { %v3151_v23 = vadd.f32 %v3150_v4, %v3149_v17 }
0x121e   :  { %v3152_v24 = vrot.slane %v3151_v23, 2 }
0x1220   :  { %v3153_v53 = vadd.f32 %v3152_v24, %v3151_v23 }
0x1222   :  { %v3154_v18 = vrot.slane %v3153_v53, 1 }
0x1224   :  { %v3155_v33 = vadd.f32 %v3154_v18, %v3153_v53 }
0x1226   :  { %v3156_v34 = vmul.f32 0.015625, %v3155_v33 }
0x1228   :  { %v3157_v19 = vadd.f32 1e-05, %v3156_v34 }
0x122a   :  { %5111 = vrsqrt.f32 %v3157_v19 }
0x1234   :  { %v5112_v10 = vpop.eup %5111 }
0x1235   :  { %v3159_v46 = vmul.f32 %v5112_v10, %v6128_v36 }
0x1237   :  { %v3163_v38 = vrot.slane %v3159_v46, %v5462_v57 }
0x1239   :  { %v3164_v13 = vmul.f32 %v3163_v38, %v3119_v52  ;;  %v3165_v21 = vmul.f32 %v3163_v38, %v3120_v59  ;;  %v3166_v40 = vmul.f32 %v3163_v38, %v3121_v60  ;;  %v3167_v41 = vmul.f32 %v3163_v38, %v3122_v14 }
0x123a   :  { %v3168_v30 = vmul.f32 %v3163_v38, %v3123_v0  ;;  %v3169_v55 = vmul.f32 %v3163_v38, %v3124_v47  ;;  %v3170_v9 = vmul.f32 %v3163_v38, %v3125_v8  ;;  %v3171_v11 = vmul.f32 %v3163_v38, %v3126_v3 }
0x123b   :  { %v3176_v12 = vadd.f32 %v3175_v37, %v3164_v13  ;;  %v3177_v54 = vadd.f32 %v3175_v37, %v3165_v21  ;;  %v3178_v6 = vadd.f32 %v3175_v37, %v3166_v40  ;;  %v3179_v36 = vadd.f32 %v3175_v37, %v3167_v41 }
0x123c   :  { %v3180_v1 = vadd.f32 %v3175_v37, %v3168_v30  ;;  %v3181_v45 = vadd.f32 %v3175_v37, %v3169_v55  ;;  %v3182_v20 = vadd.f32 %v3175_v37, %v3170_v9  ;;  %v3183_v48 = vadd.f32 %v3175_v37, %v3171_v11 }
0x123d   :  { %4605 = vmatprep.mubr.msk.f32.mxu0 %vm3096_vm3, %v3176_v12 }
0x123e   :  { %4606 = vmatmul.mubr.msk.f32.vlgmr.msra.gmra.mrb[96].mxu0 %vm3096_vm3, %v3177_v54 }
0x123f   :  { %4608 = vmatprep.mubr.msk.f32.mxu0 %vm3096_vm3, %v3178_v6 }
0x1242   :  { %4609 = vmatmul.mubr.msk.f32.gmra.mrb[98].mxu0 %vm3096_vm3, %v3179_v36 }
0x1243   :  { %4611 = vmatprep.mubr.msk.f32.mxu0 %vm3096_vm3, %v3180_v1 }
0x1246   :  { %4612 = vmatmul.mubr.msk.f32.gmra.mrb[100].mxu0 %vm3096_vm3, %v3181_v45 }
0x1247   :  { %4614 = vmatprep.mubr.msk.f32.mxu0 %vm3096_vm3, %v3182_v20 }
0x124a   :  { %4615 = vmatmul.mubr.msk.f32.gmra.mrb[102].mxu0 %vm3096_vm3, %v3183_v48 }
0x124b   :  { %4633 = vmatprep.mubr.msk.f32.mxu0 %vm70_vm0, %v5214_v29 }
0x1311   :  { %v4607_v58 = vpop.f32.mrb[96].mxu0 }
0x1312   :  { %v3276_v47 = vpop.f32.mrb[97].mxu0 }
0x1313   :  { %v4707_v52 = vpack.c.bf16 %v4607_v58, %v3276_v47 }
0x1315   :  { %v4610_v59 = vpop.f32.mrb[98].mxu0  ;;  %4708 = vmatprep.subr.bf16.mxu0 %v4707_v52 }
0x1316   :  { %v3286_v60 = vpop.f32.mrb[99].mxu0  ;;  %4710 = vmatpush3.bf16.msra.mxu0 %v4707_v52 }
0x1317   :  { %v4711_v14 = vpack.c.bf16 %v4610_v59, %v3286_v60 }
0x1319   :  { %v4613_v0 = vpop.f32.mrb[100].mxu0  ;;  %4712 = vmatprep.subr.bf16.mxu0 %v4711_v14 }
0x131a   :  { %v3296_v8 = vpop.f32.mrb[101].mxu0  ;;  %4714 = vmatpush3.bf16.msra.mxu0 %v4711_v14 }
0x131b   :  { %v4715_v3 = vpack.c.bf16 %v4613_v0, %v3296_v8 }
0x131d   :  { %v4616_v39 = vpop.f32.mrb[102].mxu0  ;;  %4716 = vmatprep.subr.bf16.mxu0 %v4715_v3 }
0x131e   :  { %v3306_v16 = vpop.f32.mrb[103].mxu0  ;;  %4718 = vmatpush3.bf16.msra.mxu0 %v4715_v3 }
0x131f   :  { %v4719_v32 = vpack.c.bf16 %v4616_v39, %v3306_v16 }
0x1321   :  { %4720 = vmatprep.subr.bf16.mxu0 %v4719_v32 }
0x1322   :  { %4722 = vmatpush3.bf16.msra.mxu0 %v4719_v32 }
0x1323   :  { %4645 = vmatprep.subr.msk.mxu0 %vm3579_vm4, %v3554_v31 }
0x1325   :  { %4634 = vmatmul.mubr.msk.f32.vlgmr.msra.gmra.mrb[104].mxu0 %vm70_vm0, %v6167_v15 }
0x1326   :  { %4636 = vmatprep.mubr.msk.f32.mxu0 %vm70_vm0, %v6174_v62  ;;  %4646 = vmatpush3.msk.msra.mxu0 %vm3579_vm4, %v3554_v31 }
0x1329   :  { %4637 = vmatmul.mubr.msk.f32.gmra.mrb[106].mxu0 %vm70_vm0, %v6181_v61 }
0x132a   :  { %4639 = vmatprep.mubr.msk.f32.mxu0 %vm70_vm0, %v6188_v2 }
0x132d   :  { %4640 = vmatmul.mubr.msk.f32.gmra.mrb[108].mxu0 %vm70_vm0, %v6195_v42 }
0x132e   :  { %4642 = vmatprep.mubr.msk.f32.mxu0 %vm70_vm0, %v6202_v5 }
0x1331   :  { %4643 = vmatmul.mubr.msk.f32.gmra.mrb[110].mxu0 %vm70_vm0, %v6209_v49 }
0x13f8   :  { %v4635_v43 = vpop.f32.mrb[104].mxu0 }
0x13f9   :  { %v3393_v28 = vadd.f32 %v4635_v43, %v3320_v27  ;;  %v3387_v22 = vpop.f32.mrb[105].mxu0 }
0x13fa   :  { %v3388_v26 = vadd.f32 %v3387_v22, %v3320_v27 }
0x13fb   :  { %v3427_v7 = vsub.f32 0.0, %v3393_v28 }
0x13fc   :  { %v3426_v25 = vsub.f32 0.0, %v3388_v26  ;;  %v4638_v35 = vpop.f32.mrb[106].mxu0 }
0x13fd   :  { %v3436_v50 = vmul.f32 1.442695, %v3427_v7  ;;  %v3403_v51 = vadd.f32 %v4638_v35, %v3320_v27  ;;  %v3397_v17 = vpop.f32.mrb[107].mxu0 }
0x13fe   :  { %v3434_v4 = vmul.f32 1.442695, %v3426_v25  ;;  %v3398_v23 = vadd.f32 %v3397_v17, %v3320_v27 }
0x13ff   :  { %5113 = vpow2.f32 %v3436_v50  ;;  %v3429_v24 = vsub.f32 0.0, %v3403_v51 }
0x1400   :  { %5115 = vpow2.f32 %v3434_v4  ;;  %v3428_v53 = vsub.f32 0.0, %v3398_v23  ;;  %v4641_v18 = vpop.f32.mrb[108].mxu0 }
0x1401   :  { %v3440_v33 = vmul.f32 1.442695, %v3429_v24  ;;  %v3413_v34 = vadd.f32 %v4641_v18, %v3320_v27  ;;  %v3407_v19 = vpop.f32.mrb[109].mxu0 }
0x1402   :  { %v3438_v10 = vmul.f32 1.442695, %v3428_v53  ;;  %v3408_v46 = vadd.f32 %v3407_v19, %v3320_v27 }
0x1403   :  { %5117 = vpow2.f32 %v3440_v33  ;;  %v3431_v37 = vsub.f32 0.0, %v3413_v34 }
0x1404   :  { %5119 = vpow2.f32 %v3438_v10  ;;  %v3430_v38 = vsub.f32 0.0, %v3408_v46  ;;  %v4644_v13 = vpop.f32.mrb[110].mxu0 }
0x1405   :  { %v3444_v21 = vmul.f32 1.442695, %v3431_v37  ;;  %v3423_v40 = vadd.f32 %v4644_v13, %v3320_v27  ;;  %v3417_v41 = vpop.f32.mrb[111].mxu0 }
0x1406   :  { %v3442_v30 = vmul.f32 1.442695, %v3430_v38  ;;  %v3418_v55 = vadd.f32 %v3417_v41, %v3320_v27 }
0x1407   :  { %5121 = vpow2.f32 %v3444_v21  ;;  %v3433_v9 = vsub.f32 0.0, %v3423_v40 }
0x1408   :  { %5123 = vpow2.f32 %v3442_v30  ;;  %v3432_v11 = vsub.f32 0.0, %v3418_v55 }
0x1409   :  { %v5114_v12 = vpop.eup %5113  ;;  %v3448_v54 = vmul.f32 1.442695, %v3433_v9 }
0x140a   :  { %v5116_v6 = vpop.eup %5115  ;;  %v3451_v36 = vadd.f32 1.0, %v5114_v12  ;;  %v3446_v1 = vmul.f32 1.442695, %v3432_v11 }
0x140b   :  { %v3450_v45 = vadd.f32 1.0, %v5116_v6  ;;  %5125 = vpow2.f32 %v3448_v54 }
0x140c   :  { %5127 = vrcp.f32 %v3451_v36 }
0x140d   :  { %v5118_v20 = vpop.eup %5117  ;;  %5129 = vrcp.f32 %v3450_v45 }
0x140e   :  { %v5120_v48 = vpop.eup %5119  ;;  %v3453_v29 = vadd.f32 1.0, %v5118_v20  ;;  %5131 = vpow2.f32 %v3446_v1 }
0x140f   :  { %v3452_v58 = vadd.f32 1.0, %v5120_v48 }
0x1410   :  { %5133 = vrcp.f32 %v3453_v29 }
0x1411   :  { %v5122_v47 = vpop.eup %5121  ;;  %5135 = vrcp.f32 %v3452_v58 }
0x1412   :  { %v5124_v52 = vpop.eup %5123  ;;  %v3455_v59 = vadd.f32 1.0, %v5122_v47 }
0x1413   :  { %v3454_v60 = vadd.f32 1.0, %v5124_v52 }
0x1414   :  { %5137 = vrcp.f32 %v3455_v59 }
0x1415   :  { %v5126_v14 = vpop.eup %5125  ;;  %5139 = vrcp.f32 %v3454_v60 }
0x1416   :  { %v5128_v0 = vpop.eup %5127  ;;  %v3457_v8 = vadd.f32 1.0, %v5126_v14 }
0x1417   :  { %v5130_v3 = vpop.eup %5129  ;;  %v3468_v39 = vsel %vm3466_vm5, %v5128_v0, 0.0 }
0x1418   :  { %v5132_v16 = vpop.eup %5131  ;;  %v3467_v32 = vsel %vm3466_vm5, %v5130_v3, 0.0  ;;  %5141 = vrcp.f32 %v3457_v8 }
0x1419   :  { %v3469_v31 = vadd.f32 %v3468_v39, %v3467_v32  ;;  %v3456_v27 = vadd.f32 1.0, %v5132_v16 }
0x141a   :  { %v5134_v43 = vpop.eup %5133 }
0x141b   :  { %v5136_v28 = vpop.eup %5135  ;;  %5143 = vrcp.f32 %v3456_v27  ;;  %v3472_v25 = vsel %vm3466_vm5, %v5134_v43, 0.0 }
0x141c   :  { %v3470_v22 = vsel %vm3466_vm5, %v5136_v28, 0.0 }
0x141d   :  { %v3471_v26 = vadd.f32 %v3470_v22, %v3469_v31 }
0x141e   :  { %v5138_v7 = vpop.eup %5137 }
0x141f   :  { %v5140_v35 = vpop.eup %5139  ;;  %v3473_v50 = vadd.f32 %v3472_v25, %v3471_v26  ;;  %v3476_v4 = vsel %vm3466_vm5, %v5138_v7, 0.0 }
0x1420   :  { %v3474_v51 = vsel %vm3466_vm5, %v5140_v35, 0.0 }
0x1421   :  { %v3475_v17 = vadd.f32 %v3474_v51, %v3473_v50 }
0x1422   :  { %v5142_v24 = vpop.eup %5141 }
0x1423   :  { %v3477_v23 = vadd.f32 %v3476_v4, %v3475_v17  ;;  %v3480_v34 = vsel %vm3466_vm5, %v5142_v24, 0.0 }
0x1425   :  { %v5144_v53 = vpop.eup %5143 }
0x1426   :  { %v3478_v18 = vsel %vm3466_vm5, %v5144_v53, 0.0 }
0x1427   :  { %v3479_v33 = vadd.f32 %v3478_v18, %v3477_v23 }
0x1429   :  { %v3481_v19 = vadd.f32 %v3480_v34, %v3479_v33 }
0x142b   :  { %v3482_v10 = vrot.slane %v3481_v19, 4 }
0x142d   :  { %v3483_v46 = vadd.f32 %v3482_v10, %v3481_v19 }
0x142f   :  { %v3484_v37 = vrot.slane %v3483_v46, 2 }
0x1431   :  { %v3485_v38 = vadd.f32 %v3484_v37, %v3483_v46 }
0x1433   :  { %v3486_v13 = vrot.slane %v3485_v38, 1 }
0x1435   :  { %v3487_v21 = vadd.f32 %v3486_v13, %v3485_v38 }
0x1437   :  { %v3488_v40 = vmul.f32 0.015625, %v3487_v21 }
0x1439   :  { %v3495_v41 = vsub.f32 %v5144_v53, %v3488_v40  ;;  %v3489_v30 = vsub.f32 %v5130_v3, %v3488_v40  ;;  %v3490_v55 = vsub.f32 %v5128_v0, %v3488_v40  ;;  %v3491_v9 = vsub.f32 %v5136_v28, %v3488_v40 }
0x143a   :  { %v3492_v11 = vsub.f32 %v5134_v43, %v3488_v40  ;;  %v3493_v12 = vsub.f32 %v5140_v35, %v3488_v40  ;;  %v3494_v54 = vsub.f32 %v5138_v7, %v3488_v40  ;;  %v3496_v6 = vsub.f32 %v5142_v24, %v3488_v40 }
0x143b   :  { %v3497_v36 = vmul.f32 %v3489_v30, %v3489_v30  ;;  %v3498_v1 = vmul.f32 %v3490_v55, %v3490_v55  ;;  %v3499_v45 = vmul.f32 %v3491_v9, %v3491_v9  ;;  %v3503_v8 = vmul.f32 %v3495_v41, %v3495_v41 }
0x143c   :  { %v3500_v20 = vmul.f32 %v3492_v11, %v3492_v11  ;;  %v3501_v47 = vmul.f32 %v3493_v12, %v3493_v12  ;;  %v3502_v60 = vmul.f32 %v3494_v54, %v3494_v54  ;;  %v3504_v16 = vmul.f32 %v3496_v6, %v3496_v6 }
0x143d   :  { %v3505_v48 = vsel %vm3466_vm5, %v3497_v36, 0.0  ;;  %v3506_v29 = vsel %vm3466_vm5, %v3498_v1, 0.0  ;;  %v3508_v52 = vsel %vm3466_vm5, %v3499_v45, 0.0  ;;  %v3516_v27 = vsel %vm3466_vm5, %v3503_v8, 0.0 }
0x143e   :  { %v3507_v58 = vadd.f32 %v3506_v29, %v3505_v48  ;;  %v3510_v14 = vsel %vm3466_vm5, %v3500_v20, 0.0  ;;  %v3512_v3 = vsel %vm3466_vm5, %v3501_v47, 0.0  ;;  %v3514_v32 = vsel %vm3466_vm5, %v3502_v60, 0.0 }
0x143f   :  { %v3518_v28 = vsel %vm3466_vm5, %v3504_v16, 0.0  ;;  %v3545_v53 = vrot.slane %v6219_v63, %v5459_v56 }
0x1440   :  { %v3509_v59 = vadd.f32 %v3508_v52, %v3507_v58 }
0x1442   :  { %v3511_v0 = vadd.f32 %v3510_v14, %v3509_v59 }
0x1444   :  { %v3513_v39 = vadd.f32 %v3512_v3, %v3511_v0 }
0x1446   :  { %v3515_v31 = vadd.f32 %v3514_v32, %v3513_v39 }
0x1448   :  { %v3517_v43 = vadd.f32 %v3516_v27, %v3515_v31 }
0x144a   :  { %v3519_v22 = vadd.f32 %v3518_v28, %v3517_v43 }
0x144c   :  { %v3520_v26 = vrot.slane %v3519_v22, 4 }
0x144e   :  { %v3521_v7 = vadd.f32 %v3520_v26, %v3519_v22 }
0x1450   :  { %v3522_v25 = vrot.slane %v3521_v7, 2 }
0x1452   :  { %v3523_v35 = vadd.f32 %v3522_v25, %v3521_v7 }
0x1454   :  { %v3524_v50 = vrot.slane %v3523_v35, 1 }
0x1456   :  { %v3525_v51 = vadd.f32 %v3524_v50, %v3523_v35 }
0x1458   :  { %v3526_v17 = vmul.f32 0.015625, %v3525_v51 }
0x145a   :  { %v3527_v4 = vadd.f32 1e-05, %v3526_v17 }
0x145c   :  { %5145 = vrsqrt.f32 %v3527_v4 }
0x1466   :  { %v5146_v23 = vpop.eup %5145 }
0x1467   :  { %v3529_v24 = vmul.f32 %v5146_v23, %v6219_v63 }
0x1469   :  { %v3533_v18 = vrot.slane %v3529_v24, %v5462_v57 }
0x146b   :  { %v3534_v33 = vmul.f32 %v3533_v18, %v3489_v30  ;;  %v3535_v34 = vmul.f32 %v3533_v18, %v3490_v55  ;;  %v3536_v19 = vmul.f32 %v3533_v18, %v3491_v9  ;;  %v3537_v10 = vmul.f32 %v3533_v18, %v3492_v11 }
0x146c   :  { %v3538_v46 = vmul.f32 %v3533_v18, %v3493_v12  ;;  %v3539_v37 = vmul.f32 %v3533_v18, %v3494_v54  ;;  %v3540_v38 = vmul.f32 %v3533_v18, %v3495_v41  ;;  %v3541_v13 = vmul.f32 %v3533_v18, %v3496_v6 }
0x146d   :  { %v3546_v21 = vadd.f32 %v3545_v53, %v3534_v33  ;;  %v3547_v40 = vadd.f32 %v3545_v53, %v3535_v34  ;;  %v3548_v36 = vadd.f32 %v3545_v53, %v3536_v19  ;;  %v3549_v63 = vadd.f32 %v3545_v53, %v3537_v10 }
0x146e   :  { %v3550_v1 = vadd.f32 %v3545_v53, %v3538_v46  ;;  %v3551_v30 = vadd.f32 %v3545_v53, %v3539_v37  ;;  %v3552_v55 = vadd.f32 %v3545_v53, %v3540_v38  ;;  %v3553_v41 = vadd.f32 %v3545_v53, %v3541_v13 }
0x146f   :  { %4647 = vmatprep.mubr.msk.f32.mxu0 %vm3466_vm5, %v3546_v21 }
0x1470   :  { %4648 = vmatmul.mubr.msk.f32.vlgmr.msra.gmra.mrb[112].mxu0 %vm3466_vm5, %v3547_v40 }
0x1471   :  { %4650 = vmatprep.mubr.msk.f32.mxu0 %vm3466_vm5, %v3548_v36 }
0x1474   :  { %4651 = vmatmul.mubr.msk.f32.gmra.mrb[114].mxu0 %vm3466_vm5, %v3549_v63 }
0x1475   :  { %4653 = vmatprep.mubr.msk.f32.mxu0 %vm3466_vm5, %v3550_v1 }
0x1478   :  { %4654 = vmatmul.mubr.msk.f32.gmra.mrb[116].mxu0 %vm3466_vm5, %v3551_v30 }
0x1479   :  { %4656 = vmatprep.mubr.msk.f32.mxu0 %vm3466_vm5, %v3552_v55 }
0x147c   :  { %4657 = vmatmul.mubr.msk.f32.gmra.mrb[118].mxu0 %vm3466_vm5, %v3553_v41 }
0x1543   :  { %v4649_v9 = vpop.f32.mrb[112].mxu0 }
0x1544   :  { %v3649_v11 = vpop.f32.mrb[113].mxu0 }
0x1545   :  { %v4723_v12 = vpack.c.bf16 %v4649_v9, %v3649_v11 }
0x1547   :  { %v4652_v54 = vpop.f32.mrb[114].mxu0  ;;  %4724 = vmatprep.subr.bf16.mxu1 %v4723_v12 }
0x1548   :  { %v3659_v6 = vpop.f32.mrb[115].mxu0  ;;  %4726 = vmatpush3.bf16.msra.mxu1 %v4723_v12 }
0x1549   :  { %v4727_v45 = vpack.c.bf16 %v4652_v54, %v3659_v6 }
0x154b   :  { %v4655_v20 = vpop.f32.mrb[116].mxu0  ;;  %4728 = vmatprep.subr.bf16.mxu1 %v4727_v45 }
0x154c   :  { %v3669_v48 = vpop.f32.mrb[117].mxu0  ;;  %4730 = vmatpush3.bf16.msra.mxu1 %v4727_v45 }
0x154d   :  { %v4731_v29 = vpack.c.bf16 %v4655_v20, %v3669_v48 }
0x154f   :  { %v4658_v58 = vpop.f32.mrb[118].mxu0  ;;  %4732 = vmatprep.subr.bf16.mxu1 %v4731_v29 }
0x1550   :  { %v3679_v47 = vpop.f32.mrb[119].mxu0  ;;  %4734 = vmatpush3.bf16.msra.mxu1 %v4731_v29 }
0x1551   :  { %v4735_v52 = vpack.c.bf16 %v4658_v58, %v3679_v47 }
0x1553   :  { %4736 = vmatprep.subr.bf16.mxu1 %v4735_v52 }
0x1554   :  { %4738 = vmatpush3.bf16.msra.mxu1 %v4735_v52 }
0x1557   :  { %4676 = vmatmul.mubr.msk.f32.vlgmr.msra.gmra.mrb[56].mxu1 %vm70_vm0, %v6167_v15  ;;  %v6268_v15 = vld [vmem:[%s6349_s9 + $0x48] sm:$0x77] }
0x1558   :  { %4678 = vmatprep.mubr.msk.f32.mxu1 %vm70_vm0, %v6174_v62  ;;  %v3693_v62 = vrot.slane %v6268_v15, %v5433_v44 }
0x155b   :  { %4679 = vmatmul.mubr.msk.f32.gmra.mrb[58].mxu1 %vm70_vm0, %v6181_v61 }
0x155c   :  { %4681 = vmatprep.mubr.msk.f32.mxu1 %vm70_vm0, %v6188_v2 }
0x155f   :  { %4682 = vmatmul.mubr.msk.f32.gmra.mrb[60].mxu1 %vm70_vm0, %v6195_v42 }
0x1560   :  { %4684 = vmatprep.mubr.msk.f32.mxu1 %vm70_vm0, %v6202_v5 }
0x1563   :  { %4685 = vmatmul.mubr.msk.f32.gmra.mrb[62].mxu1 %vm70_vm0, %v6209_v49 }
0x162a   :  { %v4677_v61 = vpop.f32.mrb[56].mxu1 }
0x162b   :  { %v3766_v59 = vadd.f32 %v4677_v61, %v3693_v62  ;;  %v3760_v2 = vpop.f32.mrb[57].mxu1 }
0x162c   :  { %v3761_v60 = vadd.f32 %v3760_v2, %v3693_v62 }
0x162d   :  { %v3800_v14 = vsub.f32 0.0, %v3766_v59 }
0x162e   :  { %v3799_v42 = vsub.f32 0.0, %v3761_v60  ;;  %v4680_v0 = vpop.f32.mrb[58].mxu1 }
0x162f   :  { %v3809_v8 = vmul.f32 1.442695, %v3800_v14  ;;  %v3776_v5 = vadd.f32 %v4680_v0, %v3693_v62  ;;  %v3770_v3 = vpop.f32.mrb[59].mxu1 }
0x1630   :  { %v3807_v39 = vmul.f32 1.442695, %v3799_v42  ;;  %v3771_v49 = vadd.f32 %v3770_v3, %v3693_v62 }
0x1631   :  { %5147 = vpow2.f32 %v3809_v8  ;;  %v3802_v16 = vsub.f32 0.0, %v3776_v5 }
0x1632   :  { %5149 = vpow2.f32 %v3807_v39  ;;  %v3801_v32 = vsub.f32 0.0, %v3771_v49  ;;  %v4683_v31 = vpop.f32.mrb[60].mxu1 }
0x1633   :  { %v3813_v27 = vmul.f32 1.442695, %v3802_v16  ;;  %v3786_v43 = vadd.f32 %v4683_v31, %v3693_v62  ;;  %v3780_v44 = vpop.f32.mrb[61].mxu1 }
0x1634   :  { %v3811_v28 = vmul.f32 1.442695, %v3801_v32  ;;  %v3781_v22 = vadd.f32 %v3780_v44, %v3693_v62 }
0x1635   :  { %5151 = vpow2.f32 %v3813_v27  ;;  %v3804_v26 = vsub.f32 0.0, %v3786_v43 }
0x1636   :  { %5153 = vpow2.f32 %v3811_v28  ;;  %v3803_v7 = vsub.f32 0.0, %v3781_v22  ;;  %v4686_v25 = vpop.f32.mrb[62].mxu1 }
0x1637   :  { %v3817_v35 = vmul.f32 1.442695, %v3804_v26  ;;  %v3796_v50 = vadd.f32 %v4686_v25, %v3693_v62  ;;  %v3790_v51 = vpop.f32.mrb[63].mxu1 }
0x1638   :  { %v3815_v17 = vmul.f32 1.442695, %v3803_v7  ;;  %v3791_v4 = vadd.f32 %v3790_v51, %v3693_v62 }
0x1639   :  { %5155 = vpow2.f32 %v3817_v35  ;;  %v3806_v23 = vsub.f32 0.0, %v3796_v50 }
0x163a   :  { %5157 = vpow2.f32 %v3815_v17  ;;  %v3805_v24 = vsub.f32 0.0, %v3791_v4 }
0x163b   :  { %v5148_v53 = vpop.eup %5147  ;;  %v3821_v18 = vmul.f32 1.442695, %v3806_v23 }
0x163c   :  { %v5150_v33 = vpop.eup %5149  ;;  %v3824_v34 = vadd.f32 1.0, %v5148_v53  ;;  %v3819_v19 = vmul.f32 1.442695, %v3805_v24 }
0x163d   :  { %v3823_v10 = vadd.f32 1.0, %v5150_v33  ;;  %5159 = vpow2.f32 %v3821_v18 }
0x163e   :  { %5161 = vrcp.f32 %v3824_v34 }
0x163f   :  { %v5152_v46 = vpop.eup %5151  ;;  %5163 = vrcp.f32 %v3823_v10 }
0x1640   :  { %v5154_v37 = vpop.eup %5153  ;;  %v3826_v38 = vadd.f32 1.0, %v5152_v46  ;;  %5165 = vpow2.f32 %v3819_v19 }
0x1641   :  { %v3825_v13 = vadd.f32 1.0, %v5154_v37 }
0x1642   :  { %5167 = vrcp.f32 %v3826_v38 }
0x1643   :  { %v5156_v21 = vpop.eup %5155  ;;  %5169 = vrcp.f32 %v3825_v13 }
0x1644   :  { %v5158_v40 = vpop.eup %5157  ;;  %v3828_v36 = vadd.f32 1.0, %v5156_v21 }
0x1645   :  { %v3827_v63 = vadd.f32 1.0, %v5158_v40 }
0x1646   :  { %5171 = vrcp.f32 %v3828_v36 }
0x1647   :  { %v5160_v1 = vpop.eup %5159  ;;  %5173 = vrcp.f32 %v3827_v63 }
0x1648   :  { %v5162_v30 = vpop.eup %5161  ;;  %v3830_v55 = vadd.f32 1.0, %v5160_v1 }
0x1649   :  { %v5164_v41 = vpop.eup %5163  ;;  %v3841_v9 = vsel %vm3839_vm6, %v5162_v30, 0.0 }
0x164a   :  { %v5166_v11 = vpop.eup %5165  ;;  %v3840_v12 = vsel %vm3839_vm6, %v5164_v41, 0.0  ;;  %5175 = vrcp.f32 %v3830_v55 }
0x164b   :  { %v3842_v54 = vadd.f32 %v3841_v9, %v3840_v12  ;;  %v3829_v6 = vadd.f32 1.0, %v5166_v11 }
0x164c   :  { %v5168_v45 = vpop.eup %5167 }
0x164d   :  { %v5170_v20 = vpop.eup %5169  ;;  %5177 = vrcp.f32 %v3829_v6  ;;  %v3845_v47 = vsel %vm3839_vm6, %v5168_v45, 0.0 }
0x164e   :  { %v3843_v48 = vsel %vm3839_vm6, %v5170_v20, 0.0 }
0x164f   :  { %v3844_v29 = vadd.f32 %v3843_v48, %v3842_v54 }
0x1650   :  { %v5172_v58 = vpop.eup %5171 }
0x1651   :  { %v5174_v52 = vpop.eup %5173  ;;  %v3846_v62 = vadd.f32 %v3845_v47, %v3844_v29  ;;  %v3849_v2 = vsel %vm3839_vm6, %v5172_v58, 0.0 }
0x1652   :  { %v3847_v61 = vsel %vm3839_vm6, %v5174_v52, 0.0 }
0x1653   :  { %v3848_v59 = vadd.f32 %v3847_v61, %v3846_v62 }
0x1654   :  { %v5176_v14 = vpop.eup %5175 }
0x1655   :  { %v3850_v60 = vadd.f32 %v3849_v2, %v3848_v59  ;;  %v3853_v5 = vsel %vm3839_vm6, %v5176_v14, 0.0 }
0x1657   :  { %v5178_v42 = vpop.eup %5177 }
0x1658   :  { %v3851_v0 = vsel %vm3839_vm6, %v5178_v42, 0.0 }
0x1659   :  { %v3852_v8 = vadd.f32 %v3851_v0, %v3850_v60 }
0x165b   :  { %v3854_v3 = vadd.f32 %v3853_v5, %v3852_v8 }
0x165d   :  { %v3855_v39 = vrot.slane %v3854_v3, 4 }
0x165f   :  { %v3856_v49 = vadd.f32 %v3855_v39, %v3854_v3 }
0x1661   :  { %v3857_v16 = vrot.slane %v3856_v49, 2 }
0x1663   :  { %v3858_v32 = vadd.f32 %v3857_v16, %v3856_v49 }
0x1665   :  { %v3859_v31 = vrot.slane %v3858_v32, 1 }
0x1667   :  { %v3860_v27 = vadd.f32 %v3859_v31, %v3858_v32 }
0x1669   :  { %v3861_v43 = vmul.f32 0.015625, %v3860_v27 }
0x166b   :  { %v3868_v44 = vsub.f32 %v5178_v42, %v3861_v43  ;;  %v3862_v28 = vsub.f32 %v5164_v41, %v3861_v43  ;;  %v3863_v22 = vsub.f32 %v5162_v30, %v3861_v43  ;;  %v3864_v26 = vsub.f32 %v5170_v20, %v3861_v43 }
0x166c   :  { %v3865_v7 = vsub.f32 %v5168_v45, %v3861_v43  ;;  %v3866_v25 = vsub.f32 %v5174_v52, %v3861_v43  ;;  %v3867_v35 = vsub.f32 %v5172_v58, %v3861_v43  ;;  %v3869_v50 = vsub.f32 %v5176_v14, %v3861_v43 }
0x166d   :  { %v3870_v51 = vmul.f32 %v3862_v28, %v3862_v28  ;;  %v3871_v17 = vmul.f32 %v3863_v22, %v3863_v22  ;;  %v3872_v4 = vmul.f32 %v3864_v26, %v3864_v26  ;;  %v3876_v38 = vmul.f32 %v3868_v44, %v3868_v44 }
0x166e   :  { %v3873_v23 = vmul.f32 %v3865_v7, %v3865_v7  ;;  %v3874_v33 = vmul.f32 %v3866_v25, %v3866_v25  ;;  %v3875_v10 = vmul.f32 %v3867_v35, %v3867_v35  ;;  %v3877_v40 = vmul.f32 %v3869_v50, %v3869_v50 }
0x166f   :  { %v3878_v24 = vsel %vm3839_vm6, %v3870_v51, 0.0  ;;  %v3879_v53 = vsel %vm3839_vm6, %v3871_v17, 0.0  ;;  %v3881_v34 = vsel %vm3839_vm6, %v3872_v4, 0.0  ;;  %v3889_v1 = vsel %vm3839_vm6, %v3876_v38, 0.0 }
0x1670   :  { %v3880_v18 = vadd.f32 %v3879_v53, %v3878_v24  ;;  %v3883_v46 = vsel %vm3839_vm6, %v3873_v23, 0.0  ;;  %v3885_v13 = vsel %vm3839_vm6, %v3874_v33, 0.0  ;;  %v3887_v36 = vsel %vm3839_vm6, %v3875_v10, 0.0 }
0x1671   :  { %v3891_v55 = vsel %vm3839_vm6, %v3877_v40, 0.0  ;;  %v3918_v52 = vrot.slane %v6268_v15, %v5459_v56 }
0x1672   :  { %v3882_v19 = vadd.f32 %v3881_v34, %v3880_v18 }
0x1674   :  { %v3884_v37 = vadd.f32 %v3883_v46, %v3882_v19 }
0x1676   :  { %v3886_v21 = vadd.f32 %v3885_v13, %v3884_v37 }
0x1678   :  { %v3888_v63 = vadd.f32 %v3887_v36, %v3886_v21 }
0x167a   :  { %v3890_v30 = vadd.f32 %v3889_v1, %v3888_v63 }
0x167c   :  { %v3892_v41 = vadd.f32 %v3891_v55, %v3890_v30 }
0x167e   :  { %v3893_v9 = vrot.slane %v3892_v41, 4 }
0x1680   :  { %v3894_v11 = vadd.f32 %v3893_v9, %v3892_v41 }
0x1682   :  { %v3895_v12 = vrot.slane %v3894_v11, 2 }
0x1684   :  { %v3896_v54 = vadd.f32 %v3895_v12, %v3894_v11 }
0x1686   :  { %v3897_v6 = vrot.slane %v3896_v54, 1 }
0x1688   :  { %v3898_v45 = vadd.f32 %v3897_v6, %v3896_v54 }
0x168a   :  { %v3899_v20 = vmul.f32 0.015625, %v3898_v45 }
0x168c   :  { %v3900_v48 = vadd.f32 1e-05, %v3899_v20 }
0x168e   :  { %5179 = vrsqrt.f32 %v3900_v48 }
0x1698   :  { %v5180_v29 = vpop.eup %5179 }
0x1699   :  { %v3902_v58 = vmul.f32 %v5180_v29, %v6268_v15 }
0x169b   :  { %v3906_v47 = vrot.slane %v3902_v58, %v5462_v57 }
0x169d   :  { %v3909_v62 = vmul.f32 %v3906_v47, %v3864_v26  ;;  %v3907_v61 = vmul.f32 %v3906_v47, %v3862_v28  ;;  %v3910_v59 = vmul.f32 %v3906_v47, %v3865_v7  ;;  %v3908_v2 = vmul.f32 %v3906_v47, %v3863_v22 }
0x169e   :  { %v3912_v60 = vmul.f32 %v3906_v47, %v3867_v35  ;;  %v3911_v14 = vmul.f32 %v3906_v47, %v3866_v25  ;;  %v3914_v42 = vmul.f32 %v3906_v47, %v3869_v50  ;;  %v3913_v0 = vmul.f32 %v3906_v47, %v3868_v44 }
0x169f   :  { %v3921_v8 = vadd.f32 %v3918_v52, %v3909_v62  ;;  %v3919_v5 = vadd.f32 %v3918_v52, %v3907_v61  ;;  %v3922_v49 = vadd.f32 %v3918_v52, %v3910_v59  ;;  %v3920_v16 = vadd.f32 %v3918_v52, %v3908_v2 }
0x16a0   :  { %v3924_v15 = vadd.f32 %v3918_v52, %v3912_v60  ;;  %v3923_v32 = vadd.f32 %v3918_v52, %v3911_v14  ;;  %v3926_v43 = vadd.f32 %v3918_v52, %v3914_v42  ;;  %v3925_v44 = vadd.f32 %v3918_v52, %v3913_v0 }
0x16a1   :  { %v3933_v3 = vsel %vm3839_vm6, %v3921_v8, -inf  ;;  %v3927_v39 = vsel %vm3839_vm6, %v3919_v5, -inf  ;;  %v3936_v56 = vsel %vm3839_vm6, %v3922_v49, -inf  ;;  %v3930_v57 = vsel %vm3839_vm6, %v3920_v16, -inf }
0x16a2   :  { %3934 = vmax.xlane.f32.xlu1 %v3933_v3  ;;  %3928 = vmax.xlane.f32.xlu0 %v3927_v39  ;;  %v3942_v31 = vsel %vm3839_vm6, %v3924_v15, -inf  ;;  %v3939_v27 = vsel %vm3839_vm6, %v3923_v32, -inf  ;;  %v3948_v28 = vsel %vm3839_vm6, %v3926_v43, -inf  ;;  %v3945_v22 = vsel %vm3839_vm6, %v3925_v44, -inf }
0x16a6   :  { %3937 = vmax.xlane.f32.xlu1 %v3936_v56  ;;  %3931 = vmax.xlane.f32.xlu0 %v3930_v57 }
0x16aa   :  { %3943 = vmax.xlane.f32.xlu1 %v3942_v31  ;;  %3940 = vmax.xlane.f32.xlu0 %v3939_v27 }
0x16ae   :  { %3949 = vmax.xlane.f32.xlu1 %v3948_v28  ;;  %3946 = vmax.xlane.f32.xlu0 %v3945_v22 }
0x172f   :  { %v3935_v26 = vpop.xlane.xlu1 %3934  ;;  %v3929_v7 = vpop.xlane.xlu0 %3928 }
0x1730   :  { %v3953_v25 = vsub.f32 %v3921_v8, %v3935_v26  ;;  %v3951_v35 = vsub.f32 %v3919_v5, %v3929_v7 }
0x1732   :  { %v3959_v50 = vmul.f32 1.442695, %v3951_v35  ;;  %v3963_v51 = vmul.f32 1.442695, %v3953_v25 }
0x1733   :  { %v3938_v17 = vpop.xlane.xlu1 %3937  ;;  %v3932_v4 = vpop.xlane.xlu0 %3931 }
0x1734   :  { %v3954_v23 = vsub.f32 %v3922_v49, %v3938_v17  ;;  %v3952_v24 = vsub.f32 %v3920_v16, %v3932_v4  ;;  %5181 = vpow2.f32 %v3959_v50 }
0x1735   :  { %5183 = vpow2.f32 %v3963_v51 }
0x1736   :  { %v3961_v53 = vmul.f32 1.442695, %v3952_v24  ;;  %v3965_v18 = vmul.f32 1.442695, %v3954_v23 }
0x1737   :  { %v3944_v33 = vpop.xlane.xlu1 %3943  ;;  %v3941_v34 = vpop.xlane.xlu0 %3940 }
0x1738   :  { %v3956_v19 = vsub.f32 %v3924_v15, %v3944_v33  ;;  %v3955_v10 = vsub.f32 %v3923_v32, %v3941_v34  ;;  %5185 = vpow2.f32 %v3961_v53 }
0x1739   :  { %5187 = vpow2.f32 %v3965_v18 }
0x173a   :  { %v3967_v46 = vmul.f32 1.442695, %v3955_v10  ;;  %v3969_v37 = vmul.f32 1.442695, %v3956_v19 }
0x173b   :  { %v3950_v38 = vpop.xlane.xlu1 %3949  ;;  %v3947_v13 = vpop.xlane.xlu0 %3946 }
0x173c   :  { %v3958_v21 = vsub.f32 %v3926_v43, %v3950_v38  ;;  %v3957_v40 = vsub.f32 %v3925_v44, %v3947_v13  ;;  %5189 = vpow2.f32 %v3967_v46 }
0x173d   :  { %5191 = vpow2.f32 %v3969_v37 }
0x173e   :  { %v3971_v36 = vmul.f32 1.442695, %v3957_v40  ;;  %v5182_v63 = vpop.eup %5181  ;;  %v3973_v1 = vmul.f32 1.442695, %v3958_v21 }
0x173f   :  { %v3975_v30 = vsel %vm3839_vm6, %v5182_v63, 0.0  ;;  %v5184_v55 = vpop.eup %5183 }
0x1740   :  { %5193 = vpow2.f32 %v3971_v36  ;;  %3976 = vadd.xlane.f32.xlu0 %v3975_v30  ;;  %v3981_v9 = vsel %vm3839_vm6, %v5184_v55, 0.0 }
0x1741   :  { %5195 = vpow2.f32 %v3973_v1 }
0x1742   :  { %v5186_v41 = vpop.eup %5185 }
0x1743   :  { %v3978_v11 = vsel %vm3839_vm6, %v5186_v41, 0.0  ;;  %v5188_v12 = vpop.eup %5187 }
0x1744   :  { %3982 = vadd.xlane.f32.xlu0 %v3981_v9  ;;  %3979 = vadd.xlane.f32.xlu1 %v3978_v11  ;;  %v3984_v6 = vsel %vm3839_vm6, %v5188_v12, 0.0 }
0x1746   :  { %v5190_v54 = vpop.eup %5189 }
0x1747   :  { %v3987_v45 = vsel %vm3839_vm6, %v5190_v54, 0.0  ;;  %v5192_v20 = vpop.eup %5191 }
0x1748   :  { %3985 = vadd.xlane.f32.xlu1 %v3984_v6  ;;  %3988 = vadd.xlane.f32.xlu0 %v3987_v45  ;;  %v3990_v29 = vsel %vm3839_vm6, %v5192_v20, 0.0 }
0x174a   :  { %v5194_v48 = vpop.eup %5193 }
0x174b   :  { %v3993_v58 = vsel %vm3839_vm6, %v5194_v48, 0.0  ;;  %v5196_v47 = vpop.eup %5195 }
0x174c   :  { %3991 = vadd.xlane.f32.xlu1 %v3990_v29  ;;  %3994 = vadd.xlane.f32.xlu0 %v3993_v58  ;;  %v3996_v52 = vsel %vm3839_vm6, %v5196_v47, 0.0 }
0x1750   :  { %3997 = vadd.xlane.f32.xlu1 %v3996_v52 }
0x17cd   :  { %v3977_v62 = vpop.xlane.xlu0 %3976 }
0x17ce   :  { %5197 = vrcp.f32 %v3977_v62 }
0x17d1   :  { %v3980_v61 = vpop.xlane.xlu1 %3979  ;;  %v3983_v59 = vpop.xlane.xlu0 %3982 }
0x17d2   :  { %5199 = vrcp.f32 %v3980_v61 }
0x17d3   :  { %5201 = vrcp.f32 %v3983_v59 }
0x17d5   :  { %v3986_v2 = vpop.xlane.xlu1 %3985  ;;  %v3989_v60 = vpop.xlane.xlu0 %3988 }
0x17d6   :  { %5203 = vrcp.f32 %v3986_v2 }
0x17d7   :  { %5205 = vrcp.f32 %v3989_v60 }
0x17d8   :  { %v5198_v14 = vpop.eup %5197 }
0x17d9   :  { %v4000_v42 = vmul.f32 %v5198_v14, %v5182_v63  ;;  %v3992_v0 = vpop.xlane.xlu1 %3991  ;;  %v3995_v8 = vpop.xlane.xlu0 %3994 }
0x17da   :  { %5207 = vrcp.f32 %v3992_v0 }
0x17db   :  { %4015 = vst.msk [vmem:[%s6350_s10] sm:$0xff] %vm3839_vm6, %v4000_v42  ;;  %5209 = vrcp.f32 %v3995_v8 }
0x17dc   :  { %v5200_v5 = vpop.eup %5199 }
0x17dd   :  { %v5202_v3 = vpop.eup %5201  ;;  %v4002_v39 = vmul.f32 %v5200_v5, %v5186_v41  ;;  %v3998_v49 = vpop.xlane.xlu1 %3997 }
0x17de   :  { %v4004_v16 = vmul.f32 %v5202_v3, %v5184_v55  ;;  %5211 = vrcp.f32 %v3998_v49 }
0x17df   :  { %4016 = vst.msk [vmem:[%s6350_s10 + $0x8] sm:$0xff] %vm3839_vm6, %v4002_v39 }
0x17e0   :  { %v5204_v56 = vpop.eup %5203  ;;  %4017 = vst.msk [vmem:[%s6350_s10 + $0x10] sm:$0xff] %vm3839_vm6, %v4004_v16 }
0x17e1   :  { %v5206_v57 = vpop.eup %5205  ;;  %v4006_v15 = vmul.f32 %v5204_v56, %v5188_v12 }
0x17e2   :  { %v4008_v32 = vmul.f32 %v5206_v57, %v5190_v54 }
0x17e3   :  { %4018 = vst.msk [vmem:[%s6350_s10 + $0x18] sm:$0xff] %vm3839_vm6, %v4006_v15 }
0x17e4   :  { %v5208_v31 = vpop.eup %5207  ;;  %4019 = vst.msk [vmem:[%s6350_s10 + $0x20] sm:$0xff] %vm3839_vm6, %v4008_v32 }
0x17e5   :  { %v5210_v27 = vpop.eup %5209  ;;  %v4010_v43 = vmul.f32 %v5208_v31, %v5192_v20 }
0x17e6   :  { %v4012_v44 = vmul.f32 %v5210_v27, %v5194_v48 }
0x17e7   :  { %4020 = vst.msk [vmem:[%s6350_s10 + $0x28] sm:$0xff] %vm3839_vm6, %v4010_v43 }
0x17e8   :  { %v5212_v28 = vpop.eup %5211  ;;  %4021 = vst.msk [vmem:[%s6350_s10 + $0x30] sm:$0xff] %vm3839_vm6, %v4012_v44 }
0x17e9   :  { %v4014_v22 = vmul.f32 %v5212_v28, %v5196_v47 }
0x17eb   :  { %4022 = vst.msk [vmem:[%s6350_s10 + $0x38] sm:$0xff] %vm3839_vm6, %v4014_v22 }
0x17ec   :  { %4027 = vsyncpa [#allocation3], 1 }

</bundles_post_ra>
